<compile_context>
chip_gen: v6e
topology: v6e:2x2x1
jax: 0.10.0
libtpu: 0.0.40
codegen_flags: <defaults>
</compile_context>

<pallas_src>
import math

import jax
import jax.numpy as jnp
from jax.experimental import pallas as pl
from jax.experimental.pallas import tpu as pltpu

MAX_TILE_B = 256        # max batch tile: matches 256x256 MXU (v6e/v7x), multiple of 128 for v5e
D_IN = 3 * 32 * 32      # 3072
D_H1 = 512
D_H2 = 256
D_H3 = 84
D_H3_PAD = 128          # fc3 output padded to a lane-dense width
D_OUT = 10
D_OUT_PAD = 128         # fc4 output padded to a lane-dense width


def mlp_kernel(x_ref, w1_ref, b1_ref, w2_ref, b2_ref, w3_ref, b3_ref,
               w4_ref, b4_ref, o_ref):
    """One batch tile: 3 x (bf16 matmul + f32 bias + relu) + final matmul + bias."""
    x = x_ref[...]  # (tile_b, 3072) bf16

    h = jnp.dot(x, w1_ref[...], preferred_element_type=jnp.float32) + b1_ref[...]
    h = jnp.maximum(h, 0.0).astype(jnp.bfloat16)

    h = jnp.dot(h, w2_ref[...], preferred_element_type=jnp.float32) + b2_ref[...]
    h = jnp.maximum(h, 0.0).astype(jnp.bfloat16)

    h = jnp.dot(h, w3_ref[...], preferred_element_type=jnp.float32) + b3_ref[...]
    h = jnp.maximum(h, 0.0).astype(jnp.bfloat16)

    o_ref[...] = (jnp.dot(h, w4_ref[...], preferred_element_type=jnp.float32)
                  + b4_ref[...]).astype(o_ref.dtype)


def _round_up(n, m):
    return ((n + m - 1) // m) * m


@jax.jit
def net_forward(x, w1, b1, w2, b2, w3, b3, w4, b4):
    """x: (B, 3, 32, 32) float32 -> logits (B, 10) float32."""
    B = x.shape[0]
    x_flat = x.reshape(B, -1).astype(jnp.bfloat16)           # row-major == torch .view

    # Adaptive batch tile: don't pad tiny batches all the way up to 256 rows.
    # (16-row multiple keeps bf16 sublane packing happy; block == full padded
    #  batch when there is only one tile.)
    tile_b = min(MAX_TILE_B, _round_up(B, 16))
    n_tiles = pl.cdiv(B, tile_b)
    B_pad = n_tiles * tile_b
    if B_pad != B:
        x_flat = jnp.pad(x_flat, ((0, B_pad - B), (0, 0)))

    # Zero-pad the narrow layers to lane-dense widths (mathematical identity).
    w3p = jnp.pad(w3, ((0, 0), (0, D_H3_PAD - D_H3)))
    b3p = jnp.pad(b3, (0, D_H3_PAD - D_H3))
    w4p = jnp.pad(w4, ((0, D_H3_PAD - D_H3), (0, D_OUT_PAD - D_OUT)))
    b4p = jnp.pad(b4, (0, D_OUT_PAD - D_OUT))

    # Weights in bf16 (f32 accumulation inside the kernel); biases stay f32 as (1, N).
    w1b = w1.astype(jnp.bfloat16)
    w2b = w2.astype(jnp.bfloat16)
    w3b = w3p.astype(jnp.bfloat16)
    w4b = w4p.astype(jnp.bfloat16)
    b1r, b2r, b3r, b4r = (b.reshape(1, -1) for b in (b1, b2, b3p, b4p))

    def resident(shape):
        # Weight / bias blocks: same block every grid step -> stay resident in VMEM.
        return pl.BlockSpec(shape, lambda i: (0, 0))

    flops = 2 * B_pad * (D_IN * D_H1 + D_H1 * D_H2 + D_H2 * D_H3_PAD
                         + D_H3_PAD * D_OUT_PAD)
    bytes_accessed = (
        x_flat.size * 2
        + (w1b.size + w2b.size + w3b.size + w4b.size) * 2
        + (b1r.size + b2r.size + b3r.size + b4r.size) * 4
        + B_pad * D_OUT_PAD * 4)

    out = pl.pallas_call(
        mlp_kernel,
        out_shape=jax.ShapeDtypeStruct((B_pad, D_OUT_PAD), jnp.float32),
        grid_spec=pltpu.PrefetchScalarGridSpec(
            num_scalar_prefetch=0,
            grid=(n_tiles,),
            in_specs=[
                pl.BlockSpec((tile_b, D_IN), lambda i: (i, 0)),   # streamed batch tile
                resident((D_IN, D_H1)), resident((1, D_H1)),
                resident((D_H1, D_H2)), resident((1, D_H2)),
                resident((D_H2, D_H3_PAD)), resident((1, D_H3_PAD)),
                resident((D_H3_PAD, D_OUT_PAD)), resident((1, D_OUT_PAD)),
            ],
            out_specs=pl.BlockSpec((tile_b, D_OUT_PAD), lambda i: (i, 0)),
        ),
        compiler_params=pltpu.CompilerParams(
            dimension_semantics=("parallel",),   # megacore split of batch tiles on v7x
        ),
        cost_estimate=pl.CostEstimate(
            flops=flops, transcendentals=0, bytes_accessed=bytes_accessed),
    )(x_flat, w1b, b1r, w2b, b2r, w3b, b3r, w4b, b4r)

    return out[:B, :D_OUT]


def init_linear(key, fan_in, fan_out):
    """Deterministic init mimicking PyTorch nn.Linear default U(-1/sqrt(fan_in), +)."""
    kw, kb = jax.random.split(key)
    bound = 1.0 / math.sqrt(fan_in)
    # stored as (in, out) == PyTorch weight.T
    w = jax.random.uniform(kw, (fan_in, fan_out), jnp.float32, -bound, bound)
    b = jax.random.uniform(kb, (fan_out,), jnp.float32, -bound, bound)
    return w, b


if __name__ == "__main__":
    key = jax.random.PRNGKey(0)
    k_x, k1, k2, k3, k4 = jax.random.split(key, 5)

    # Small batch, but feature dims are fixed by the module (fc1 expects 3*32*32).
    B = 2
    x = jax.random.normal(k_x, (B, 3, 32, 32), jnp.float32)

    w1, b1 = init_linear(k1, D_IN, D_H1)
    w2, b2 = init_linear(k2, D_H1, D_H2)
    w3, b3 = init_linear(k3, D_H2, D_H3)
    w4, b4 = init_linear(k4, D_H3, D_OUT)

    logits = net_forward(x, w1, b1, w2, b2, w3, b3, w4, b4)
    logits = jax.block_until_ready(logits)
    assert logits.shape == (B, D_OUT)

    # Reference with the same bf16 weight/activation casts and f32 accumulation.
    xf = x.reshape(B, -1).astype(jnp.bfloat16)
    h = jnp.maximum(jnp.dot(xf, w1.astype(jnp.bfloat16),
                            preferred_element_type=jnp.float32) + b1, 0.0)
    h = jnp.maximum(jnp.dot(h.astype(jnp.bfloat16), w2.astype(jnp.bfloat16),
                            preferred_element_type=jnp.float32) + b2, 0.0)
    h = jnp.maximum(jnp.dot(h.astype(jnp.bfloat16), w3.astype(jnp.bfloat16),
                            preferred_element_type=jnp.float32) + b3, 0.0)
    ref = jnp.dot(h.astype(jnp.bfloat16), w4.astype(jnp.bfloat16),
                  preferred_element_type=jnp.float32) + b4
    assert jnp.allclose(logits, ref, atol=1e-2, rtol=1e-2), "mismatch vs reference"

    # Sanity vs. full-f32 math (loose: bf16 quantization of inputs/weights).
    rf = jnp.maximum(x.reshape(B, -1) @ w1 + b1, 0.0)
    rf = jnp.maximum(rf @ w2 + b2, 0.0)
    rf = jnp.maximum(rf @ w3 + b3, 0.0)
    rf = rf @ w4 + b4
    assert jnp.allclose(logits, rf, atol=5e-2, rtol=5e-2), "mismatch vs f32 reference"

    print("KERNEL_OK")
</pallas_src>

<mosaic_0001>
module attributes {stable_mosaic.version = 11 : i64} {
  func.func @mlp_kernel(%arg0: i32, %arg1: memref<16x3072xbf16, #tpu.memory_space<vmem>>, %arg2: memref<3072x512xbf16, #tpu.memory_space<vmem>>, %arg3: memref<1x512xf32, #tpu.memory_space<vmem>>, %arg4: memref<512x256xbf16, #tpu.memory_space<vmem>>, %arg5: memref<1x256xf32, #tpu.memory_space<vmem>>, %arg6: memref<256x128xbf16, #tpu.memory_space<vmem>>, %arg7: memref<1x128xf32, #tpu.memory_space<vmem>>, %arg8: memref<128x128xbf16, #tpu.memory_space<vmem>>, %arg9: memref<1x128xf32, #tpu.memory_space<vmem>>, %arg10: memref<16x128xf32, #tpu.memory_space<vmem>>) attributes {dimension_semantics = [#tpu.dimension_semantics<parallel>], iteration_bounds = array<i64: 1>, scalar_prefetch = 0 : i64, scratch_operands = 0 : i64, tpu.core_type = #tpu.core_type<tc>, window_params = [{transform_indices = @transform_0, window_bounds = array<i64: 16, 3072>}, {pipeline_mode = #tpu.pipeline_mode<synchronous>, transform_indices = @transform_1, window_bounds = array<i64: 3072, 512>}, {pipeline_mode = #tpu.pipeline_mode<synchronous>, transform_indices = @transform_2, window_bounds = array<i64: 1, 512>}, {pipeline_mode = #tpu.pipeline_mode<synchronous>, transform_indices = @transform_3, window_bounds = array<i64: 512, 256>}, {pipeline_mode = #tpu.pipeline_mode<synchronous>, transform_indices = @transform_4, window_bounds = array<i64: 1, 256>}, {pipeline_mode = #tpu.pipeline_mode<synchronous>, transform_indices = @transform_5, window_bounds = array<i64: 256, 128>}, {pipeline_mode = #tpu.pipeline_mode<synchronous>, transform_indices = @transform_6, window_bounds = array<i64: 1, 128>}, {pipeline_mode = #tpu.pipeline_mode<synchronous>, transform_indices = @transform_7, window_bounds = array<i64: 128, 128>}, {pipeline_mode = #tpu.pipeline_mode<synchronous>, transform_indices = @transform_8, window_bounds = array<i64: 1, 128>}, {transform_indices = @transform_9, window_bounds = array<i64: 16, 128>}]} {
    %c0 = arith.constant 0 : index
    %c0_0 = arith.constant 0 : index
    %0 = vector.load %arg1[%c0, %c0_0] : memref<16x3072xbf16, #tpu.memory_space<vmem>>, vector<16x3072xbf16>
    %c0_1 = arith.constant 0 : index
    %c0_2 = arith.constant 0 : index
    %1 = vector.load %arg2[%c0_1, %c0_2] : memref<3072x512xbf16, #tpu.memory_space<vmem>>, vector<3072x512xbf16>
    %cst = arith.constant dense<0.000000e+00> : vector<16x512xf32>
    %2 = tpu.matmul %0, %1, %cst {dimension_numbers = #tpu.dot_dimension_numbers<[1], [0], [0], [1], [0, 0, 1, 1], [], []>} : vector<16x3072xbf16>, vector<3072x512xbf16>, vector<16x512xf32> -> vector<16x512xf32>
    %c0_3 = arith.constant 0 : index
    %c0_4 = arith.constant 0 : index
    %3 = vector.load %arg3[%c0_3, %c0_4] : memref<1x512xf32, #tpu.memory_space<vmem>>, vector<1x512xf32>
    %4 = vector.broadcast %3 : vector<1x512xf32> to vector<16x512xf32>
    %5 = arith.addf %2, %4 : vector<16x512xf32>
    %cst_5 = arith.constant 0.000000e+00 : f32
    %6 = vector.broadcast %cst_5 : f32 to vector<16x512xf32>
    %7 = arith.maximumf %5, %6 : vector<16x512xf32>
    %8 = arith.truncf %7 : vector<16x512xf32> to vector<16x512xbf16>
    %c0_6 = arith.constant 0 : index
    %c0_7 = arith.constant 0 : index
    %9 = vector.load %arg4[%c0_6, %c0_7] : memref<512x256xbf16, #tpu.memory_space<vmem>>, vector<512x256xbf16>
    %cst_8 = arith.constant dense<0.000000e+00> : vector<16x256xf32>
    %10 = tpu.matmul %8, %9, %cst_8 {dimension_numbers = #tpu.dot_dimension_numbers<[1], [0], [0], [1], [0, 0, 1, 1], [], []>} : vector<16x512xbf16>, vector<512x256xbf16>, vector<16x256xf32> -> vector<16x256xf32>
    %c0_9 = arith.constant 0 : index
    %c0_10 = arith.constant 0 : index
    %11 = vector.load %arg5[%c0_9, %c0_10] : memref<1x256xf32, #tpu.memory_space<vmem>>, vector<1x256xf32>
    %12 = vector.broadcast %11 : vector<1x256xf32> to vector<16x256xf32>
    %13 = arith.addf %10, %12 : vector<16x256xf32>
    %cst_11 = arith.constant 0.000000e+00 : f32
    %14 = vector.broadcast %cst_11 : f32 to vector<16x256xf32>
    %15 = arith.maximumf %13, %14 : vector<16x256xf32>
    %16 = arith.truncf %15 : vector<16x256xf32> to vector<16x256xbf16>
    %c0_12 = arith.constant 0 : index
    %c0_13 = arith.constant 0 : index
    %17 = vector.load %arg6[%c0_12, %c0_13] : memref<256x128xbf16, #tpu.memory_space<vmem>>, vector<256x128xbf16>
    %cst_14 = arith.constant dense<0.000000e+00> : vector<16x128xf32>
    %18 = tpu.matmul %16, %17, %cst_14 {dimension_numbers = #tpu.dot_dimension_numbers<[1], [0], [0], [1], [0, 0, 1, 1], [], []>} : vector<16x256xbf16>, vector<256x128xbf16>, vector<16x128xf32> -> vector<16x128xf32>
    %c0_15 = arith.constant 0 : index
    %c0_16 = arith.constant 0 : index
    %19 = vector.load %arg7[%c0_15, %c0_16] : memref<1x128xf32, #tpu.memory_space<vmem>>, vector<1x128xf32>
    %20 = vector.broadcast %19 : vector<1x128xf32> to vector<16x128xf32>
    %21 = arith.addf %18, %20 : vector<16x128xf32>
    %cst_17 = arith.constant 0.000000e+00 : f32
    %22 = vector.broadcast %cst_17 : f32 to vector<16x128xf32>
    %23 = arith.maximumf %21, %22 : vector<16x128xf32>
    %24 = arith.truncf %23 : vector<16x128xf32> to vector<16x128xbf16>
    %c0_18 = arith.constant 0 : index
    %c0_19 = arith.constant 0 : index
    %25 = vector.load %arg8[%c0_18, %c0_19] : memref<128x128xbf16, #tpu.memory_space<vmem>>, vector<128x128xbf16>
    %cst_20 = arith.constant dense<0.000000e+00> : vector<16x128xf32>
    %26 = tpu.matmul %24, %25, %cst_20 {dimension_numbers = #tpu.dot_dimension_numbers<[1], [0], [0], [1], [0, 0, 1, 1], [], []>} : vector<16x128xbf16>, vector<128x128xbf16>, vector<16x128xf32> -> vector<16x128xf32>
    %c0_21 = arith.constant 0 : index
    %c0_22 = arith.constant 0 : index
    %27 = vector.load %arg9[%c0_21, %c0_22] : memref<1x128xf32, #tpu.memory_space<vmem>>, vector<1x128xf32>
    %28 = vector.broadcast %27 : vector<1x128xf32> to vector<16x128xf32>
    %29 = arith.addf %26, %28 : vector<16x128xf32>
    %c0_23 = arith.constant 0 : index
    %c0_24 = arith.constant 0 : index
    %30 = vector.load %arg10[%c0_23, %c0_24] : memref<16x128xf32, #tpu.memory_space<vmem>>, vector<16x128xf32>
    tpu.vector_store %arg10[%c0_23, %c0_24], %29 {strides = array<i32>} : memref<16x128xf32, #tpu.memory_space<vmem>>, vector<16x128xf32>,
    return
  }
  func.func @transform_0(%arg0: i32) -> (i32, i32) {
    %c0_i32 = arith.constant 0 : i32
    %c0_i32_0 = arith.constant 0 : i32
    return %arg0, %c0_i32 : i32, i32
  }
  func.func @transform_1(%arg0: i32) -> (i32, i32) {
    %c0_i32 = arith.constant 0 : i32
    %c0_i32_0 = arith.constant 0 : i32
    %c0_i32_1 = arith.constant 0 : i32
    return %c0_i32, %c0_i32_0 : i32, i32
  }
  func.func @transform_2(%arg0: i32) -> (i32, i32) {
    %c0_i32 = arith.constant 0 : i32
    %c0_i32_0 = arith.constant 0 : i32
    %c0_i32_1 = arith.constant 0 : i32
    return %c0_i32, %c0_i32_0 : i32, i32
  }
  func.func @transform_3(%arg0: i32) -> (i32, i32) {
    %c0_i32 = arith.constant 0 : i32
    %c0_i32_0 = arith.constant 0 : i32
    %c0_i32_1 = arith.constant 0 : i32
    return %c0_i32, %c0_i32_0 : i32, i32
  }
  func.func @transform_4(%arg0: i32) -> (i32, i32) {
    %c0_i32 = arith.constant 0 : i32
    %c0_i32_0 = arith.constant 0 : i32
    %c0_i32_1 = arith.constant 0 : i32
    return %c0_i32, %c0_i32_0 : i32, i32
  }
  func.func @transform_5(%arg0: i32) -> (i32, i32) {
    %c0_i32 = arith.constant 0 : i32
    %c0_i32_0 = arith.constant 0 : i32
    %c0_i32_1 = arith.constant 0 : i32
    return %c0_i32, %c0_i32_0 : i32, i32
  }
  func.func @transform_6(%arg0: i32) -> (i32, i32) {
    %c0_i32 = arith.constant 0 : i32
    %c0_i32_0 = arith.constant 0 : i32
    %c0_i32_1 = arith.constant 0 : i32
    return %c0_i32, %c0_i32_0 : i32, i32
  }
  func.func @transform_7(%arg0: i32) -> (i32, i32) {
    %c0_i32 = arith.constant 0 : i32
    %c0_i32_0 = arith.constant 0 : i32
    %c0_i32_1 = arith.constant 0 : i32
    return %c0_i32, %c0_i32_0 : i32, i32
  }
  func.func @transform_8(%arg0: i32) -> (i32, i32) {
    %c0_i32 = arith.constant 0 : i32
    %c0_i32_0 = arith.constant 0 : i32
    %c0_i32_1 = arith.constant 0 : i32
    return %c0_i32, %c0_i32_0 : i32, i32
  }
  func.func @transform_9(%arg0: i32) -> (i32, i32) {
    %c0_i32 = arith.constant 0 : i32
    %c0_i32_0 = arith.constant 0 : i32
    return %arg0, %c0_i32 : i32, i32
  }
}

</mosaic_0001>

<bundles_post_ra>
// kernel: net_forward.1
= control target key start
LH: loop header
LB: loop body
LE: loop exit
PB: predicated region body
PF: predicated region fallthrough
CT: control target
= control target key end

     0   :  { %vm8845_vm0 = vmmov 0   ;;  %s11851_s1 = inlined_call_operand.vmem [shape: bf16[3072,512], index: 1, kind: input, shape index: {}]   ;;  %s11852_s0 = inlined_call_operand.vmem [shape: bf16[16,3072], index: 0, kind: input, shape index: {}]   ;;  %s11853_s2 = inlined_call_operand.vmem [shape: f32[1,512], index: 2, kind: input, shape index: {}]   ;;  %s11854_s3 = inlined_call_operand.vmem [shape: bf16[512,256], index: 3, kind: input, shape index: {}]   ;;  %s11855_s5 = inlined_call_operand.vmem [shape: bf16[256,128], index: 5, kind: input, shape index: {}]   ;;  %s11856_s7 = inlined_call_operand.vmem [shape: bf16[128,128], index: 7, kind: input, shape index: {}]   ;;  %s11857_s4 = inlined_call_operand.vmem [shape: f32[1,256], index: 4, kind: input, shape index: {}]   ;;  %s11858_s6 = inlined_call_operand.vmem [shape: f32[1,128], index: 6, kind: input, shape index: {}]   ;;  %s11859_s8 = inlined_call_operand.vmem [shape: f32[1,128], index: 8, kind: input, shape index: {}]   ;;  %s11860_s9 = inlined_call_operand.vmem [shape: f32[16,128], index: 9, kind: output, shape index: {}]  }
   0x1   :  { %v7571_v0 = vld [vmem:[%s11851_s1 + $0xe4] ss:$16 sps:$4 sm:$0xff]   ;;  %v7575_v2 = vld [vmem:[%s11851_s1 + $0xe0] ss:$16 sps:$4 sm:$0xff]   ;;  %v34_v50 = vld [vmem:[%s11852_s0 + $0x8] sm:$0xff] }
   0x2   :  { %v7573_v1 = vld [vmem:[%s11851_s1 + $0x2e4] ss:$16 sps:$4 sm:$0xff]   ;;  %4807 = vmatprep.subr.bf16.mxu0 %v7571_v0  ;;  %v7576_v3 = vld [vmem:[%s11851_s1 + $0x2e0] ss:$16 sps:$4 sm:$0xff]   ;;  %v46_v51 = vld [vmem:[%s11852_s0 + $0x68] sm:$0xff] }
   0x3   :  { %4850 = vmatprep.subr.bf16.mxu1 %v7573_v1  ;;  %v7577_v4 = vld [vmem:[%s11851_s1 + $0xc4] ss:$16 sps:$4 sm:$0xff]   ;;  %4808 = vmatpush1.bf16.msra.mxu0 %v7575_v2  ;;  %v7581_v6 = vld [vmem:[%s11851_s1 + $0xc0] ss:$16 sps:$4 sm:$0xff]   ;;  %v9060_v55 = vcombine.high %v34_v50, %v46_v51 }
   0x4   :  { %4851 = vmatpush1.bf16.msra.mxu1 %v7576_v3  ;;  %v7579_v5 = vld [vmem:[%s11851_s1 + $0x2c4] ss:$16 sps:$4 sm:$0xff]   ;;  %4809 = vmatprep.subr.bf16.mxu0 %v7577_v4  ;;  %v7582_v7 = vld [vmem:[%s11851_s1 + $0x2c0] ss:$16 sps:$4 sm:$0xff]  }
   0x5   :  { %4852 = vmatprep.subr.bf16.mxu1 %v7579_v5  ;;  %v7583_v8 = vld [vmem:[%s11851_s1 + $0xa4] ss:$16 sps:$4 sm:$0xff]   ;;  %v7587_v10 = vld [vmem:[%s11851_s1 + $0xa0] ss:$16 sps:$4 sm:$0xff]   ;;  %4882 = vmatprep.mubr.bf16.mxu1 %v9060_v55 }
   0x6   :  { %v7585_v9 = vld [vmem:[%s11851_s1 + $0x2a4] ss:$16 sps:$4 sm:$0xff]   ;;  %v7588_v11 = vld [vmem:[%s11851_s1 + $0x2a0] ss:$16 sps:$4 sm:$0xff]  }
   0x7   :  { %4810 = vmatpush1.bf16.msra.mxu0 %v7581_v6  ;;  %v7589_v12 = vld [vmem:[%s11851_s1 + $0x84] ss:$16 sps:$4 sm:$0xff]   ;;  %v7593_v14 = vld [vmem:[%s11851_s1 + $0x80] ss:$16 sps:$4 sm:$0xff]  }
   0x8   :  { %4853 = vmatpush1.bf16.msra.mxu1 %v7582_v7  ;;  %4811 = vmatprep.subr.bf16.mxu0 %v7583_v8  ;;  %v7591_v13 = vld [vmem:[%s11851_s1 + $0x284] ss:$16 sps:$4 sm:$0xff]   ;;  %v7594_v15 = vld [vmem:[%s11851_s1 + $0x280] ss:$16 sps:$4 sm:$0xff]  }
   0x9   :  { %4854 = vmatprep.subr.bf16.mxu1 %v7585_v9  ;;  %v7595_v16 = vld [vmem:[%s11851_s1 + $0x64] ss:$16 sps:$4 sm:$0xff]   ;;  %v7599_v18 = vld [vmem:[%s11851_s1 + $0x60] ss:$16 sps:$4 sm:$0xff]   ;;  %v9114_v9 = vcombine.low %v34_v50, %v46_v51 }
   0xa   :  { %v7597_v17 = vld [vmem:[%s11851_s1 + $0x264] ss:$16 sps:$4 sm:$0xff]   ;;  %v7600_v19 = vld [vmem:[%s11851_s1 + $0x260] ss:$16 sps:$4 sm:$0xff]  }
   0xb   :  { %4812 = vmatpush1.bf16.msra.mxu0 %v7587_v10  ;;  %v7601_v20 = vld [vmem:[%s11851_s1 + $0x44] ss:$16 sps:$4 sm:$0xff]   ;;  %v7605_v22 = vld [vmem:[%s11851_s1 + $0x40] ss:$16 sps:$4 sm:$0xff]  }
   0xc   :  { %4855 = vmatpush1.bf16.msra.mxu1 %v7588_v11  ;;  %4813 = vmatprep.subr.bf16.mxu0 %v7589_v12  ;;  %v7603_v21 = vld [vmem:[%s11851_s1 + $0x244] ss:$16 sps:$4 sm:$0xff]   ;;  %v7606_v23 = vld [vmem:[%s11851_s1 + $0x240] ss:$16 sps:$4 sm:$0xff]  }
   0xd   :  { %4856 = vmatprep.subr.bf16.mxu1 %v7591_v13  ;;  %v7607_v24 = vld [vmem:[%s11851_s1 + $0x24] ss:$16 sps:$4 sm:$0xff]   ;;  %v7611_v26 = vld [vmem:[%s11851_s1 + $0x20] ss:$16 sps:$4 sm:$0xff]  }
   0xe   :  { %v7609_v25 = vld [vmem:[%s11851_s1 + $0x224] ss:$16 sps:$4 sm:$0xff]   ;;  %v7612_v27 = vld [vmem:[%s11851_s1 + $0x220] ss:$16 sps:$4 sm:$0xff]  }
   0xf   :  { %4814 = vmatpush1.bf16.msra.mxu0 %v7593_v14  ;;  %v7613_v28 = vld [vmem:[%s11851_s1 + $0x4] ss:$16 sps:$4 sm:$0xff]   ;;  %v7617_v30 = vld [vmem:[%s11851_s1] ss:$16 sps:$4 sm:$0xff]  }
  0x10   :  { %4857 = vmatpush1.bf16.msra.mxu1 %v7594_v15  ;;  %4815 = vmatprep.subr.bf16.mxu0 %v7595_v16  ;;  %v7615_v29 = vld [vmem:[%s11851_s1 + $0x204] ss:$16 sps:$4 sm:$0xff]   ;;  %v7618_v31 = vld [vmem:[%s11851_s1 + $0x200] ss:$16 sps:$4 sm:$0xff]  }
  0x11   :  { %4858 = vmatprep.subr.bf16.mxu1 %v7597_v17  ;;  %v7619_v32 = vld [vmem:[%s11851_s1 + $0x1e4] ss:$16 sps:$4 sm:$0xff]   ;;  %v7623_v34 = vld [vmem:[%s11851_s1 + $0x1e0] ss:$16 sps:$4 sm:$0xff]  }
  0x12   :  { %v7621_v33 = vld [vmem:[%s11851_s1 + $0x3e4] ss:$16 sps:$4 sm:$0xff]   ;;  %v7624_v35 = vld [vmem:[%s11851_s1 + $0x3e0] ss:$16 sps:$4 sm:$0xff]  }
  0x13   :  { %4816 = vmatpush1.bf16.msra.mxu0 %v7599_v18  ;;  %v7625_v36 = vld [vmem:[%s11851_s1 + $0x1c4] ss:$16 sps:$4 sm:$0xff]   ;;  %v7629_v38 = vld [vmem:[%s11851_s1 + $0x1c0] ss:$16 sps:$4 sm:$0xff]  }
  0x14   :  { %4859 = vmatpush1.bf16.msra.mxu1 %v7600_v19  ;;  %4817 = vmatprep.subr.bf16.mxu0 %v7601_v20  ;;  %v7627_v37 = vld [vmem:[%s11851_s1 + $0x3c4] ss:$16 sps:$4 sm:$0xff]   ;;  %v7630_v39 = vld [vmem:[%s11851_s1 + $0x3c0] ss:$16 sps:$4 sm:$0xff]  }
  0x15   :  { %4860 = vmatprep.subr.bf16.mxu1 %v7603_v21  ;;  %v7631_v40 = vld [vmem:[%s11851_s1 + $0x1a4] ss:$16 sps:$4 sm:$0xff]   ;;  %v7635_v42 = vld [vmem:[%s11851_s1 + $0x1a0] ss:$16 sps:$4 sm:$0xff]  }
  0x16   :  { %v7633_v41 = vld [vmem:[%s11851_s1 + $0x3a4] ss:$16 sps:$4 sm:$0xff]   ;;  %v7636_v43 = vld [vmem:[%s11851_s1 + $0x3a0] ss:$16 sps:$4 sm:$0xff]  }
  0x17   :  { %4818 = vmatpush1.bf16.msra.mxu0 %v7605_v22  ;;  %v7637_v44 = vld [vmem:[%s11851_s1 + $0x184] ss:$16 sps:$4 sm:$0xff]   ;;  %v7641_v46 = vld [vmem:[%s11851_s1 + $0x180] ss:$16 sps:$4 sm:$0xff]  }
  0x18   :  { %4861 = vmatpush1.bf16.msra.mxu1 %v7606_v23  ;;  %4819 = vmatprep.subr.bf16.mxu0 %v7607_v24  ;;  %v7639_v45 = vld [vmem:[%s11851_s1 + $0x384] ss:$16 sps:$4 sm:$0xff]   ;;  %v7642_v47 = vld [vmem:[%s11851_s1 + $0x380] ss:$16 sps:$4 sm:$0xff]  }
  0x19   :  { %4862 = vmatprep.subr.bf16.mxu1 %v7609_v25  ;;  %v33_v48 = vld [vmem:[%s11852_s0] sm:$0xff] }
  0x1a   :  { %v45_v49 = vld [vmem:[%s11852_s0 + $0x60] sm:$0xff] }
  0x1b   :  { %4820 = vmatpush1.bf16.msra.mxu0 %v7611_v26  ;;  %v7643_v52 = vld [vmem:[%s11851_s1 + $0x164] ss:$16 sps:$4 sm:$0xff]   ;;  %v9055_v53 = vcombine.high %v33_v48, %v45_v49  ;;  %v7647_v56 = vld [vmem:[%s11851_s1 + $0x160] ss:$16 sps:$4 sm:$0xff]   ;;  %v9112_v8 = vcombine.low %v33_v48, %v45_v49 }
  0x1c   :  { %4863 = vmatpush1.bf16.msra.mxu1 %v7612_v27  ;;  %4821 = vmatprep.subr.bf16.mxu0 %v7613_v28  ;;  %v7645_v54 = vld [vmem:[%s11851_s1 + $0x364] ss:$16 sps:$4 sm:$0xff]   ;;  %v7648_v57 = vld [vmem:[%s11851_s1 + $0x360] ss:$16 sps:$4 sm:$0xff]  }
  0x1d   :  { %4864 = vmatprep.subr.bf16.mxu1 %v7615_v29  ;;  %4839 = vmatprep.mubr.bf16.mxu0 %v9055_v53  ;;  %v7649_v58 = vld [vmem:[%s11851_s1 + $0x144] ss:$16 sps:$4 sm:$0xff]   ;;  %v7653_v60 = vld [vmem:[%s11851_s1 + $0x140] ss:$16 sps:$4 sm:$0xff]  }
  0x1e   :  { %v7651_v59 = vld [vmem:[%s11851_s1 + $0x344] ss:$16 sps:$4 sm:$0xff]   ;;  %v7654_v61 = vld [vmem:[%s11851_s1 + $0x340] ss:$16 sps:$4 sm:$0xff]  }
  0x1f   :  { %4822 = vmatpush1.bf16.msra.mxu0 %v7617_v30  ;;  %v7655_v62 = vld [vmem:[%s11851_s1 + $0x124] ss:$16 sps:$4 sm:$0xff]   ;;  %v7659_v0 = vld [vmem:[%s11851_s1 + $0x120] ss:$16 sps:$4 sm:$0xff]  }
  0x20   :  { %4865 = vmatpush1.bf16.msra.mxu1 %v7618_v31  ;;  %4823 = vmatprep.subr.bf16.mxu0 %v7619_v32  ;;  %v7657_v63 = vld [vmem:[%s11851_s1 + $0x324] ss:$16 sps:$4 sm:$0xff]   ;;  %v7660_v1 = vld [vmem:[%s11851_s1 + $0x320] ss:$16 sps:$4 sm:$0xff]  }
  0x21   :  { %4866 = vmatprep.subr.bf16.mxu1 %v7621_v33  ;;  %v7661_v2 = vld [vmem:[%s11851_s1 + $0x104] ss:$16 sps:$4 sm:$0xff]   ;;  %v7665_v4 = vld [vmem:[%s11851_s1 + $0x100] ss:$16 sps:$4 sm:$0xff]  }
  0x22   :  { %v7663_v3 = vld [vmem:[%s11851_s1 + $0x304] ss:$16 sps:$4 sm:$0xff]   ;;  %v7666_v5 = vld [vmem:[%s11851_s1 + $0x300] ss:$16 sps:$4 sm:$0xff]  }
  0x23   :  { %4824 = vmatpush2.bf16.msra.mxu0 %v7623_v34  ;;  %v7669_v6 = vld [vmem:[%s11851_s1 + $0x4e4] ss:$16 sps:$4 sm:$0xff]   ;;  %v7667_v10 = vld [vmem:[%s11851_s1 + $0x4e0] ss:$16 sps:$4 sm:$0xff]  }
  0x24   :  { %4867 = vmatpush2.bf16.msra.mxu1 %v7624_v35  ;;  %4825 = vmatprep.subr.bf16.mxu0 %v7625_v36  ;;  %v7672_v7 = vld [vmem:[%s11851_s1 + $0x6e4] ss:$16 sps:$4 sm:$0xff]   ;;  %v7670_v11 = vld [vmem:[%s11851_s1 + $0x6e0] ss:$16 sps:$4 sm:$0xff]  }
  0x25   :  { %4868 = vmatprep.subr.bf16.mxu1 %v7627_v37  ;;  %v7675_v12 = vld [vmem:[%s11851_s1 + $0x4c4] ss:$16 sps:$4 sm:$0xff]   ;;  %v7673_v14 = vld [vmem:[%s11851_s1 + $0x4c0] ss:$16 sps:$4 sm:$0xff]  }
  0x26   :  { %v7678_v13 = vld [vmem:[%s11851_s1 + $0x6c4] ss:$16 sps:$4 sm:$0xff]   ;;  %v7676_v15 = vld [vmem:[%s11851_s1 + $0x6c0] ss:$16 sps:$4 sm:$0xff]  }
  0x27   :  { %4826 = vmatpush2.bf16.msra.mxu0 %v7629_v38  ;;  %v7681_v16 = vld [vmem:[%s11851_s1 + $0x4a4] ss:$16 sps:$4 sm:$0xff]   ;;  %v7679_v18 = vld [vmem:[%s11851_s1 + $0x4a0] ss:$16 sps:$4 sm:$0xff]   ;;  %v9209_v38 = vld [vmem:[%s11852_s0 + $0x18] sm:$0xff] }
  0x28   :  { %4869 = vmatpush2.bf16.msra.mxu1 %v7630_v39  ;;  %4827 = vmatprep.subr.bf16.mxu0 %v7631_v40  ;;  %v7684_v17 = vld [vmem:[%s11851_s1 + $0x6a4] ss:$16 sps:$4 sm:$0xff]   ;;  %v7682_v19 = vld [vmem:[%s11851_s1 + $0x6a0] ss:$16 sps:$4 sm:$0xff]   ;;  %v9214_v39 = vld [vmem:[%s11852_s0 + $0x78] sm:$0xff] }
  0x29   :  { %4870 = vmatprep.subr.bf16.mxu1 %v7633_v41  ;;  %v7687_v20 = vld [vmem:[%s11851_s1 + $0x484] ss:$16 sps:$4 sm:$0xff]   ;;  %v7685_v22 = vld [vmem:[%s11851_s1 + $0x480] ss:$16 sps:$4 sm:$0xff]  }
  0x2a   :  { %v7690_v21 = vld [vmem:[%s11851_s1 + $0x684] ss:$16 sps:$4 sm:$0xff]   ;;  %v7688_v23 = vld [vmem:[%s11851_s1 + $0x680] ss:$16 sps:$4 sm:$0xff]  }
  0x2b   :  { %4828 = vmatpush2.bf16.msra.mxu0 %v7635_v42  ;;  %v7693_v24 = vld [vmem:[%s11851_s1 + $0x464] ss:$16 sps:$4 sm:$0xff]   ;;  %v7691_v26 = vld [vmem:[%s11851_s1 + $0x460] ss:$16 sps:$4 sm:$0xff]  }
  0x2c   :  { %4871 = vmatpush2.bf16.msra.mxu1 %v7636_v43  ;;  %4829 = vmatprep.subr.bf16.mxu0 %v7637_v44  ;;  %v7696_v25 = vld [vmem:[%s11851_s1 + $0x664] ss:$16 sps:$4 sm:$0xff]   ;;  %v7694_v27 = vld [vmem:[%s11851_s1 + $0x660] ss:$16 sps:$4 sm:$0xff]   ;;  %v9228_v43 = vcombine.high %v9209_v38, %v9214_v39 }
  0x2d   :  { %4872 = vmatprep.subr.bf16.mxu1 %v7639_v45  ;;  %v7699_v28 = vld [vmem:[%s11851_s1 + $0x444] ss:$16 sps:$4 sm:$0xff]   ;;  %v7697_v30 = vld [vmem:[%s11851_s1 + $0x440] ss:$16 sps:$4 sm:$0xff]  }
  0x2e   :  { %v7702_v29 = vld [vmem:[%s11851_s1 + $0x644] ss:$16 sps:$4 sm:$0xff]   ;;  %v7700_v31 = vld [vmem:[%s11851_s1 + $0x640] ss:$16 sps:$4 sm:$0xff]  }
  0x2f   :  { %4830 = vmatpush2.bf16.msra.mxu0 %v7641_v46  ;;  %v7705_v32 = vld [vmem:[%s11851_s1 + $0x424] ss:$16 sps:$4 sm:$0xff]   ;;  %v7703_v34 = vld [vmem:[%s11851_s1 + $0x420] ss:$16 sps:$4 sm:$0xff]  }
  0x30   :  { %4873 = vmatpush2.bf16.msra.mxu1 %v7642_v47  ;;  %4831 = vmatprep.subr.bf16.mxu0 %v7643_v52  ;;  %v7708_v33 = vld [vmem:[%s11851_s1 + $0x624] ss:$16 sps:$4 sm:$0xff]   ;;  %v7706_v35 = vld [vmem:[%s11851_s1 + $0x620] ss:$16 sps:$4 sm:$0xff]  }
  0x31   :  { %4874 = vmatprep.subr.bf16.mxu1 %v7645_v54  ;;  %v9199_v36 = vld [vmem:[%s11852_s0 + $0x10] sm:$0xff] }
  0x32   :  { %v9204_v37 = vld [vmem:[%s11852_s0 + $0x70] sm:$0xff] }
  0x33   :  { %4832 = vmatpush2.bf16.msra.mxu0 %v7647_v56  ;;  %v7711_v40 = vld [vmem:[%s11851_s1 + $0x404] ss:$16 sps:$4 sm:$0xff]   ;;  %v9221_v41 = vcombine.high %v9199_v36, %v9204_v37  ;;  %v7709_v44 = vld [vmem:[%s11851_s1 + $0x400] ss:$16 sps:$4 sm:$0xff]  }
  0x34   :  { %4875 = vmatpush2.bf16.msra.mxu1 %v7648_v57  ;;  %4833 = vmatprep.subr.bf16.mxu0 %v7649_v58  ;;  %v7714_v42 = vld [vmem:[%s11851_s1 + $0x604] ss:$16 sps:$4 sm:$0xff]   ;;  %v7712_v45 = vld [vmem:[%s11851_s1 + $0x600] ss:$16 sps:$4 sm:$0xff]  }
  0x35   :  { %4876 = vmatprep.subr.bf16.mxu1 %v7651_v59  ;;  %v7717_v46 = vld [vmem:[%s11851_s1 + $0x5e4] ss:$16 sps:$4 sm:$0xff]   ;;  %v7715_v48 = vld [vmem:[%s11851_s1 + $0x5e0] ss:$16 sps:$4 sm:$0xff]  }
  0x36   :  { %v7720_v47 = vld [vmem:[%s11851_s1 + $0x7e4] ss:$16 sps:$4 sm:$0xff]   ;;  %v7718_v49 = vld [vmem:[%s11851_s1 + $0x7e0] ss:$16 sps:$4 sm:$0xff]  }
  0x37   :  { %4834 = vmatpush2.bf16.msra.mxu0 %v7653_v60  ;;  %v7723_v50 = vld [vmem:[%s11851_s1 + $0x5c4] ss:$16 sps:$4 sm:$0xff]   ;;  %v7721_v52 = vld [vmem:[%s11851_s1 + $0x5c0] ss:$16 sps:$4 sm:$0xff]  }
  0x38   :  { %4877 = vmatpush2.bf16.msra.mxu1 %v7654_v61  ;;  %4835 = vmatprep.subr.bf16.mxu0 %v7655_v62  ;;  %v7726_v51 = vld [vmem:[%s11851_s1 + $0x7c4] ss:$16 sps:$4 sm:$0xff]   ;;  %v7724_v54 = vld [vmem:[%s11851_s1 + $0x7c0] ss:$16 sps:$4 sm:$0xff]  }
  0x39   :  { %4878 = vmatprep.subr.bf16.mxu1 %v7657_v63  ;;  %v7729_v56 = vld [vmem:[%s11851_s1 + $0x5a4] ss:$16 sps:$4 sm:$0xff]   ;;  %v7727_v58 = vld [vmem:[%s11851_s1 + $0x5a0] ss:$16 sps:$4 sm:$0xff]  }
  0x3a   :  { %v7732_v57 = vld [vmem:[%s11851_s1 + $0x7a4] ss:$16 sps:$4 sm:$0xff]   ;;  %v7730_v59 = vld [vmem:[%s11851_s1 + $0x7a0] ss:$16 sps:$4 sm:$0xff]  }
  0x3b   :  { %4836 = vmatpush2.bf16.msra.mxu0 %v7659_v0  ;;  %v7735_v60 = vld [vmem:[%s11851_s1 + $0x584] ss:$16 sps:$4 sm:$0xff]   ;;  %v7733_v62 = vld [vmem:[%s11851_s1 + $0x580] ss:$16 sps:$4 sm:$0xff]  }
  0x3c   :  { %4879 = vmatpush2.bf16.msra.mxu1 %v7660_v1  ;;  %4837 = vmatprep.subr.bf16.mxu0 %v7661_v2  ;;  %v7738_v61 = vld [vmem:[%s11851_s1 + $0x784] ss:$16 sps:$4 sm:$0xff]   ;;  %v7736_v63 = vld [vmem:[%s11851_s1 + $0x780] ss:$16 sps:$4 sm:$0xff]  }
  0x3d   :  { %4880 = vmatprep.subr.bf16.mxu1 %v7663_v3  ;;  %v7741_v0 = vld [vmem:[%s11851_s1 + $0x564] ss:$16 sps:$4 sm:$0xff]   ;;  %v7739_v2 = vld [vmem:[%s11851_s1 + $0x560] ss:$16 sps:$4 sm:$0xff]  }
  0x3e   :  { %v7744_v1 = vld [vmem:[%s11851_s1 + $0x764] ss:$16 sps:$4 sm:$0xff]   ;;  %v7742_v3 = vld [vmem:[%s11851_s1 + $0x760] ss:$16 sps:$4 sm:$0xff]  }
  0x3f   :  { %4838 = vmatpush2.bf16.msra.mxu0 %v7665_v4  ;;  %v7747_v4 = vld [vmem:[%s11851_s1 + $0x544] ss:$16 sps:$4 sm:$0xff]  }
  0x40   :  { %4881 = vmatpush2.bf16.msra.mxu1 %v7666_v5  ;;  %4893 = vmatprep.subr.bf16.mxu0 %v7669_v6  ;;  %v7750_v5 = vld [vmem:[%s11851_s1 + $0x744] ss:$16 sps:$4 sm:$0xff]   ;;  %v7745_v6 = vld [vmem:[%s11851_s1 + $0x540] ss:$16 sps:$4 sm:$0xff]  }
  0x41   :  { %4936 = vmatprep.subr.bf16.mxu1 %v7672_v7  ;;  %v7748_v7 = vld [vmem:[%s11851_s1 + $0x740] ss:$16 sps:$4 sm:$0xff]  }
  0x42   :  { %4840 = vmatmul.mubr.bf16.vlgmr.msra.gmra.mxu0 %v9112_v8 }
  0x43   :  { %4883 = vmatmul.mubr.bf16.vlgmr.msra.gmra.mxu1 %v9114_v9  ;;  %4894 = vmatpush1.bf16.msra.mxu0 %v7667_v10  ;;  %v7753_v10 = vld [vmem:[%s11851_s1 + $0x524] ss:$16 sps:$4 sm:$0xff]  }
  0x44   :  { %4937 = vmatpush1.bf16.msra.mxu1 %v7670_v11  ;;  %4895 = vmatprep.subr.bf16.mxu0 %v7675_v12  ;;  %v7756_v11 = vld [vmem:[%s11851_s1 + $0x724] ss:$16 sps:$4 sm:$0xff]   ;;  %v7751_v12 = vld [vmem:[%s11851_s1 + $0x520] ss:$16 sps:$4 sm:$0xff]  }
  0x45   :  { %4938 = vmatprep.subr.bf16.mxu1 %v7678_v13  ;;  %4925 = vmatprep.mubr.bf16.mxu0 %v9221_v41  ;;  %v7754_v13 = vld [vmem:[%s11851_s1 + $0x720] ss:$16 sps:$4 sm:$0xff]  }
  0x46   :  { %4968 = vmatprep.mubr.bf16.mxu1 %v9228_v43 }
  0x47   :  { %4896 = vmatpush1.bf16.msra.mxu0 %v7673_v14  ;;  %v7759_v14 = vld [vmem:[%s11851_s1 + $0x504] ss:$16 sps:$4 sm:$0xff]  }
  0x48   :  { %4939 = vmatpush1.bf16.msra.mxu1 %v7676_v15  ;;  %4897 = vmatprep.subr.bf16.mxu0 %v7681_v16  ;;  %v7762_v15 = vld [vmem:[%s11851_s1 + $0x704] ss:$16 sps:$4 sm:$0xff]   ;;  %v7757_v16 = vld [vmem:[%s11851_s1 + $0x500] ss:$16 sps:$4 sm:$0xff]  }
  0x49   :  { %4940 = vmatprep.subr.bf16.mxu1 %v7684_v17  ;;  %v7760_v17 = vld [vmem:[%s11851_s1 + $0x700] ss:$16 sps:$4 sm:$0xff]  }
  0x4b   :  { %4898 = vmatpush1.bf16.msra.mxu0 %v7679_v18  ;;  %v7765_v18 = vld [vmem:[%s11851_s1 + $0x8e4] ss:$16 sps:$4 sm:$0xff]  }
  0x4c   :  { %4941 = vmatpush1.bf16.msra.mxu1 %v7682_v19  ;;  %4899 = vmatprep.subr.bf16.mxu0 %v7687_v20  ;;  %v7768_v19 = vld [vmem:[%s11851_s1 + $0xae4] ss:$16 sps:$4 sm:$0xff]   ;;  %v9342_v20 = vcombine.low %v9199_v36, %v9204_v37  ;;  %v7775_v36 = vld [vmem:[%s11851_s1 + $0x8a0] ss:$16 sps:$4 sm:$0xff]  }
  0x4d   :  { %4942 = vmatprep.subr.bf16.mxu1 %v7690_v21  ;;  %v9346_v21 = vcombine.low %v9209_v38, %v9214_v39  ;;  %v7778_v37 = vld [vmem:[%s11851_s1 + $0xaa0] ss:$16 sps:$4 sm:$0xff]   ;;  %v7783_v38 = vld [vmem:[%s11851_s1 + $0x884] ss:$16 sps:$4 sm:$0xff]  }
  0x4e   :  { %v7786_v39 = vld [vmem:[%s11851_s1 + $0xa84] ss:$16 sps:$4 sm:$0xff]  }
  0x4f   :  { %4900 = vmatpush1.bf16.msra.mxu0 %v7685_v22  ;;  %v7763_v22 = vld [vmem:[%s11851_s1 + $0x8e0] ss:$16 sps:$4 sm:$0xff]  }
  0x50   :  { %4943 = vmatpush1.bf16.msra.mxu1 %v7688_v23  ;;  %4901 = vmatprep.subr.bf16.mxu0 %v7693_v24  ;;  %v7766_v23 = vld [vmem:[%s11851_s1 + $0xae0] ss:$16 sps:$4 sm:$0xff]   ;;  %v7771_v24 = vld [vmem:[%s11851_s1 + $0x8c4] ss:$16 sps:$4 sm:$0xff]  }
  0x51   :  { %4944 = vmatprep.subr.bf16.mxu1 %v7696_v25  ;;  %v7774_v25 = vld [vmem:[%s11851_s1 + $0xac4] ss:$16 sps:$4 sm:$0xff]  }
  0x53   :  { %4902 = vmatpush1.bf16.msra.mxu0 %v7691_v26  ;;  %v7769_v26 = vld [vmem:[%s11851_s1 + $0x8c0] ss:$16 sps:$4 sm:$0xff]  }
  0x54   :  { %4945 = vmatpush1.bf16.msra.mxu1 %v7694_v27  ;;  %4903 = vmatprep.subr.bf16.mxu0 %v7699_v28  ;;  %v7772_v27 = vld [vmem:[%s11851_s1 + $0xac0] ss:$16 sps:$4 sm:$0xff]  }
  0x55   :  { %4946 = vmatprep.subr.bf16.mxu1 %v7702_v29  ;;  %v9369_v28 = vld [vmem:[%s11852_s0 + $0x20] sm:$0xff] }
  0x56   :  { %v9376_v29 = vld [vmem:[%s11852_s0 + $0x80] sm:$0xff] }
  0x57   :  { %4904 = vmatpush1.bf16.msra.mxu0 %v7697_v30  ;;  %v9381_v30 = vld [vmem:[%s11852_s0 + $0x28] sm:$0xff] }
  0x58   :  { %4947 = vmatpush1.bf16.msra.mxu1 %v7700_v31  ;;  %4905 = vmatprep.subr.bf16.mxu0 %v7705_v32  ;;  %v9386_v31 = vld [vmem:[%s11852_s0 + $0x88] sm:$0xff]  ;;  %v7777_v32 = vld [vmem:[%s11851_s1 + $0x8a4] ss:$16 sps:$4 sm:$0xff]  }
  0x59   :  { %4948 = vmatprep.subr.bf16.mxu1 %v7708_v33  ;;  %v9393_v33 = vcombine.high %v9369_v28, %v9376_v29 }
  0x5b   :  { %4906 = vmatpush1.bf16.msra.mxu0 %v7703_v34  ;;  %v7780_v34 = vld [vmem:[%s11851_s1 + $0xaa4] ss:$16 sps:$4 sm:$0xff]  }
  0x5c   :  { %4949 = vmatpush1.bf16.msra.mxu1 %v7706_v35  ;;  %4907 = vmatprep.subr.bf16.mxu0 %v7711_v40  ;;  %v9400_v35 = vcombine.high %v9381_v30, %v9386_v31  ;;  %v7781_v40 = vld [vmem:[%s11851_s1 + $0x880] ss:$16 sps:$4 sm:$0xff]  }
  0x5d   :  { %4950 = vmatprep.subr.bf16.mxu1 %v7714_v42  ;;  %v7784_v42 = vld [vmem:[%s11851_s1 + $0xa80] ss:$16 sps:$4 sm:$0xff]  }
  0x5f   :  { %4908 = vmatpush1.bf16.msra.mxu0 %v7709_v44  ;;  %v7789_v44 = vld [vmem:[%s11851_s1 + $0x864] ss:$16 sps:$4 sm:$0xff]  }
  0x60   :  { %4951 = vmatpush1.bf16.msra.mxu1 %v7712_v45  ;;  %4909 = vmatprep.subr.bf16.mxu0 %v7717_v46  ;;  %v7792_v45 = vld [vmem:[%s11851_s1 + $0xa64] ss:$16 sps:$4 sm:$0xff]   ;;  %v7787_v46 = vld [vmem:[%s11851_s1 + $0x860] ss:$16 sps:$4 sm:$0xff]  }
  0x61   :  { %4952 = vmatprep.subr.bf16.mxu1 %v7720_v47  ;;  %v7790_v47 = vld [vmem:[%s11851_s1 + $0xa60] ss:$16 sps:$4 sm:$0xff]  }
  0x63   :  { %4910 = vmatpush2.bf16.msra.mxu0 %v7715_v48  ;;  %v7795_v48 = vld [vmem:[%s11851_s1 + $0x844] ss:$16 sps:$4 sm:$0xff]  }
  0x64   :  { %4953 = vmatpush2.bf16.msra.mxu1 %v7718_v49  ;;  %4911 = vmatprep.subr.bf16.mxu0 %v7723_v50  ;;  %v7798_v49 = vld [vmem:[%s11851_s1 + $0xa44] ss:$16 sps:$4 sm:$0xff]   ;;  %v7793_v50 = vld [vmem:[%s11851_s1 + $0x840] ss:$16 sps:$4 sm:$0xff]  }
  0x65   :  { %4954 = vmatprep.subr.bf16.mxu1 %v7726_v51  ;;  %v7796_v51 = vld [vmem:[%s11851_s1 + $0xa40] ss:$16 sps:$4 sm:$0xff]  }
  0x67   :  { %4912 = vmatpush2.bf16.msra.mxu0 %v7721_v52  ;;  %v7801_v52 = vld [vmem:[%s11851_s1 + $0x824] ss:$16 sps:$4 sm:$0xff]  }
  0x68   :  { %4955 = vmatpush2.bf16.msra.mxu1 %v7724_v54  ;;  %4913 = vmatprep.subr.bf16.mxu0 %v7729_v56  ;;  %v7804_v54 = vld [vmem:[%s11851_s1 + $0xa24] ss:$16 sps:$4 sm:$0xff]   ;;  %v7799_v56 = vld [vmem:[%s11851_s1 + $0x820] ss:$16 sps:$4 sm:$0xff]  }
  0x69   :  { %4956 = vmatprep.subr.bf16.mxu1 %v7732_v57  ;;  %v7802_v57 = vld [vmem:[%s11851_s1 + $0xa20] ss:$16 sps:$4 sm:$0xff]  }
  0x6b   :  { %4914 = vmatpush2.bf16.msra.mxu0 %v7727_v58  ;;  %v7807_v58 = vld [vmem:[%s11851_s1 + $0x804] ss:$16 sps:$4 sm:$0xff]  }
  0x6c   :  { %4957 = vmatpush2.bf16.msra.mxu1 %v7730_v59  ;;  %4915 = vmatprep.subr.bf16.mxu0 %v7735_v60  ;;  %v7810_v59 = vld [vmem:[%s11851_s1 + $0xa04] ss:$16 sps:$4 sm:$0xff]   ;;  %v7805_v60 = vld [vmem:[%s11851_s1 + $0x800] ss:$16 sps:$4 sm:$0xff]  }
  0x6d   :  { %4958 = vmatprep.subr.bf16.mxu1 %v7738_v61  ;;  %v7808_v61 = vld [vmem:[%s11851_s1 + $0xa00] ss:$16 sps:$4 sm:$0xff]  }
  0x6f   :  { %4916 = vmatpush2.bf16.msra.mxu0 %v7733_v62  ;;  %v7813_v62 = vld [vmem:[%s11851_s1 + $0x9e4] ss:$16 sps:$4 sm:$0xff]  }
  0x70   :  { %4959 = vmatpush2.bf16.msra.mxu1 %v7736_v63  ;;  %4917 = vmatprep.subr.bf16.mxu0 %v7741_v0  ;;  %v7816_v63 = vld [vmem:[%s11851_s1 + $0xbe4] ss:$16 sps:$4 sm:$0xff]   ;;  %v7811_v0 = vld [vmem:[%s11851_s1 + $0x9e0] ss:$16 sps:$4 sm:$0xff]  }
  0x71   :  { %4960 = vmatprep.subr.bf16.mxu1 %v7744_v1  ;;  %v7814_v1 = vld [vmem:[%s11851_s1 + $0xbe0] ss:$16 sps:$4 sm:$0xff]  }
  0x73   :  { %4918 = vmatpush2.bf16.msra.mxu0 %v7739_v2  ;;  %v7819_v2 = vld [vmem:[%s11851_s1 + $0x9c4] ss:$16 sps:$4 sm:$0xff]  }
  0x74   :  { %4961 = vmatpush2.bf16.msra.mxu1 %v7742_v3  ;;  %4919 = vmatprep.subr.bf16.mxu0 %v7747_v4  ;;  %v7822_v3 = vld [vmem:[%s11851_s1 + $0xbc4] ss:$16 sps:$4 sm:$0xff]   ;;  %v7817_v4 = vld [vmem:[%s11851_s1 + $0x9c0] ss:$16 sps:$4 sm:$0xff]  }
  0x75   :  { %4962 = vmatprep.subr.bf16.mxu1 %v7750_v5  ;;  %v7820_v5 = vld [vmem:[%s11851_s1 + $0xbc0] ss:$16 sps:$4 sm:$0xff]  }
  0x77   :  { %4920 = vmatpush2.bf16.msra.mxu0 %v7745_v6  ;;  %v7825_v6 = vld [vmem:[%s11851_s1 + $0x9a4] ss:$16 sps:$4 sm:$0xff]  }
  0x78   :  { %4963 = vmatpush2.bf16.msra.mxu1 %v7748_v7  ;;  %4921 = vmatprep.subr.bf16.mxu0 %v7753_v10  ;;  %v7828_v7 = vld [vmem:[%s11851_s1 + $0xba4] ss:$16 sps:$4 sm:$0xff]   ;;  %v7823_v10 = vld [vmem:[%s11851_s1 + $0x9a0] ss:$16 sps:$4 sm:$0xff]  }
  0x79   :  { %4964 = vmatprep.subr.bf16.mxu1 %v7756_v11  ;;  %v7826_v11 = vld [vmem:[%s11851_s1 + $0xba0] ss:$16 sps:$4 sm:$0xff]  }
  0x7b   :  { %4922 = vmatpush2.bf16.msra.mxu0 %v7751_v12  ;;  %v7831_v12 = vld [vmem:[%s11851_s1 + $0x984] ss:$16 sps:$4 sm:$0xff]  }
  0x7c   :  { %4965 = vmatpush2.bf16.msra.mxu1 %v7754_v13  ;;  %4923 = vmatprep.subr.bf16.mxu0 %v7759_v14  ;;  %v7834_v13 = vld [vmem:[%s11851_s1 + $0xb84] ss:$16 sps:$4 sm:$0xff]   ;;  %v7829_v14 = vld [vmem:[%s11851_s1 + $0x980] ss:$16 sps:$4 sm:$0xff]  }
  0x7d   :  { %4966 = vmatprep.subr.bf16.mxu1 %v7762_v15  ;;  %v7832_v15 = vld [vmem:[%s11851_s1 + $0xb80] ss:$16 sps:$4 sm:$0xff]  }
  0x7f   :  { %4924 = vmatpush2.bf16.msra.mxu0 %v7757_v16  ;;  %v7837_v16 = vld [vmem:[%s11851_s1 + $0x964] ss:$16 sps:$4 sm:$0xff]  }
  0x80   :  { %4967 = vmatpush2.bf16.msra.mxu1 %v7760_v17  ;;  %4979 = vmatprep.subr.bf16.mxu0 %v7765_v18  ;;  %v7840_v17 = vld [vmem:[%s11851_s1 + $0xb64] ss:$16 sps:$4 sm:$0xff]   ;;  %v7835_v18 = vld [vmem:[%s11851_s1 + $0x960] ss:$16 sps:$4 sm:$0xff]  }
  0x81   :  { %5022 = vmatprep.subr.bf16.mxu1 %v7768_v19  ;;  %v7838_v19 = vld [vmem:[%s11851_s1 + $0xb60] ss:$16 sps:$4 sm:$0xff]  }
  0x82   :  { %4926 = vmatmul.mubr.bf16.vlgmr.msra.gmra.mxu0 %v9342_v20 }
  0x83   :  { %4969 = vmatmul.mubr.bf16.vlgmr.msra.gmra.mxu1 %v9346_v21  ;;  %4980 = vmatpush1.bf16.msra.mxu0 %v7763_v22  ;;  %v7843_v22 = vld [vmem:[%s11851_s1 + $0x944] ss:$16 sps:$4 sm:$0xff]  }
  0x84   :  { %5023 = vmatpush1.bf16.msra.mxu1 %v7766_v23  ;;  %4981 = vmatprep.subr.bf16.mxu0 %v7771_v24  ;;  %v7846_v23 = vld [vmem:[%s11851_s1 + $0xb44] ss:$16 sps:$4 sm:$0xff]   ;;  %v7841_v24 = vld [vmem:[%s11851_s1 + $0x940] ss:$16 sps:$4 sm:$0xff]  }
  0x85   :  { %5024 = vmatprep.subr.bf16.mxu1 %v7774_v25  ;;  %5011 = vmatprep.mubr.bf16.mxu0 %v9393_v33  ;;  %v7844_v25 = vld [vmem:[%s11851_s1 + $0xb40] ss:$16 sps:$4 sm:$0xff]  }
  0x86   :  { %5054 = vmatprep.mubr.bf16.mxu1 %v9400_v35 }
  0x87   :  { %4982 = vmatpush1.bf16.msra.mxu0 %v7769_v26  ;;  %v7849_v26 = vld [vmem:[%s11851_s1 + $0x924] ss:$16 sps:$4 sm:$0xff]  }
  0x88   :  { %5025 = vmatpush1.bf16.msra.mxu1 %v7772_v27  ;;  %4983 = vmatprep.subr.bf16.mxu0 %v7777_v32  ;;  %v7852_v27 = vld [vmem:[%s11851_s1 + $0xb24] ss:$16 sps:$4 sm:$0xff]   ;;  %v7847_v32 = vld [vmem:[%s11851_s1 + $0x920] ss:$16 sps:$4 sm:$0xff]  }
  0x89   :  { %5026 = vmatprep.subr.bf16.mxu1 %v7780_v34  ;;  %v7850_v34 = vld [vmem:[%s11851_s1 + $0xb20] ss:$16 sps:$4 sm:$0xff]  }
  0x8b   :  { %4984 = vmatpush1.bf16.msra.mxu0 %v7775_v36  ;;  %v7855_v36 = vld [vmem:[%s11851_s1 + $0x904] ss:$16 sps:$4 sm:$0xff]  }
  0x8c   :  { %5027 = vmatpush1.bf16.msra.mxu1 %v7778_v37  ;;  %4985 = vmatprep.subr.bf16.mxu0 %v7783_v38  ;;  %v7858_v37 = vld [vmem:[%s11851_s1 + $0xb04] ss:$16 sps:$4 sm:$0xff]   ;;  %v7853_v38 = vld [vmem:[%s11851_s1 + $0x900] ss:$16 sps:$4 sm:$0xff]  }
  0x8d   :  { %5028 = vmatprep.subr.bf16.mxu1 %v7786_v39  ;;  %v7856_v39 = vld [vmem:[%s11851_s1 + $0xb00] ss:$16 sps:$4 sm:$0xff]  }
  0x8f   :  { %4986 = vmatpush1.bf16.msra.mxu0 %v7781_v40  ;;  %v7861_v40 = vld [vmem:[%s11851_s1 + $0xce4] ss:$16 sps:$4 sm:$0xff]  }
  0x90   :  { %5029 = vmatpush1.bf16.msra.mxu1 %v7784_v42  ;;  %4987 = vmatprep.subr.bf16.mxu0 %v7789_v44  ;;  %v7864_v42 = vld [vmem:[%s11851_s1 + $0xee4] ss:$16 sps:$4 sm:$0xff]  }
  0x91   :  { %5030 = vmatprep.subr.bf16.mxu1 %v7792_v45  ;;  %v9575_v44 = vld [vmem:[%s11852_s0 + $0x30] sm:$0xff] }
  0x92   :  { %v7859_v45 = vld [vmem:[%s11851_s1 + $0xce0] ss:$16 sps:$4 sm:$0xff]  }
  0x93   :  { %4988 = vmatpush1.bf16.msra.mxu0 %v7787_v46  ;;  %v9583_v46 = vld [vmem:[%s11852_s0 + $0x90] sm:$0xff] }
  0x94   :  { %5031 = vmatpush1.bf16.msra.mxu1 %v7790_v47  ;;  %4989 = vmatprep.subr.bf16.mxu0 %v7795_v48  ;;  %v9588_v47 = vld [vmem:[%s11852_s0 + $0x38] sm:$0xff]  ;;  %v9592_v48 = vcombine.low %v9369_v28, %v9376_v29  ;;  %v7867_v28 = vld [vmem:[%s11851_s1 + $0xcc4] ss:$16 sps:$4 sm:$0xff]  }
  0x95   :  { %5032 = vmatprep.subr.bf16.mxu1 %v7798_v49  ;;  %v9596_v49 = vcombine.low %v9381_v30, %v9386_v31  ;;  %v7870_v29 = vld [vmem:[%s11851_s1 + $0xec4] ss:$16 sps:$4 sm:$0xff]   ;;  %v9614_v30 = vcombine.high %v9575_v44, %v9583_v46 }
  0x97   :  { %4990 = vmatpush1.bf16.msra.mxu0 %v7793_v50  ;;  %v9601_v50 = vld [vmem:[%s11852_s0 + $0x98] sm:$0xff] }
  0x98   :  { %5033 = vmatpush1.bf16.msra.mxu1 %v7796_v51  ;;  %4991 = vmatprep.subr.bf16.mxu0 %v7801_v52  ;;  %v7862_v51 = vld [vmem:[%s11851_s1 + $0xee0] ss:$16 sps:$4 sm:$0xff]   ;;  %v9618_v31 = vcombine.high %v9588_v47, %v9601_v50 }
  0x99   :  { %5034 = vmatprep.subr.bf16.mxu1 %v7804_v54  ;;  %v7865_v52 = vld [vmem:[%s11851_s1 + $0xcc0] ss:$16 sps:$4 sm:$0xff]  }
  0x9a   :  { %v7868_v54 = vld [vmem:[%s11851_s1 + $0xec0] ss:$16 sps:$4 sm:$0xff]  }
  0x9b   :  { %4992 = vmatpush1.bf16.msra.mxu0 %v7799_v56  ;;  %v7873_v56 = vld [vmem:[%s11851_s1 + $0xca4] ss:$16 sps:$4 sm:$0xff]  }
  0x9c   :  { %5035 = vmatpush1.bf16.msra.mxu1 %v7802_v57  ;;  %4993 = vmatprep.subr.bf16.mxu0 %v7807_v58  ;;  %v7876_v57 = vld [vmem:[%s11851_s1 + $0xea4] ss:$16 sps:$4 sm:$0xff]   ;;  %v7871_v58 = vld [vmem:[%s11851_s1 + $0xca0] ss:$16 sps:$4 sm:$0xff]  }
  0x9d   :  { %5036 = vmatprep.subr.bf16.mxu1 %v7810_v59  ;;  %v7874_v59 = vld [vmem:[%s11851_s1 + $0xea0] ss:$16 sps:$4 sm:$0xff]  }
  0x9f   :  { %4994 = vmatpush1.bf16.msra.mxu0 %v7805_v60  ;;  %v7879_v60 = vld [vmem:[%s11851_s1 + $0xc84] ss:$16 sps:$4 sm:$0xff]  }
  0xa0   :  { %5037 = vmatpush1.bf16.msra.mxu1 %v7808_v61  ;;  %4995 = vmatprep.subr.bf16.mxu0 %v7813_v62  ;;  %v7882_v61 = vld [vmem:[%s11851_s1 + $0xe84] ss:$16 sps:$4 sm:$0xff]   ;;  %v7877_v62 = vld [vmem:[%s11851_s1 + $0xc80] ss:$16 sps:$4 sm:$0xff]  }
  0xa1   :  { %5038 = vmatprep.subr.bf16.mxu1 %v7816_v63  ;;  %v7880_v63 = vld [vmem:[%s11851_s1 + $0xe80] ss:$16 sps:$4 sm:$0xff]  }
  0xa3   :  { %4996 = vmatpush2.bf16.msra.mxu0 %v7811_v0  ;;  %v7885_v0 = vld [vmem:[%s11851_s1 + $0xc64] ss:$16 sps:$4 sm:$0xff]  }
  0xa4   :  { %5039 = vmatpush2.bf16.msra.mxu1 %v7814_v1  ;;  %4997 = vmatprep.subr.bf16.mxu0 %v7819_v2  ;;  %v7888_v1 = vld [vmem:[%s11851_s1 + $0xe64] ss:$16 sps:$4 sm:$0xff]   ;;  %v7883_v2 = vld [vmem:[%s11851_s1 + $0xc60] ss:$16 sps:$4 sm:$0xff]  }
  0xa5   :  { %5040 = vmatprep.subr.bf16.mxu1 %v7822_v3  ;;  %v7886_v3 = vld [vmem:[%s11851_s1 + $0xe60] ss:$16 sps:$4 sm:$0xff]  }
  0xa7   :  { %4998 = vmatpush2.bf16.msra.mxu0 %v7817_v4  ;;  %v7891_v4 = vld [vmem:[%s11851_s1 + $0xc44] ss:$16 sps:$4 sm:$0xff]  }
  0xa8   :  { %5041 = vmatpush2.bf16.msra.mxu1 %v7820_v5  ;;  %4999 = vmatprep.subr.bf16.mxu0 %v7825_v6  ;;  %v7894_v5 = vld [vmem:[%s11851_s1 + $0xe44] ss:$16 sps:$4 sm:$0xff]   ;;  %v7889_v6 = vld [vmem:[%s11851_s1 + $0xc40] ss:$16 sps:$4 sm:$0xff]  }
  0xa9   :  { %5042 = vmatprep.subr.bf16.mxu1 %v7828_v7  ;;  %v7892_v7 = vld [vmem:[%s11851_s1 + $0xe40] ss:$16 sps:$4 sm:$0xff]  }
  0xab   :  { %5000 = vmatpush2.bf16.msra.mxu0 %v7823_v10  ;;  %v7897_v10 = vld [vmem:[%s11851_s1 + $0xc24] ss:$16 sps:$4 sm:$0xff]  }
  0xac   :  { %5043 = vmatpush2.bf16.msra.mxu1 %v7826_v11  ;;  %5001 = vmatprep.subr.bf16.mxu0 %v7831_v12  ;;  %v7900_v11 = vld [vmem:[%s11851_s1 + $0xe24] ss:$16 sps:$4 sm:$0xff]   ;;  %v7895_v12 = vld [vmem:[%s11851_s1 + $0xc20] ss:$16 sps:$4 sm:$0xff]  }
  0xad   :  { %5044 = vmatprep.subr.bf16.mxu1 %v7834_v13  ;;  %v7898_v13 = vld [vmem:[%s11851_s1 + $0xe20] ss:$16 sps:$4 sm:$0xff]  }
  0xaf   :  { %5002 = vmatpush2.bf16.msra.mxu0 %v7829_v14  ;;  %v7903_v14 = vld [vmem:[%s11851_s1 + $0xc04] ss:$16 sps:$4 sm:$0xff]  }
  0xb0   :  { %5045 = vmatpush2.bf16.msra.mxu1 %v7832_v15  ;;  %5003 = vmatprep.subr.bf16.mxu0 %v7837_v16  ;;  %v7906_v15 = vld [vmem:[%s11851_s1 + $0xe04] ss:$16 sps:$4 sm:$0xff]   ;;  %v7901_v16 = vld [vmem:[%s11851_s1 + $0xc00] ss:$16 sps:$4 sm:$0xff]  }
  0xb1   :  { %5046 = vmatprep.subr.bf16.mxu1 %v7840_v17  ;;  %v7904_v17 = vld [vmem:[%s11851_s1 + $0xe00] ss:$16 sps:$4 sm:$0xff]  }
  0xb3   :  { %5004 = vmatpush2.bf16.msra.mxu0 %v7835_v18  ;;  %v7909_v18 = vld [vmem:[%s11851_s1 + $0xde4] ss:$16 sps:$4 sm:$0xff]  }
  0xb4   :  { %5047 = vmatpush2.bf16.msra.mxu1 %v7838_v19  ;;  %5005 = vmatprep.subr.bf16.mxu0 %v7843_v22  ;;  %v7912_v19 = vld [vmem:[%s11851_s1 + $0xfe4] ss:$16 sps:$4 sm:$0xff]   ;;  %v7907_v22 = vld [vmem:[%s11851_s1 + $0xde0] ss:$16 sps:$4 sm:$0xff]  }
  0xb5   :  { %5048 = vmatprep.subr.bf16.mxu1 %v7846_v23  ;;  %v7910_v23 = vld [vmem:[%s11851_s1 + $0xfe0] ss:$16 sps:$4 sm:$0xff]  }
  0xb7   :  { %5006 = vmatpush2.bf16.msra.mxu0 %v7841_v24  ;;  %v7915_v24 = vld [vmem:[%s11851_s1 + $0xdc4] ss:$16 sps:$4 sm:$0xff]  }
  0xb8   :  { %5049 = vmatpush2.bf16.msra.mxu1 %v7844_v25  ;;  %5007 = vmatprep.subr.bf16.mxu0 %v7849_v26  ;;  %v7918_v25 = vld [vmem:[%s11851_s1 + $0xfc4] ss:$16 sps:$4 sm:$0xff]   ;;  %v7913_v26 = vld [vmem:[%s11851_s1 + $0xdc0] ss:$16 sps:$4 sm:$0xff]  }
  0xb9   :  { %5050 = vmatprep.subr.bf16.mxu1 %v7852_v27  ;;  %v7916_v27 = vld [vmem:[%s11851_s1 + $0xfc0] ss:$16 sps:$4 sm:$0xff]  }
  0xbb   :  { %5008 = vmatpush2.bf16.msra.mxu0 %v7847_v32  ;;  %v7921_v32 = vld [vmem:[%s11851_s1 + $0xda4] ss:$16 sps:$4 sm:$0xff]  }
  0xbc   :  { %5051 = vmatpush2.bf16.msra.mxu1 %v7850_v34  ;;  %5009 = vmatprep.subr.bf16.mxu0 %v7855_v36  ;;  %v7924_v34 = vld [vmem:[%s11851_s1 + $0xfa4] ss:$16 sps:$4 sm:$0xff]   ;;  %v7919_v36 = vld [vmem:[%s11851_s1 + $0xda0] ss:$16 sps:$4 sm:$0xff]  }
  0xbd   :  { %5052 = vmatprep.subr.bf16.mxu1 %v7858_v37  ;;  %v7922_v37 = vld [vmem:[%s11851_s1 + $0xfa0] ss:$16 sps:$4 sm:$0xff]  }
  0xbf   :  { %5010 = vmatpush2.bf16.msra.mxu0 %v7853_v38  ;;  %v7927_v38 = vld [vmem:[%s11851_s1 + $0xd84] ss:$16 sps:$4 sm:$0xff]  }
  0xc0   :  { %5053 = vmatpush2.bf16.msra.mxu1 %v7856_v39  ;;  %5065 = vmatprep.subr.bf16.mxu0 %v7861_v40  ;;  %v7930_v39 = vld [vmem:[%s11851_s1 + $0xf84] ss:$16 sps:$4 sm:$0xff]   ;;  %v7925_v40 = vld [vmem:[%s11851_s1 + $0xd80] ss:$16 sps:$4 sm:$0xff]  }
  0xc1   :  { %5108 = vmatprep.subr.bf16.mxu1 %v7864_v42  ;;  %v7928_v42 = vld [vmem:[%s11851_s1 + $0xf80] ss:$16 sps:$4 sm:$0xff]  }
  0xc2   :  { %5012 = vmatmul.mubr.bf16.vlgmr.msra.gmra.mxu0 %v9592_v48 }
  0xc3   :  { %5055 = vmatmul.mubr.bf16.vlgmr.msra.gmra.mxu1 %v9596_v49  ;;  %5066 = vmatpush1.bf16.msra.mxu0 %v7859_v45  ;;  %v7933_v45 = vld [vmem:[%s11851_s1 + $0xd64] ss:$16 sps:$4 sm:$0xff]  }
  0xc4   :  { %5109 = vmatpush1.bf16.msra.mxu1 %v7862_v51  ;;  %5067 = vmatprep.subr.bf16.mxu0 %v7867_v28  ;;  %v7936_v51 = vld [vmem:[%s11851_s1 + $0xf64] ss:$16 sps:$4 sm:$0xff]   ;;  %v7931_v28 = vld [vmem:[%s11851_s1 + $0xd60] ss:$16 sps:$4 sm:$0xff]  }
  0xc5   :  { %5110 = vmatprep.subr.bf16.mxu1 %v7870_v29  ;;  %5097 = vmatprep.mubr.bf16.mxu0 %v9614_v30  ;;  %v7934_v29 = vld [vmem:[%s11851_s1 + $0xf60] ss:$16 sps:$4 sm:$0xff]  }
  0xc6   :  { %5140 = vmatprep.mubr.bf16.mxu1 %v9618_v31 }
  0xc7   :  { %5068 = vmatpush1.bf16.msra.mxu0 %v7865_v52  ;;  %v7939_v52 = vld [vmem:[%s11851_s1 + $0xd44] ss:$16 sps:$4 sm:$0xff]  }
  0xc8   :  { %5111 = vmatpush1.bf16.msra.mxu1 %v7868_v54  ;;  %5069 = vmatprep.subr.bf16.mxu0 %v7873_v56  ;;  %v7942_v54 = vld [vmem:[%s11851_s1 + $0xf44] ss:$16 sps:$4 sm:$0xff]   ;;  %v7937_v56 = vld [vmem:[%s11851_s1 + $0xd40] ss:$16 sps:$4 sm:$0xff]  }
  0xc9   :  { %5112 = vmatprep.subr.bf16.mxu1 %v7876_v57  ;;  %v7940_v57 = vld [vmem:[%s11851_s1 + $0xf40] ss:$16 sps:$4 sm:$0xff]  }
  0xcb   :  { %5070 = vmatpush1.bf16.msra.mxu0 %v7871_v58  ;;  %v827_v58 = vlaneseq }
  0xcc   :  { %5113 = vmatpush1.bf16.msra.mxu1 %v7874_v59  ;;  %5071 = vmatprep.subr.bf16.mxu0 %v7879_v60  ;;  %v7945_v59 = vld [vmem:[%s11851_s1 + $0xd24] ss:$16 sps:$4 sm:$0xff]  }
  0xcd   :  { %5114 = vmatprep.subr.bf16.mxu1 %v7882_v61  ;;  %v7948_v60 = vld [vmem:[%s11851_s1 + $0xf24] ss:$16 sps:$4 sm:$0xff]   ;;  %v7943_v61 = vld [vmem:[%s11851_s1 + $0xd20] ss:$16 sps:$4 sm:$0xff]  }
  0xcf   :  { %5072 = vmatpush1.bf16.msra.mxu0 %v7877_v62  ;;  %v7946_v62 = vld [vmem:[%s11851_s1 + $0xf20] ss:$16 sps:$4 sm:$0xff]  }
  0xd0   :  { %5115 = vmatpush1.bf16.msra.mxu1 %v7880_v63  ;;  %5073 = vmatprep.subr.bf16.mxu0 %v7885_v0  ;;  %v9786_v63 = vshrl.u32 %v827_v58, 7  ;;  %v7951_v0 = vld [vmem:[%s11851_s1 + $0xd04] ss:$16 sps:$4 sm:$0xff]   ;;  %v7982_v58 = vld [vmem:[%s11851_s1 + $0x1260] ss:$16 sps:$4 sm:$0xff]  }
  0xd1   :  { %5116 = vmatprep.subr.bf16.mxu1 %v7888_v1  ;;  %v7954_v1 = vld [vmem:[%s11851_s1 + $0xf04] ss:$16 sps:$4 sm:$0xff]  }
  0xd3   :  { %5074 = vmatpush1.bf16.msra.mxu0 %v7883_v2  ;;  %v7949_v2 = vld [vmem:[%s11851_s1 + $0xd00] ss:$16 sps:$4 sm:$0xff]  }
  0xd4   :  { %5117 = vmatpush1.bf16.msra.mxu1 %v7886_v3  ;;  %5075 = vmatprep.subr.bf16.mxu0 %v7891_v4  ;;  %v7952_v3 = vld [vmem:[%s11851_s1 + $0xf00] ss:$16 sps:$4 sm:$0xff]  }
  0xd5   :  { %5118 = vmatprep.subr.bf16.mxu1 %v7894_v5  ;;  %v825_v4 = vld [vmem:[%s11853_s2] sm:$0xf]  ;;  %v829_v5 = vsub.s32 0, %v9786_v63 }
  0xd7   :  { %5076 = vmatpush1.bf16.msra.mxu0 %v7889_v6  ;;  %v7957_v6 = vld [vmem:[%s11851_s1 + $0x10e4] ss:$16 sps:$4 sm:$0xff]  }
  0xd8   :  { %5119 = vmatpush1.bf16.msra.mxu1 %v7892_v7  ;;  %5077 = vmatprep.subr.bf16.mxu0 %v7897_v10  ;;  %v7960_v7 = vld [vmem:[%s11851_s1 + $0x12e4] ss:$16 sps:$4 sm:$0xff]  }
  0xd9   :  { %5120 = vmatprep.subr.bf16.mxu1 %v7900_v11  ;;  %v9813_v10 = vld [vmem:[%s11852_s0 + $0x40] sm:$0xff] }
  0xda   :  { %v7955_v11 = vld [vmem:[%s11851_s1 + $0x10e0] ss:$16 sps:$4 sm:$0xff]  }
  0xdb   :  { %5078 = vmatpush1.bf16.msra.mxu0 %v7895_v12  ;;  %v9821_v12 = vld [vmem:[%s11852_s0 + $0xa0] sm:$0xff] }
  0xdc   :  { %5121 = vmatpush1.bf16.msra.mxu1 %v7898_v13  ;;  %5079 = vmatprep.subr.bf16.mxu0 %v7903_v14  ;;  %v9826_v13 = vld [vmem:[%s11852_s0 + $0x48] sm:$0xff]  ;;  %v9830_v14 = vcombine.low %v9575_v44, %v9583_v46  ;;  %v7963_v44 = vld [vmem:[%s11851_s1 + $0x10c4] ss:$16 sps:$4 sm:$0xff]  }
  0xdd   :  { %5122 = vmatprep.subr.bf16.mxu1 %v7906_v15  ;;  %v9834_v15 = vcombine.low %v9588_v47, %v9601_v50  ;;  %v7966_v46 = vld [vmem:[%s11851_s1 + $0x12c4] ss:$16 sps:$4 sm:$0xff]   ;;  %v9854_v47 = vcombine.high %v9813_v10, %v9821_v12 }
  0xdf   :  { %5080 = vmatpush1.bf16.msra.mxu0 %v7901_v16  ;;  %v9839_v16 = vld [vmem:[%s11852_s0 + $0xa8] sm:$0xff] }
  0xe0   :  { %5123 = vmatpush1.bf16.msra.mxu1 %v7904_v17  ;;  %5081 = vmatprep.subr.bf16.mxu0 %v7909_v18  ;;  %v830_v17 = vrot.slane %v825_v4, %v829_v5  ;;  %v7958_v18 = vld [vmem:[%s11851_s1 + $0x12e0] ss:$16 sps:$4 sm:$0xff]   ;;  %v9858_v50 = vcombine.high %v9826_v13, %v9839_v16  ;;  %v7999_v4 = vld [vmem:[%s11851_s1 + $0x1004] ss:$16 sps:$4 sm:$0xff]  }
  0xe1   :  { %5124 = vmatprep.subr.bf16.mxu1 %v7912_v19 }
  0xe3   :  { %5082 = vmatpush2.bf16.msra.mxu0 %v7907_v22 }
  0xe4   :  { %5125 = vmatpush2.bf16.msra.mxu1 %v7910_v23  ;;  %5083 = vmatprep.subr.bf16.mxu0 %v7915_v24  ;;  %v7961_v23 = vld [vmem:[%s11851_s1 + $0x10c0] ss:$16 sps:$4 sm:$0xff]  }
  0xe5   :  { %5126 = vmatprep.subr.bf16.mxu1 %v7918_v25  ;;  %v7964_v25 = vld [vmem:[%s11851_s1 + $0x12c0] ss:$16 sps:$4 sm:$0xff]  }
  0xe7   :  { %5084 = vmatpush2.bf16.msra.mxu0 %v7913_v26 }
  0xe8   :  { %5127 = vmatpush2.bf16.msra.mxu1 %v7916_v27  ;;  %5085 = vmatprep.subr.bf16.mxu0 %v7921_v32  ;;  %v7969_v32 = vld [vmem:[%s11851_s1 + $0x10a4] ss:$16 sps:$4 sm:$0xff]  }
  0xe9   :  { %5128 = vmatprep.subr.bf16.mxu1 %v7924_v34  ;;  %v7972_v34 = vld [vmem:[%s11851_s1 + $0x12a4] ss:$16 sps:$4 sm:$0xff]  }
  0xeb   :  { %5086 = vmatpush2.bf16.msra.mxu0 %v7919_v36 }
  0xec   :  { %5129 = vmatpush2.bf16.msra.mxu1 %v7922_v37  ;;  %5087 = vmatprep.subr.bf16.mxu0 %v7927_v38  ;;  %v7967_v38 = vld [vmem:[%s11851_s1 + $0x10a0] ss:$16 sps:$4 sm:$0xff]  }
  0xed   :  { %5130 = vmatprep.subr.bf16.mxu1 %v7930_v39 }
  0xef   :  { %5088 = vmatpush2.bf16.msra.mxu0 %v7925_v40  ;;  %v7970_v40 = vld [vmem:[%s11851_s1 + $0x12a0] ss:$16 sps:$4 sm:$0xff]  }
  0xf0   :  { %5131 = vmatpush2.bf16.msra.mxu1 %v7928_v42  ;;  %5089 = vmatprep.subr.bf16.mxu0 %v7933_v45  ;;  %v7975_v45 = vld [vmem:[%s11851_s1 + $0x1084] ss:$16 sps:$4 sm:$0xff]  }
  0xf1   :  { %5132 = vmatprep.subr.bf16.mxu1 %v7936_v51  ;;  %v7978_v51 = vld [vmem:[%s11851_s1 + $0x1284] ss:$16 sps:$4 sm:$0xff]  }
  0xf3   :  { %5090 = vmatpush2.bf16.msra.mxu0 %v7931_v28 }
  0xf4   :  { %5133 = vmatpush2.bf16.msra.mxu1 %v7934_v29  ;;  %5091 = vmatprep.subr.bf16.mxu0 %v7939_v52  ;;  %v7973_v29 = vld [vmem:[%s11851_s1 + $0x1080] ss:$16 sps:$4 sm:$0xff]  }
  0xf5   :  { %5134 = vmatprep.subr.bf16.mxu1 %v7942_v54  ;;  %v7976_v52 = vld [vmem:[%s11851_s1 + $0x1280] ss:$16 sps:$4 sm:$0xff]   ;;  %v7981_v54 = vld [vmem:[%s11851_s1 + $0x1064] ss:$16 sps:$4 sm:$0xff]  }
  0xf7   :  { %5092 = vmatpush2.bf16.msra.mxu0 %v7937_v56  ;;  %v7984_v56 = vld [vmem:[%s11851_s1 + $0x1264] ss:$16 sps:$4 sm:$0xff]  }
  0xf8   :  { %5135 = vmatpush2.bf16.msra.mxu1 %v7940_v57  ;;  %5093 = vmatprep.subr.bf16.mxu0 %v7945_v59  ;;  %v7979_v57 = vld [vmem:[%s11851_s1 + $0x1060] ss:$16 sps:$4 sm:$0xff]   ;;  %v7987_v59 = vld [vmem:[%s11851_s1 + $0x1044] ss:$16 sps:$4 sm:$0xff]  }
  0xf9   :  { %5136 = vmatprep.subr.bf16.mxu1 %v7948_v60  ;;  %v7990_v60 = vld [vmem:[%s11851_s1 + $0x1244] ss:$16 sps:$4 sm:$0xff]  }
  0xfb   :  { %5094 = vmatpush2.bf16.msra.mxu0 %v7943_v61  ;;  %v7985_v61 = vld [vmem:[%s11851_s1 + $0x1040] ss:$16 sps:$4 sm:$0xff]  }
  0xfc   :  { %5137 = vmatpush2.bf16.msra.mxu1 %v7946_v62  ;;  %5095 = vmatprep.subr.bf16.mxu0 %v7951_v0  ;;  %v7988_v62 = vld [vmem:[%s11851_s1 + $0x1240] ss:$16 sps:$4 sm:$0xff]   ;;  %v7993_v0 = vld [vmem:[%s11851_s1 + $0x1024] ss:$16 sps:$4 sm:$0xff]  }
  0xfd   :  { %5138 = vmatprep.subr.bf16.mxu1 %v7954_v1  ;;  %v7996_v1 = vld [vmem:[%s11851_s1 + $0x1224] ss:$16 sps:$4 sm:$0xff]  }
  0xff   :  { %5096 = vmatpush2.bf16.msra.mxu0 %v7949_v2  ;;  %v7991_v2 = vld [vmem:[%s11851_s1 + $0x1020] ss:$16 sps:$4 sm:$0xff]  }
 0x100   :  { %5139 = vmatpush2.bf16.msra.mxu1 %v7952_v3  ;;  %5151 = vmatprep.subr.bf16.mxu0 %v7957_v6  ;;  %v7994_v3 = vld [vmem:[%s11851_s1 + $0x1220] ss:$16 sps:$4 sm:$0xff]   ;;  %v8002_v6 = vld [vmem:[%s11851_s1 + $0x1204] ss:$16 sps:$4 sm:$0xff]  }
 0x101   :  { %5194 = vmatprep.subr.bf16.mxu1 %v7960_v7  ;;  %v7997_v7 = vld [vmem:[%s11851_s1 + $0x1000] ss:$16 sps:$4 sm:$0xff]  }
 0x102   :  { %v4841_v19 = vpop.f32.mrf.mxu0  ;;  %5098 = vmatmul.mubr.bf16.vlgmr.msra.gmra.mxu0 %v9830_v14 }
 0x103   :  { %v4884_v22 = vpop.f32.mrf.mxu1  ;;  %5141 = vmatmul.mubr.bf16.vlgmr.msra.gmra.mxu1 %v9834_v15  ;;  %v4842_v24 = vadd.f32 %v4841_v19, %v830_v17  ;;  %5152 = vmatpush1.bf16.msra.mxu0 %v7955_v11  ;;  %v8000_v11 = vld [vmem:[%s11851_s1 + $0x1200] ss:$16 sps:$4 sm:$0xff]   ;;  %v8011_v19 = vld [vmem:[%s11851_s1 + $0x11c4] ss:$16 sps:$4 sm:$0xff]  }
 0x104   :  { %5195 = vmatpush1.bf16.msra.mxu1 %v7958_v18  ;;  %v9868_v26 = vpop.f32.mrf.mxu0  ;;  %5153 = vmatprep.subr.bf16.mxu0 %v7963_v44  ;;  %v8008_v18 = vld [vmem:[%s11851_s1 + $0x13e4] ss:$16 sps:$4 sm:$0xff]   ;;  %v8003_v44 = vld [vmem:[%s11851_s1 + $0x11e0] ss:$16 sps:$4 sm:$0xff]  }
 0x105   :  { %v9870_v27 = vpop.f32.mrf.mxu1  ;;  %5196 = vmatprep.subr.bf16.mxu1 %v7966_v46  ;;  %v9878_v36 = vadd.f32 %v4884_v22, %v4842_v24  ;;  %5183 = vmatprep.mubr.bf16.mxu0 %v9854_v47  ;;  %v8006_v46 = vld [vmem:[%s11851_s1 + $0x13e0] ss:$16 sps:$4 sm:$0xff]   ;;  %v8014_v22 = vld [vmem:[%s11851_s1 + $0x13c4] ss:$16 sps:$4 sm:$0xff]  }
 0x106   :  { %5226 = vmatprep.mubr.bf16.mxu1 %v9858_v50  ;;  %v4845_v37 = vpop.f32.mrf.mxu0  ;;  %v8012_v24 = vld [vmem:[%s11851_s1 + $0x13c0] ss:$16 sps:$4 sm:$0xff]  }
 0x107   :  { %v4846_v39 = vadd.f32 %v4845_v37, %v830_v17  ;;  %5154 = vmatpush1.bf16.msra.mxu0 %v7961_v23  ;;  %v4888_v42 = vpop.f32.mrf.mxu1  ;;  %v8005_v17 = vld [vmem:[%s11851_s1 + $0x11e4] ss:$16 sps:$4 sm:$0xff]   ;;  %v8009_v23 = vld [vmem:[%s11851_s1 + $0x11c0] ss:$16 sps:$4 sm:$0xff]  }
 0x108   :  { %5197 = vmatpush1.bf16.msra.mxu1 %v7964_v25  ;;  %5155 = vmatprep.subr.bf16.mxu0 %v7969_v32  ;;  %v8017_v25 = vld [vmem:[%s11851_s1 + $0x11a4] ss:$16 sps:$4 sm:$0xff]   ;;  %v8018_v37 = vld [vmem:[%s11851_s1 + $0x13a0] ss:$16 sps:$4 sm:$0xff]  }
 0x109   :  { %5198 = vmatprep.subr.bf16.mxu1 %v7972_v34  ;;  %v9894_v28 = vadd.f32 %v4888_v42, %v4846_v39  ;;  %v8020_v32 = vld [vmem:[%s11851_s1 + $0x13a4] ss:$16 sps:$4 sm:$0xff]   ;;  %v8015_v34 = vld [vmem:[%s11851_s1 + $0x11a0] ss:$16 sps:$4 sm:$0xff]  }
 0x10a   :  { %v8026_v39 = vld [vmem:[%s11851_s1 + $0x1384] ss:$16 sps:$4 sm:$0xff]   ;;  %v8024_v42 = vld [vmem:[%s11851_s1 + $0x1380] ss:$16 sps:$4 sm:$0xff]  }
 0x10b   :  { %5156 = vmatpush1.bf16.msra.mxu0 %v7967_v38  ;;  %v8023_v38 = vld [vmem:[%s11851_s1 + $0x1184] ss:$16 sps:$4 sm:$0xff]  }
 0x10c   :  { %5199 = vmatpush1.bf16.msra.mxu1 %v7970_v40  ;;  %5157 = vmatprep.subr.bf16.mxu0 %v7975_v45  ;;  %v8021_v40 = vld [vmem:[%s11851_s1 + $0x1180] ss:$16 sps:$4 sm:$0xff]   ;;  %v8029_v45 = vld [vmem:[%s11851_s1 + $0x1164] ss:$16 sps:$4 sm:$0xff]  }
 0x10d   :  { %5200 = vmatprep.subr.bf16.mxu1 %v7978_v51  ;;  %v8032_v51 = vld [vmem:[%s11851_s1 + $0x1364] ss:$16 sps:$4 sm:$0xff]  }
 0x10f   :  { %5158 = vmatpush1.bf16.msra.mxu0 %v7973_v29  ;;  %v8027_v29 = vld [vmem:[%s11851_s1 + $0x1160] ss:$16 sps:$4 sm:$0xff]  }
 0x110   :  { %5201 = vmatpush1.bf16.msra.mxu1 %v7976_v52  ;;  %5159 = vmatprep.subr.bf16.mxu0 %v7981_v54  ;;  %v8030_v52 = vld [vmem:[%s11851_s1 + $0x1360] ss:$16 sps:$4 sm:$0xff]   ;;  %v8035_v54 = vld [vmem:[%s11851_s1 + $0x1144] ss:$16 sps:$4 sm:$0xff]  }
 0x111   :  { %5202 = vmatprep.subr.bf16.mxu1 %v7984_v56  ;;  %v8038_v56 = vld [vmem:[%s11851_s1 + $0x1344] ss:$16 sps:$4 sm:$0xff]  }
 0x113   :  { %5160 = vmatpush1.bf16.msra.mxu0 %v7979_v57  ;;  %v8033_v57 = vld [vmem:[%s11851_s1 + $0x1140] ss:$16 sps:$4 sm:$0xff]  }
 0x114   :  { %5203 = vmatpush1.bf16.msra.mxu1 %v7982_v58  ;;  %5161 = vmatprep.subr.bf16.mxu0 %v7987_v59  ;;  %v8036_v58 = vld [vmem:[%s11851_s1 + $0x1340] ss:$16 sps:$4 sm:$0xff]   ;;  %v8041_v59 = vld [vmem:[%s11851_s1 + $0x1124] ss:$16 sps:$4 sm:$0xff]  }
 0x115   :  { %5204 = vmatprep.subr.bf16.mxu1 %v7990_v60  ;;  %v8044_v60 = vld [vmem:[%s11851_s1 + $0x1324] ss:$16 sps:$4 sm:$0xff]  }
 0x117   :  { %5162 = vmatpush1.bf16.msra.mxu0 %v7985_v61  ;;  %v8039_v61 = vld [vmem:[%s11851_s1 + $0x1120] ss:$16 sps:$4 sm:$0xff]  }
 0x118   :  { %5205 = vmatpush1.bf16.msra.mxu1 %v7988_v62  ;;  %5163 = vmatprep.subr.bf16.mxu0 %v7993_v0  ;;  %v8042_v62 = vld [vmem:[%s11851_s1 + $0x1320] ss:$16 sps:$4 sm:$0xff]   ;;  %v8047_v0 = vld [vmem:[%s11851_s1 + $0x1104] ss:$16 sps:$4 sm:$0xff]  }
 0x119   :  { %5206 = vmatprep.subr.bf16.mxu1 %v7996_v1  ;;  %v8050_v1 = vld [vmem:[%s11851_s1 + $0x1304] ss:$16 sps:$4 sm:$0xff]  }
 0x11b   :  { %5164 = vmatpush1.bf16.msra.mxu0 %v7991_v2  ;;  %v8045_v2 = vld [vmem:[%s11851_s1 + $0x1100] ss:$16 sps:$4 sm:$0xff]  }
 0x11c   :  { %5207 = vmatpush1.bf16.msra.mxu1 %v7994_v3  ;;  %5165 = vmatprep.subr.bf16.mxu0 %v7999_v4  ;;  %v8048_v3 = vld [vmem:[%s11851_s1 + $0x1300] ss:$16 sps:$4 sm:$0xff]   ;;  %v8053_v4 = vld [vmem:[%s11851_s1 + $0x14e4] ss:$16 sps:$4 sm:$0xff]  }
 0x11d   :  { %5208 = vmatprep.subr.bf16.mxu1 %v8002_v6  ;;  %v8056_v6 = vld [vmem:[%s11851_s1 + $0x16e4] ss:$16 sps:$4 sm:$0xff]  }
 0x11f   :  { %5166 = vmatpush1.bf16.msra.mxu0 %v7997_v7  ;;  %v10055_v7 = vld [vmem:[%s11852_s0 + $0x50] sm:$0xff] }
 0x120   :  { %5209 = vmatpush1.bf16.msra.mxu1 %v8000_v11  ;;  %5167 = vmatprep.subr.bf16.mxu0 %v8005_v17  ;;  %v10060_v11 = vld [vmem:[%s11852_s0 + $0xb0] sm:$0xff]  ;;  %v10065_v17 = vld [vmem:[%s11852_s0 + $0x58] sm:$0xff] }
 0x121   :  { %5210 = vmatprep.subr.bf16.mxu1 %v8008_v18  ;;  %v10070_v18 = vld [vmem:[%s11852_s0 + $0xb8] sm:$0xff] }
 0x123   :  { %5168 = vmatpush2.bf16.msra.mxu0 %v8003_v44  ;;  %v8051_v44 = vld [vmem:[%s11851_s1 + $0x14e0] ss:$16 sps:$4 sm:$0xff]  }
 0x124   :  { %5211 = vmatpush2.bf16.msra.mxu1 %v8006_v46  ;;  %5169 = vmatprep.subr.bf16.mxu0 %v8011_v19  ;;  %v8054_v46 = vld [vmem:[%s11851_s1 + $0x16e0] ss:$16 sps:$4 sm:$0xff]   ;;  %v10080_v19 = vcombine.low %v9813_v10, %v9821_v12  ;;  %v8062_v10 = vld [vmem:[%s11851_s1 + $0x16c4] ss:$16 sps:$4 sm:$0xff]  }
 0x125   :  { %5212 = vmatprep.subr.bf16.mxu1 %v8014_v22  ;;  %v10084_v22 = vcombine.low %v9826_v13, %v9839_v16  ;;  %v8057_v12 = vld [vmem:[%s11851_s1 + $0x14c0] ss:$16 sps:$4 sm:$0xff]   ;;  %v10104_v16 = vcombine.high %v10055_v7, %v10060_v11 }
 0x126   :  { %v8060_v13 = vld [vmem:[%s11851_s1 + $0x16c0] ss:$16 sps:$4 sm:$0xff]  }
 0x127   :  { %5170 = vmatpush2.bf16.msra.mxu0 %v8009_v23  ;;  %v10086_v23 = vpop.f32.mrf.mxu0 }
 0x128   :  { %5213 = vmatpush2.bf16.msra.mxu1 %v8012_v24  ;;  %5171 = vmatprep.subr.bf16.mxu0 %v8017_v25  ;;  %v10088_v24 = vpop.f32.mrf.mxu1  ;;  %v8059_v25 = vld [vmem:[%s11851_s1 + $0x14c4] ss:$16 sps:$4 sm:$0xff]  }
 0x129   :  { %5214 = vmatprep.subr.bf16.mxu1 %v8020_v32  ;;  %v10108_v32 = vcombine.high %v10065_v17, %v10070_v18 }
 0x12b   :  { %5172 = vmatpush2.bf16.msra.mxu0 %v8015_v34 }
 0x12c   :  { %5215 = vmatpush2.bf16.msra.mxu1 %v8018_v37  ;;  %5173 = vmatprep.subr.bf16.mxu0 %v8023_v38 }
 0x12d   :  { %5216 = vmatprep.subr.bf16.mxu1 %v8026_v39 }
 0x12f   :  { %5174 = vmatpush2.bf16.msra.mxu0 %v8021_v40 }
 0x130   :  { %5217 = vmatpush2.bf16.msra.mxu1 %v8024_v42  ;;  %5175 = vmatprep.subr.bf16.mxu0 %v8029_v45  ;;  %v8065_v42 = vld [vmem:[%s11851_s1 + $0x14a4] ss:$16 sps:$4 sm:$0xff]  }
 0x131   :  { %5218 = vmatprep.subr.bf16.mxu1 %v8032_v51  ;;  %v8068_v45 = vld [vmem:[%s11851_s1 + $0x16a4] ss:$16 sps:$4 sm:$0xff]  }
 0x133   :  { %5176 = vmatpush2.bf16.msra.mxu0 %v8027_v29  ;;  %v8066_v29 = vld [vmem:[%s11851_s1 + $0x16a0] ss:$16 sps:$4 sm:$0xff]  }
 0x134   :  { %5219 = vmatpush2.bf16.msra.mxu1 %v8030_v52  ;;  %5177 = vmatprep.subr.bf16.mxu0 %v8035_v54 }
 0x135   :  { %5220 = vmatprep.subr.bf16.mxu1 %v8038_v56 }
 0x137   :  { %5178 = vmatpush2.bf16.msra.mxu0 %v8033_v57  ;;  %v8071_v57 = vld [vmem:[%s11851_s1 + $0x1484] ss:$16 sps:$4 sm:$0xff]  }
 0x138   :  { %5221 = vmatpush2.bf16.msra.mxu1 %v8036_v58  ;;  %5179 = vmatprep.subr.bf16.mxu0 %v8041_v59  ;;  %v8074_v58 = vld [vmem:[%s11851_s1 + $0x1684] ss:$16 sps:$4 sm:$0xff]  }
 0x139   :  { %5222 = vmatprep.subr.bf16.mxu1 %v8044_v60  ;;  %v8072_v60 = vld [vmem:[%s11851_s1 + $0x1680] ss:$16 sps:$4 sm:$0xff]  }
 0x13b   :  { %5180 = vmatpush2.bf16.msra.mxu0 %v8039_v61  ;;  %v8077_v61 = vld [vmem:[%s11851_s1 + $0x1464] ss:$16 sps:$4 sm:$0xff]  }
 0x13c   :  { %5223 = vmatpush2.bf16.msra.mxu1 %v8042_v62  ;;  %5181 = vmatprep.subr.bf16.mxu0 %v8047_v0  ;;  %v8080_v62 = vld [vmem:[%s11851_s1 + $0x1664] ss:$16 sps:$4 sm:$0xff]   ;;  %v8075_v0 = vld [vmem:[%s11851_s1 + $0x1460] ss:$16 sps:$4 sm:$0xff]  }
 0x13d   :  { %5224 = vmatprep.subr.bf16.mxu1 %v8050_v1  ;;  %v8078_v1 = vld [vmem:[%s11851_s1 + $0x1660] ss:$16 sps:$4 sm:$0xff]  }
 0x13f   :  { %5182 = vmatpush2.bf16.msra.mxu0 %v8045_v2  ;;  %v8083_v2 = vld [vmem:[%s11851_s1 + $0x1444] ss:$16 sps:$4 sm:$0xff]  }
 0x140   :  { %5225 = vmatpush2.bf16.msra.mxu1 %v8048_v3  ;;  %5237 = vmatprep.subr.bf16.mxu0 %v8053_v4  ;;  %v8086_v3 = vld [vmem:[%s11851_s1 + $0x1644] ss:$16 sps:$4 sm:$0xff]   ;;  %v8081_v4 = vld [vmem:[%s11851_s1 + $0x1440] ss:$16 sps:$4 sm:$0xff]  }
 0x141   :  { %5280 = vmatprep.subr.bf16.mxu1 %v8056_v6  ;;  %v8084_v6 = vld [vmem:[%s11851_s1 + $0x1640] ss:$16 sps:$4 sm:$0xff]  }
 0x142   :  { %v4927_v34 = vpop.f32.mrf.mxu0  ;;  %5184 = vmatmul.mubr.bf16.vlgmr.msra.gmra.mxu0 %v10080_v19 }
 0x143   :  { %v4970_v37 = vpop.f32.mrf.mxu1  ;;  %5227 = vmatmul.mubr.bf16.vlgmr.msra.gmra.mxu1 %v10084_v22  ;;  %v4928_v38 = vadd.f32 %v4927_v34, %v9878_v36  ;;  %5238 = vmatpush1.bf16.msra.mxu0 %v8051_v44  ;;  %v8063_v36 = vld [vmem:[%s11851_s1 + $0x14a0] ss:$16 sps:$4 sm:$0xff]   ;;  %v8089_v44 = vld [vmem:[%s11851_s1 + $0x1424] ss:$16 sps:$4 sm:$0xff]  }
 0x144   :  { %5281 = vmatpush1.bf16.msra.mxu1 %v8054_v46  ;;  %v10113_v39 = vpop.f32.mrf.mxu0  ;;  %5239 = vmatprep.subr.bf16.mxu0 %v8059_v25  ;;  %v8092_v46 = vld [vmem:[%s11851_s1 + $0x1624] ss:$16 sps:$4 sm:$0xff]   ;;  %v8087_v25 = vld [vmem:[%s11851_s1 + $0x1420] ss:$16 sps:$4 sm:$0xff]  }
 0x145   :  { %v10115_v40 = vpop.f32.mrf.mxu1  ;;  %5282 = vmatprep.subr.bf16.mxu1 %v8062_v10  ;;  %v10123_v51 = vadd.f32 %v4970_v37, %v4928_v38  ;;  %5269 = vmatprep.mubr.bf16.mxu0 %v10104_v16  ;;  %v8090_v10 = vld [vmem:[%s11851_s1 + $0x1620] ss:$16 sps:$4 sm:$0xff]   ;;  %v8101_v38 = vld [vmem:[%s11851_s1 + $0x15e4] ss:$16 sps:$4 sm:$0xff]  }
 0x146   :  { %5312 = vmatprep.mubr.bf16.mxu1 %v10108_v32  ;;  %v4931_v52 = vpop.f32.mrf.mxu0  ;;  %v8093_v34 = vld [vmem:[%s11851_s1 + $0x1400] ss:$16 sps:$4 sm:$0xff]  }
 0x147   :  { %v4932_v54 = vadd.f32 %v4931_v52, %v9894_v28  ;;  %5240 = vmatpush1.bf16.msra.mxu0 %v8057_v12  ;;  %v4974_v56 = vpop.f32.mrf.mxu1  ;;  %v8069_v28 = vld [vmem:[%s11851_s1 + $0x1480] ss:$16 sps:$4 sm:$0xff]   ;;  %v8095_v12 = vld [vmem:[%s11851_s1 + $0x1404] ss:$16 sps:$4 sm:$0xff]  }
 0x148   :  { %5283 = vmatpush1.bf16.msra.mxu1 %v8060_v13  ;;  %5241 = vmatprep.subr.bf16.mxu0 %v8065_v42  ;;  %v8098_v13 = vld [vmem:[%s11851_s1 + $0x1604] ss:$16 sps:$4 sm:$0xff]   ;;  %v8096_v37 = vld [vmem:[%s11851_s1 + $0x1600] ss:$16 sps:$4 sm:$0xff]  }
 0x149   :  { %5284 = vmatprep.subr.bf16.mxu1 %v8068_v45  ;;  %v10140_v59 = vadd.f32 %v4974_v56, %v4932_v54  ;;  %v8104_v42 = vld [vmem:[%s11851_s1 + $0x17e4] ss:$16 sps:$4 sm:$0xff]   ;;  %v8099_v45 = vld [vmem:[%s11851_s1 + $0x15e0] ss:$16 sps:$4 sm:$0xff]  }
 0x14a   :  { %v8110_v52 = vld [vmem:[%s11851_s1 + $0x17c4] ss:$16 sps:$4 sm:$0xff]   ;;  %v8105_v54 = vld [vmem:[%s11851_s1 + $0x15c0] ss:$16 sps:$4 sm:$0xff]  }
 0x14b   :  { %5242 = vmatpush1.bf16.msra.mxu0 %v8063_v36  ;;  %v8102_v36 = vld [vmem:[%s11851_s1 + $0x17e0] ss:$16 sps:$4 sm:$0xff]  }
 0x14c   :  { %5285 = vmatpush1.bf16.msra.mxu1 %v8066_v29  ;;  %5243 = vmatprep.subr.bf16.mxu0 %v8071_v57  ;;  %v8107_v29 = vld [vmem:[%s11851_s1 + $0x15c4] ss:$16 sps:$4 sm:$0xff]   ;;  %v8108_v56 = vld [vmem:[%s11851_s1 + $0x17c0] ss:$16 sps:$4 sm:$0xff]  }
 0x14d   :  { %5286 = vmatprep.subr.bf16.mxu1 %v8074_v58  ;;  %v8113_v57 = vld [vmem:[%s11851_s1 + $0x15a4] ss:$16 sps:$4 sm:$0xff]  }
 0x14e   :  { %v8116_v58 = vld [vmem:[%s11851_s1 + $0x17a4] ss:$16 sps:$4 sm:$0xff]  }
 0x14f   :  { %5244 = vmatpush1.bf16.msra.mxu0 %v8069_v28  ;;  %v8111_v28 = vld [vmem:[%s11851_s1 + $0x15a0] ss:$16 sps:$4 sm:$0xff]  }
 0x150   :  { %5287 = vmatpush1.bf16.msra.mxu1 %v8072_v60  ;;  %5245 = vmatprep.subr.bf16.mxu0 %v8077_v61  ;;  %v8114_v60 = vld [vmem:[%s11851_s1 + $0x17a0] ss:$16 sps:$4 sm:$0xff]   ;;  %v8119_v61 = vld [vmem:[%s11851_s1 + $0x1584] ss:$16 sps:$4 sm:$0xff]  }
 0x151   :  { %5288 = vmatprep.subr.bf16.mxu1 %v8080_v62  ;;  %v8122_v62 = vld [vmem:[%s11851_s1 + $0x1784] ss:$16 sps:$4 sm:$0xff]  }
 0x153   :  { %5246 = vmatpush1.bf16.msra.mxu0 %v8075_v0  ;;  %v8117_v0 = vld [vmem:[%s11851_s1 + $0x1580] ss:$16 sps:$4 sm:$0xff]  }
 0x154   :  { %5289 = vmatpush1.bf16.msra.mxu1 %v8078_v1  ;;  %5247 = vmatprep.subr.bf16.mxu0 %v8083_v2  ;;  %v8120_v1 = vld [vmem:[%s11851_s1 + $0x1780] ss:$16 sps:$4 sm:$0xff]   ;;  %v8125_v2 = vld [vmem:[%s11851_s1 + $0x1564] ss:$16 sps:$4 sm:$0xff]  }
 0x155   :  { %5290 = vmatprep.subr.bf16.mxu1 %v8086_v3  ;;  %v8128_v3 = vld [vmem:[%s11851_s1 + $0x1764] ss:$16 sps:$4 sm:$0xff]  }
 0x157   :  { %5248 = vmatpush1.bf16.msra.mxu0 %v8081_v4  ;;  %v8123_v4 = vld [vmem:[%s11851_s1 + $0x1560] ss:$16 sps:$4 sm:$0xff]  }
 0x158   :  { %5291 = vmatpush1.bf16.msra.mxu1 %v8084_v6  ;;  %5249 = vmatprep.subr.bf16.mxu0 %v8089_v44  ;;  %v8126_v6 = vld [vmem:[%s11851_s1 + $0x1760] ss:$16 sps:$4 sm:$0xff]   ;;  %v8131_v44 = vld [vmem:[%s11851_s1 + $0x1544] ss:$16 sps:$4 sm:$0xff]  }
 0x159   :  { %5292 = vmatprep.subr.bf16.mxu1 %v8092_v46  ;;  %v8134_v46 = vld [vmem:[%s11851_s1 + $0x1744] ss:$16 sps:$4 sm:$0xff]  }
 0x15b   :  { %5250 = vmatpush1.bf16.msra.mxu0 %v8087_v25  ;;  %v8129_v25 = vld [vmem:[%s11851_s1 + $0x1540] ss:$16 sps:$4 sm:$0xff]  }
 0x15c   :  { %5293 = vmatpush1.bf16.msra.mxu1 %v8090_v10  ;;  %5251 = vmatprep.subr.bf16.mxu0 %v8095_v12  ;;  %v8132_v10 = vld [vmem:[%s11851_s1 + $0x1740] ss:$16 sps:$4 sm:$0xff]   ;;  %v8137_v12 = vld [vmem:[%s11851_s1 + $0x1524] ss:$16 sps:$4 sm:$0xff]  }
 0x15d   :  { %5294 = vmatprep.subr.bf16.mxu1 %v8098_v13  ;;  %v8140_v13 = vld [vmem:[%s11851_s1 + $0x1724] ss:$16 sps:$4 sm:$0xff]  }
 0x15f   :  { %5252 = vmatpush1.bf16.msra.mxu0 %v8093_v34  ;;  %v8135_v34 = vld [vmem:[%s11851_s1 + $0x1520] ss:$16 sps:$4 sm:$0xff]  }
 0x160   :  { %5295 = vmatpush1.bf16.msra.mxu1 %v8096_v37  ;;  %5253 = vmatprep.subr.bf16.mxu0 %v8101_v38  ;;  %v8138_v37 = vld [vmem:[%s11851_s1 + $0x1720] ss:$16 sps:$4 sm:$0xff]   ;;  %v8143_v38 = vld [vmem:[%s11851_s1 + $0x1504] ss:$16 sps:$4 sm:$0xff]  }
 0x161   :  { %5296 = vmatprep.subr.bf16.mxu1 %v8104_v42  ;;  %v8146_v42 = vld [vmem:[%s11851_s1 + $0x1704] ss:$16 sps:$4 sm:$0xff]  }
 0x163   :  { %5254 = vmatpush2.bf16.msra.mxu0 %v8099_v45  ;;  %v8141_v45 = vld [vmem:[%s11851_s1 + $0x1500] ss:$16 sps:$4 sm:$0xff]  }
 0x164   :  { %5297 = vmatpush2.bf16.msra.mxu1 %v8102_v36  ;;  %5255 = vmatprep.subr.bf16.mxu0 %v8107_v29  ;;  %v8144_v36 = vld [vmem:[%s11851_s1 + $0x1700] ss:$16 sps:$4 sm:$0xff]   ;;  %v8149_v29 = vld [vmem:[%s11851_s1 + $0xec] ss:$16 sps:$4 sm:$0xff]  }
 0x165   :  { %5298 = vmatprep.subr.bf16.mxu1 %v8110_v52  ;;  %v8152_v52 = vld [vmem:[%s11851_s1 + $0x2ec] ss:$16 sps:$4 sm:$0xff]  }
 0x167   :  { %5256 = vmatpush2.bf16.msra.mxu0 %v8105_v54  ;;  %v8147_v54 = vld [vmem:[%s11851_s1 + $0xe8] ss:$16 sps:$4 sm:$0xff]  }
 0x168   :  { %5299 = vmatpush2.bf16.msra.mxu1 %v8108_v56  ;;  %5257 = vmatprep.subr.bf16.mxu0 %v8113_v57  ;;  %v8150_v56 = vld [vmem:[%s11851_s1 + $0x2e8] ss:$16 sps:$4 sm:$0xff]   ;;  %v10306_v57 = vcombine.low %v10055_v7, %v10060_v11  ;;  %v8158_v7 = vld [vmem:[%s11851_s1 + $0x2cc] ss:$16 sps:$4 sm:$0xff]  }
 0x169   :  { %5300 = vmatprep.subr.bf16.mxu1 %v8116_v58  ;;  %v10310_v58 = vcombine.low %v10065_v17, %v10070_v18  ;;  %v8153_v11 = vld [vmem:[%s11851_s1 + $0xc8] ss:$16 sps:$4 sm:$0xff]  }
 0x16a   :  { %v8156_v17 = vld [vmem:[%s11851_s1 + $0x2c8] ss:$16 sps:$4 sm:$0xff]  }
 0x16b   :  { %5258 = vmatpush2.bf16.msra.mxu0 %v8111_v28  ;;  %v10312_v28 = vpop.f32.mrf.mxu0 }
 0x16c   :  { %5301 = vmatpush2.bf16.msra.mxu1 %v8114_v60  ;;  %5259 = vmatprep.subr.bf16.mxu0 %v8119_v61  ;;  %v10314_v60 = vpop.f32.mrf.mxu1  ;;  %v8155_v61 = vld [vmem:[%s11851_s1 + $0xcc] ss:$16 sps:$4 sm:$0xff]  }
 0x16d   :  { %5302 = vmatprep.subr.bf16.mxu1 %v8122_v62 }
 0x16f   :  { %5260 = vmatpush2.bf16.msra.mxu0 %v8117_v0 }
 0x170   :  { %5303 = vmatpush2.bf16.msra.mxu1 %v8120_v1  ;;  %5261 = vmatprep.subr.bf16.mxu0 %v8125_v2 }
 0x171   :  { %5304 = vmatprep.subr.bf16.mxu1 %v8128_v3  ;;  %v8161_v3 = vld [vmem:[%s11851_s1 + $0xac] ss:$16 sps:$4 sm:$0xff]  }
 0x173   :  { %5262 = vmatpush2.bf16.msra.mxu0 %v8123_v4  ;;  %v8164_v4 = vld [vmem:[%s11851_s1 + $0x2ac] ss:$16 sps:$4 sm:$0xff]  }
 0x174   :  { %5305 = vmatpush2.bf16.msra.mxu1 %v8126_v6  ;;  %5263 = vmatprep.subr.bf16.mxu0 %v8131_v44  ;;  %v8162_v44 = vld [vmem:[%s11851_s1 + $0x2a8] ss:$16 sps:$4 sm:$0xff]  }
 0x175   :  { %5306 = vmatprep.subr.bf16.mxu1 %v8134_v46 }
 0x177   :  { %5264 = vmatpush2.bf16.msra.mxu0 %v8129_v25 }
 0x178   :  { %5307 = vmatpush2.bf16.msra.mxu1 %v8132_v10  ;;  %5265 = vmatprep.subr.bf16.mxu0 %v8137_v12  ;;  %v8167_v12 = vld [vmem:[%s11851_s1 + $0x8c] ss:$16 sps:$4 sm:$0xff]  }
 0x179   :  { %5308 = vmatprep.subr.bf16.mxu1 %v8140_v13  ;;  %v8170_v13 = vld [vmem:[%s11851_s1 + $0x28c] ss:$16 sps:$4 sm:$0xff]  }
 0x17b   :  { %5266 = vmatpush2.bf16.msra.mxu0 %v8135_v34 }
 0x17c   :  { %5309 = vmatpush2.bf16.msra.mxu1 %v8138_v37  ;;  %5267 = vmatprep.subr.bf16.mxu0 %v8143_v38  ;;  %v8176_v37 = vld [vmem:[%s11851_s1 + $0x26c] ss:$16 sps:$4 sm:$0xff]   ;;  %v8171_v38 = vld [vmem:[%s11851_s1 + $0x68] ss:$16 sps:$4 sm:$0xff]  }
 0x17d   :  { %5310 = vmatprep.subr.bf16.mxu1 %v8146_v42  ;;  %v8174_v42 = vld [vmem:[%s11851_s1 + $0x268] ss:$16 sps:$4 sm:$0xff]  }
 0x17f   :  { %5268 = vmatpush2.bf16.msra.mxu0 %v8141_v45  ;;  %v8179_v45 = vld [vmem:[%s11851_s1 + $0x4c] ss:$16 sps:$4 sm:$0xff]  }
 0x180   :  { %5311 = vmatpush2.bf16.msra.mxu1 %v8144_v36  ;;  %5323 = vmatprep.subr.bf16.mxu0 %v8149_v29  ;;  %v8182_v36 = vld [vmem:[%s11851_s1 + $0x24c] ss:$16 sps:$4 sm:$0xff]   ;;  %v8177_v29 = vld [vmem:[%s11851_s1 + $0x48] ss:$16 sps:$4 sm:$0xff]  }
 0x181   :  { %5366 = vmatprep.subr.bf16.mxu1 %v8152_v52  ;;  %v8180_v52 = vld [vmem:[%s11851_s1 + $0x248] ss:$16 sps:$4 sm:$0xff]  }
 0x182   :  { %v5013_v18 = vpop.f32.mrf.mxu0  ;;  %5270 = vmatmul.mubr.bf16.vlgmr.msra.gmra.mxu0 %v10306_v57 }
 0x183   :  { %v5056_v62 = vpop.f32.mrf.mxu1  ;;  %5313 = vmatmul.mubr.bf16.vlgmr.msra.gmra.mxu1 %v10310_v58  ;;  %v5014_v0 = vadd.f32 %v5013_v18, %v10123_v51  ;;  %5324 = vmatpush1.bf16.msra.mxu0 %v8147_v54  ;;  %v8159_v51 = vld [vmem:[%s11851_s1 + $0xa8] ss:$16 sps:$4 sm:$0xff]   ;;  %v8185_v54 = vld [vmem:[%s11851_s1 + $0x2c] ss:$16 sps:$4 sm:$0xff]  }
 0x184   :  { %5367 = vmatpush1.bf16.msra.mxu1 %v8150_v56  ;;  %v10331_v1 = vpop.f32.mrf.mxu0  ;;  %5325 = vmatprep.subr.bf16.mxu0 %v8155_v61  ;;  %v8188_v56 = vld [vmem:[%s11851_s1 + $0x22c] ss:$16 sps:$4 sm:$0xff]   ;;  %v8183_v61 = vld [vmem:[%s11851_s1 + $0x28] ss:$16 sps:$4 sm:$0xff]  }
 0x185   :  { %v10333_v2 = vpop.f32.mrf.mxu1  ;;  %5368 = vmatprep.subr.bf16.mxu1 %v8158_v7  ;;  %v10341_v6 = vadd.f32 %v5056_v62, %v5014_v0  ;;  %5355 = vmatprep.mubr.bf16.mxu0 %v9055_v53  ;;  %v8165_v53 = vld [vmem:[%s11851_s1 + $0x88] ss:$16 sps:$4 sm:$0xff]   ;;  %v8197_v0 = vld [vmem:[%s11851_s1 + $0x1ec] ss:$16 sps:$4 sm:$0xff]  }
 0x186   :  { %5398 = vmatprep.mubr.bf16.mxu1 %v9060_v55  ;;  %v5017_v46 = vpop.f32.mrf.mxu0  ;;  %v8168_v55 = vld [vmem:[%s11851_s1 + $0x288] ss:$16 sps:$4 sm:$0xff]  }
 0x187   :  { %v5018_v25 = vadd.f32 %v5017_v46, %v10140_v59  ;;  %5326 = vmatpush1.bf16.msra.mxu0 %v8153_v11  ;;  %v5060_v10 = vpop.f32.mrf.mxu1  ;;  %v8173_v59 = vld [vmem:[%s11851_s1 + $0x6c] ss:$16 sps:$4 sm:$0xff]   ;;  %v8186_v7 = vld [vmem:[%s11851_s1 + $0x228] ss:$16 sps:$4 sm:$0xff]  }
 0x188   :  { %5369 = vmatpush1.bf16.msra.mxu1 %v8156_v17  ;;  %5327 = vmatprep.subr.bf16.mxu0 %v8161_v3  ;;  %v8191_v11 = vld [vmem:[%s11851_s1 + $0xc] ss:$16 sps:$4 sm:$0xff]   ;;  %v8189_v18 = vld [vmem:[%s11851_s1 + $0x8] ss:$16 sps:$4 sm:$0xff]  }
 0x189   :  { %5370 = vmatprep.subr.bf16.mxu1 %v8164_v4  ;;  %v10358_v34 = vadd.f32 %v5060_v10, %v5018_v25  ;;  %v8194_v17 = vld [vmem:[%s11851_s1 + $0x20c] ss:$16 sps:$4 sm:$0xff]   ;;  %v8192_v62 = vld [vmem:[%s11851_s1 + $0x208] ss:$16 sps:$4 sm:$0xff]  }
 0x18a   :  { %v8200_v3 = vld [vmem:[%s11851_s1 + $0x3ec] ss:$16 sps:$4 sm:$0xff]   ;;  %v8195_v4 = vld [vmem:[%s11851_s1 + $0x1e8] ss:$16 sps:$4 sm:$0xff]  }
 0x18b   :  { %5328 = vmatpush1.bf16.msra.mxu0 %v8159_v51  ;;  %v8198_v51 = vld [vmem:[%s11851_s1 + $0x3e8] ss:$16 sps:$4 sm:$0xff]   ;;  %v8206_v46 = vld [vmem:[%s11851_s1 + $0x3cc] ss:$16 sps:$4 sm:$0xff]  }
 0x18c   :  { %5371 = vmatpush1.bf16.msra.mxu1 %v8162_v44  ;;  %5329 = vmatprep.subr.bf16.mxu0 %v8167_v12  ;;  %v8203_v44 = vld [vmem:[%s11851_s1 + $0x1cc] ss:$16 sps:$4 sm:$0xff]   ;;  %v8201_v25 = vld [vmem:[%s11851_s1 + $0x1c8] ss:$16 sps:$4 sm:$0xff]  }
 0x18d   :  { %5372 = vmatprep.subr.bf16.mxu1 %v8170_v13  ;;  %v8204_v10 = vld [vmem:[%s11851_s1 + $0x3c8] ss:$16 sps:$4 sm:$0xff]   ;;  %v8209_v12 = vld [vmem:[%s11851_s1 + $0x1ac] ss:$16 sps:$4 sm:$0xff]  }
 0x18e   :  { %v8212_v13 = vld [vmem:[%s11851_s1 + $0x3ac] ss:$16 sps:$4 sm:$0xff]  }
 0x18f   :  { %5330 = vmatpush1.bf16.msra.mxu0 %v8165_v53  ;;  %v8207_v53 = vld [vmem:[%s11851_s1 + $0x1a8] ss:$16 sps:$4 sm:$0xff]  }
 0x190   :  { %5373 = vmatpush1.bf16.msra.mxu1 %v8168_v55  ;;  %5331 = vmatprep.subr.bf16.mxu0 %v8173_v59  ;;  %v8210_v55 = vld [vmem:[%s11851_s1 + $0x3a8] ss:$16 sps:$4 sm:$0xff]   ;;  %v8215_v59 = vld [vmem:[%s11851_s1 + $0x18c] ss:$16 sps:$4 sm:$0xff]  }
 0x191   :  { %5374 = vmatprep.subr.bf16.mxu1 %v8176_v37  ;;  %v8218_v37 = vld [vmem:[%s11851_s1 + $0x38c] ss:$16 sps:$4 sm:$0xff]  }
 0x193   :  { %5332 = vmatpush1.bf16.msra.mxu0 %v8171_v38  ;;  %v8213_v38 = vld [vmem:[%s11851_s1 + $0x188] ss:$16 sps:$4 sm:$0xff]  }
 0x194   :  { %5375 = vmatpush1.bf16.msra.mxu1 %v8174_v42  ;;  %5333 = vmatprep.subr.bf16.mxu0 %v8179_v45  ;;  %v8216_v42 = vld [vmem:[%s11851_s1 + $0x388] ss:$16 sps:$4 sm:$0xff]   ;;  %v8221_v45 = vld [vmem:[%s11851_s1 + $0x16c] ss:$16 sps:$4 sm:$0xff]  }
 0x195   :  { %5376 = vmatprep.subr.bf16.mxu1 %v8182_v36  ;;  %v8224_v36 = vld [vmem:[%s11851_s1 + $0x36c] ss:$16 sps:$4 sm:$0xff]  }
 0x197   :  { %5334 = vmatpush1.bf16.msra.mxu0 %v8177_v29  ;;  %v8219_v29 = vld [vmem:[%s11851_s1 + $0x168] ss:$16 sps:$4 sm:$0xff]  }
 0x198   :  { %5377 = vmatpush1.bf16.msra.mxu1 %v8180_v52  ;;  %5335 = vmatprep.subr.bf16.mxu0 %v8185_v54  ;;  %v8222_v52 = vld [vmem:[%s11851_s1 + $0x368] ss:$16 sps:$4 sm:$0xff]   ;;  %v8227_v54 = vld [vmem:[%s11851_s1 + $0x14c] ss:$16 sps:$4 sm:$0xff]  }
 0x199   :  { %5378 = vmatprep.subr.bf16.mxu1 %v8188_v56  ;;  %v8230_v56 = vld [vmem:[%s11851_s1 + $0x34c] ss:$16 sps:$4 sm:$0xff]  }
 0x19b   :  { %5336 = vmatpush1.bf16.msra.mxu0 %v8183_v61  ;;  %v8225_v61 = vld [vmem:[%s11851_s1 + $0x148] ss:$16 sps:$4 sm:$0xff]  }
 0x19c   :  { %5379 = vmatpush1.bf16.msra.mxu1 %v8186_v7  ;;  %5337 = vmatprep.subr.bf16.mxu0 %v8191_v11  ;;  %v8228_v7 = vld [vmem:[%s11851_s1 + $0x348] ss:$16 sps:$4 sm:$0xff]   ;;  %v8233_v11 = vld [vmem:[%s11851_s1 + $0x12c] ss:$16 sps:$4 sm:$0xff]  }
 0x19d   :  { %5380 = vmatprep.subr.bf16.mxu1 %v8194_v17  ;;  %v8236_v17 = vld [vmem:[%s11851_s1 + $0x32c] ss:$16 sps:$4 sm:$0xff]  }
 0x19f   :  { %5338 = vmatpush1.bf16.msra.mxu0 %v8189_v18  ;;  %v8231_v18 = vld [vmem:[%s11851_s1 + $0x128] ss:$16 sps:$4 sm:$0xff]  }
 0x1a0   :  { %5381 = vmatpush1.bf16.msra.mxu1 %v8192_v62  ;;  %5339 = vmatprep.subr.bf16.mxu0 %v8197_v0  ;;  %v8234_v62 = vld [vmem:[%s11851_s1 + $0x328] ss:$16 sps:$4 sm:$0xff]   ;;  %v8239_v0 = vld [vmem:[%s11851_s1 + $0x10c] ss:$16 sps:$4 sm:$0xff]  }
 0x1a1   :  { %5382 = vmatprep.subr.bf16.mxu1 %v8200_v3  ;;  %v8242_v3 = vld [vmem:[%s11851_s1 + $0x30c] ss:$16 sps:$4 sm:$0xff]  }
 0x1a3   :  { %5340 = vmatpush2.bf16.msra.mxu0 %v8195_v4  ;;  %v8237_v4 = vld [vmem:[%s11851_s1 + $0x108] ss:$16 sps:$4 sm:$0xff]  }
 0x1a4   :  { %5383 = vmatpush2.bf16.msra.mxu1 %v8198_v51  ;;  %5341 = vmatprep.subr.bf16.mxu0 %v8203_v44  ;;  %v8240_v51 = vld [vmem:[%s11851_s1 + $0x308] ss:$16 sps:$4 sm:$0xff]   ;;  %v8245_v44 = vld [vmem:[%s11851_s1 + $0x4ec] ss:$16 sps:$4 sm:$0xff]  }
 0x1a5   :  { %5384 = vmatprep.subr.bf16.mxu1 %v8206_v46  ;;  %v8248_v46 = vld [vmem:[%s11851_s1 + $0x6ec] ss:$16 sps:$4 sm:$0xff]  }
 0x1a7   :  { %5342 = vmatpush2.bf16.msra.mxu0 %v8201_v25  ;;  %v8243_v25 = vld [vmem:[%s11851_s1 + $0x4e8] ss:$16 sps:$4 sm:$0xff]  }
 0x1a8   :  { %5385 = vmatpush2.bf16.msra.mxu1 %v8204_v10  ;;  %5343 = vmatprep.subr.bf16.mxu0 %v8209_v12  ;;  %v8246_v10 = vld [vmem:[%s11851_s1 + $0x6e8] ss:$16 sps:$4 sm:$0xff]   ;;  %v10522_v12 = vpop.f32.mrf.mxu0 }
 0x1a9   :  { %5386 = vmatprep.subr.bf16.mxu1 %v8212_v13  ;;  %v10524_v13 = vpop.f32.mrf.mxu1 }
 0x1ab   :  { %5344 = vmatpush2.bf16.msra.mxu0 %v8207_v53  ;;  %v8251_v53 = vld [vmem:[%s11851_s1 + $0x4cc] ss:$16 sps:$4 sm:$0xff]  }
 0x1ac   :  { %5387 = vmatpush2.bf16.msra.mxu1 %v8210_v55  ;;  %5345 = vmatprep.subr.bf16.mxu0 %v8215_v59  ;;  %v8254_v55 = vld [vmem:[%s11851_s1 + $0x6cc] ss:$16 sps:$4 sm:$0xff]   ;;  %v8249_v59 = vld [vmem:[%s11851_s1 + $0x4c8] ss:$16 sps:$4 sm:$0xff]  }
 0x1ad   :  { %5388 = vmatprep.subr.bf16.mxu1 %v8218_v37  ;;  %v8252_v37 = vld [vmem:[%s11851_s1 + $0x6c8] ss:$16 sps:$4 sm:$0xff]  }
 0x1af   :  { %5346 = vmatpush2.bf16.msra.mxu0 %v8213_v38 }
 0x1b0   :  { %5389 = vmatpush2.bf16.msra.mxu1 %v8216_v42  ;;  %5347 = vmatprep.subr.bf16.mxu0 %v8221_v45 }
 0x1b1   :  { %5390 = vmatprep.subr.bf16.mxu1 %v8224_v36 }
 0x1b3   :  { %5348 = vmatpush2.bf16.msra.mxu0 %v8219_v29 }
 0x1b4   :  { %5391 = vmatpush2.bf16.msra.mxu1 %v8222_v52  ;;  %5349 = vmatprep.subr.bf16.mxu0 %v8227_v54  ;;  %v8257_v52 = vld [vmem:[%s11851_s1 + $0x4ac] ss:$16 sps:$4 sm:$0xff]  }
 0x1b5   :  { %5392 = vmatprep.subr.bf16.mxu1 %v8230_v56 }
 0x1b7   :  { %5350 = vmatpush2.bf16.msra.mxu0 %v8225_v61 }
 0x1b8   :  { %5393 = vmatpush2.bf16.msra.mxu1 %v8228_v7  ;;  %5351 = vmatprep.subr.bf16.mxu0 %v8233_v11  ;;  %v8263_v11 = vld [vmem:[%s11851_s1 + $0x48c] ss:$16 sps:$4 sm:$0xff]  }
 0x1b9   :  { %5394 = vmatprep.subr.bf16.mxu1 %v8236_v17  ;;  %v8266_v17 = vld [vmem:[%s11851_s1 + $0x68c] ss:$16 sps:$4 sm:$0xff]  }
 0x1bb   :  { %5352 = vmatpush2.bf16.msra.mxu0 %v8231_v18 }
 0x1bc   :  { %5395 = vmatpush2.bf16.msra.mxu1 %v8234_v62  ;;  %5353 = vmatprep.subr.bf16.mxu0 %v8239_v0  ;;  %v8272_v62 = vld [vmem:[%s11851_s1 + $0x66c] ss:$16 sps:$4 sm:$0xff]   ;;  %v8267_v0 = vld [vmem:[%s11851_s1 + $0x468] ss:$16 sps:$4 sm:$0xff]  }
 0x1bd   :  { %5396 = vmatprep.subr.bf16.mxu1 %v8242_v3  ;;  %v8270_v3 = vld [vmem:[%s11851_s1 + $0x668] ss:$16 sps:$4 sm:$0xff]  }
 0x1bf   :  { %5354 = vmatpush2.bf16.msra.mxu0 %v8237_v4  ;;  %v8275_v4 = vld [vmem:[%s11851_s1 + $0x44c] ss:$16 sps:$4 sm:$0xff]  }
 0x1c0   :  { %5397 = vmatpush2.bf16.msra.mxu1 %v8240_v51  ;;  %5409 = vmatprep.subr.bf16.mxu0 %v8245_v44  ;;  %v8278_v51 = vld [vmem:[%s11851_s1 + $0x64c] ss:$16 sps:$4 sm:$0xff]   ;;  %v8273_v44 = vld [vmem:[%s11851_s1 + $0x448] ss:$16 sps:$4 sm:$0xff]  }
 0x1c1   :  { %5452 = vmatprep.subr.bf16.mxu1 %v8248_v46  ;;  %v8276_v46 = vld [vmem:[%s11851_s1 + $0x648] ss:$16 sps:$4 sm:$0xff]  }
 0x1c2   :  { %v5099_v38 = vpop.f32.mrf.mxu0  ;;  %5356 = vmatmul.mubr.bf16.vlgmr.msra.gmra.mxu0 %v9112_v8  ;;  %v8260_v8 = vld [vmem:[%s11851_s1 + $0x6ac] ss:$16 sps:$4 sm:$0xff]  }
 0x1c3   :  { %v5142_v42 = vpop.f32.mrf.mxu1  ;;  %5399 = vmatmul.mubr.bf16.vlgmr.msra.gmra.mxu1 %v9114_v9  ;;  %v5100_v45 = vadd.f32 %v5099_v38, %v10341_v6  ;;  %5410 = vmatpush1.bf16.msra.mxu0 %v8243_v25  ;;  %v8255_v9 = vld [vmem:[%s11851_s1 + $0x4a8] ss:$16 sps:$4 sm:$0xff]   ;;  %v8281_v25 = vld [vmem:[%s11851_s1 + $0x42c] ss:$16 sps:$4 sm:$0xff]  }
 0x1c4   :  { %5453 = vmatpush1.bf16.msra.mxu1 %v8246_v10  ;;  %v10541_v36 = vpop.f32.mrf.mxu0  ;;  %5411 = vmatprep.subr.bf16.mxu0 %v8251_v53  ;;  %v8258_v6 = vld [vmem:[%s11851_s1 + $0x6a8] ss:$16 sps:$4 sm:$0xff]   ;;  %v8284_v10 = vld [vmem:[%s11851_s1 + $0x62c] ss:$16 sps:$4 sm:$0xff]  }
 0x1c5   :  { %v10543_v29 = vpop.f32.mrf.mxu1  ;;  %5454 = vmatprep.subr.bf16.mxu1 %v8254_v55  ;;  %v10551_v54 = vadd.f32 %v5142_v42, %v5100_v45  ;;  %5441 = vmatprep.mubr.bf16.mxu0 %v9221_v41  ;;  %v8261_v41 = vld [vmem:[%s11851_s1 + $0x488] ss:$16 sps:$4 sm:$0xff]   ;;  %v8293_v45 = vld [vmem:[%s11851_s1 + $0x5ec] ss:$16 sps:$4 sm:$0xff]  }
 0x1c6   :  { %5484 = vmatprep.mubr.bf16.mxu1 %v9228_v43  ;;  %v5103_v56 = vpop.f32.mrf.mxu0  ;;  %v8264_v43 = vld [vmem:[%s11851_s1 + $0x688] ss:$16 sps:$4 sm:$0xff]  }
 0x1c7   :  { %v5104_v61 = vadd.f32 %v5103_v56, %v10358_v34  ;;  %5412 = vmatpush1.bf16.msra.mxu0 %v8249_v59  ;;  %v5146_v7 = vpop.f32.mrf.mxu1  ;;  %v8269_v34 = vld [vmem:[%s11851_s1 + $0x46c] ss:$16 sps:$4 sm:$0xff]   ;;  %v8279_v53 = vld [vmem:[%s11851_s1 + $0x428] ss:$16 sps:$4 sm:$0xff]  }
 0x1c8   :  { %5455 = vmatpush1.bf16.msra.mxu1 %v8252_v37  ;;  %5413 = vmatprep.subr.bf16.mxu0 %v8257_v52  ;;  %v8282_v55 = vld [vmem:[%s11851_s1 + $0x628] ss:$16 sps:$4 sm:$0xff]   ;;  %v8287_v59 = vld [vmem:[%s11851_s1 + $0x40c] ss:$16 sps:$4 sm:$0xff]  }
 0x1c9   :  { %5456 = vmatprep.subr.bf16.mxu1 %v8260_v8  ;;  %v10568_v18 = vadd.f32 %v5146_v7, %v5104_v61  ;;  %v8290_v37 = vld [vmem:[%s11851_s1 + $0x60c] ss:$16 sps:$4 sm:$0xff]   ;;  %v8285_v38 = vld [vmem:[%s11851_s1 + $0x408] ss:$16 sps:$4 sm:$0xff]  }
 0x1ca   :  { %v8288_v42 = vld [vmem:[%s11851_s1 + $0x608] ss:$16 sps:$4 sm:$0xff]   ;;  %v8296_v52 = vld [vmem:[%s11851_s1 + $0x7ec] ss:$16 sps:$4 sm:$0xff]  }
 0x1cb   :  { %5414 = vmatpush1.bf16.msra.mxu0 %v8255_v9  ;;  %v8291_v8 = vld [vmem:[%s11851_s1 + $0x5e8] ss:$16 sps:$4 sm:$0xff]   ;;  %v8302_v56 = vld [vmem:[%s11851_s1 + $0x7cc] ss:$16 sps:$4 sm:$0xff]  }
 0x1cc   :  { %5457 = vmatpush1.bf16.msra.mxu1 %v8258_v6  ;;  %5415 = vmatprep.subr.bf16.mxu0 %v8263_v11  ;;  %v8294_v9 = vld [vmem:[%s11851_s1 + $0x7e8] ss:$16 sps:$4 sm:$0xff]   ;;  %v8299_v6 = vld [vmem:[%s11851_s1 + $0x5cc] ss:$16 sps:$4 sm:$0xff]  }
 0x1cd   :  { %5458 = vmatprep.subr.bf16.mxu1 %v8266_v17  ;;  %v8297_v61 = vld [vmem:[%s11851_s1 + $0x5c8] ss:$16 sps:$4 sm:$0xff]   ;;  %v8305_v11 = vld [vmem:[%s11851_s1 + $0x5ac] ss:$16 sps:$4 sm:$0xff]  }
 0x1ce   :  { %v8300_v7 = vld [vmem:[%s11851_s1 + $0x7c8] ss:$16 sps:$4 sm:$0xff]   ;;  %v8308_v17 = vld [vmem:[%s11851_s1 + $0x7ac] ss:$16 sps:$4 sm:$0xff]  }
 0x1cf   :  { %5416 = vmatpush1.bf16.msra.mxu0 %v8261_v41  ;;  %v8303_v41 = vld [vmem:[%s11851_s1 + $0x5a8] ss:$16 sps:$4 sm:$0xff]  }
 0x1d0   :  { %5459 = vmatpush1.bf16.msra.mxu1 %v8264_v43  ;;  %5417 = vmatprep.subr.bf16.mxu0 %v8269_v34  ;;  %v8306_v43 = vld [vmem:[%s11851_s1 + $0x7a8] ss:$16 sps:$4 sm:$0xff]   ;;  %v8311_v34 = vld [vmem:[%s11851_s1 + $0x58c] ss:$16 sps:$4 sm:$0xff]  }
 0x1d1   :  { %5460 = vmatprep.subr.bf16.mxu1 %v8272_v62  ;;  %v8314_v62 = vld [vmem:[%s11851_s1 + $0x78c] ss:$16 sps:$4 sm:$0xff]  }
 0x1d3   :  { %5418 = vmatpush1.bf16.msra.mxu0 %v8267_v0  ;;  %v8309_v0 = vld [vmem:[%s11851_s1 + $0x588] ss:$16 sps:$4 sm:$0xff]  }
 0x1d4   :  { %5461 = vmatpush1.bf16.msra.mxu1 %v8270_v3  ;;  %5419 = vmatprep.subr.bf16.mxu0 %v8275_v4  ;;  %v8312_v3 = vld [vmem:[%s11851_s1 + $0x788] ss:$16 sps:$4 sm:$0xff]   ;;  %v8317_v4 = vld [vmem:[%s11851_s1 + $0x56c] ss:$16 sps:$4 sm:$0xff]  }
 0x1d5   :  { %5462 = vmatprep.subr.bf16.mxu1 %v8278_v51  ;;  %v8320_v51 = vld [vmem:[%s11851_s1 + $0x76c] ss:$16 sps:$4 sm:$0xff]  }
 0x1d7   :  { %5420 = vmatpush1.bf16.msra.mxu0 %v8273_v44  ;;  %v8315_v44 = vld [vmem:[%s11851_s1 + $0x568] ss:$16 sps:$4 sm:$0xff]  }
 0x1d8   :  { %5463 = vmatpush1.bf16.msra.mxu1 %v8276_v46  ;;  %5421 = vmatprep.subr.bf16.mxu0 %v8281_v25  ;;  %v8318_v46 = vld [vmem:[%s11851_s1 + $0x768] ss:$16 sps:$4 sm:$0xff]   ;;  %v8323_v25 = vld [vmem:[%s11851_s1 + $0x54c] ss:$16 sps:$4 sm:$0xff]  }
 0x1d9   :  { %5464 = vmatprep.subr.bf16.mxu1 %v8284_v10  ;;  %v8326_v10 = vld [vmem:[%s11851_s1 + $0x74c] ss:$16 sps:$4 sm:$0xff]  }
 0x1db   :  { %5422 = vmatpush1.bf16.msra.mxu0 %v8279_v53  ;;  %v8321_v53 = vld [vmem:[%s11851_s1 + $0x548] ss:$16 sps:$4 sm:$0xff]  }
 0x1dc   :  { %5465 = vmatpush1.bf16.msra.mxu1 %v8282_v55  ;;  %5423 = vmatprep.subr.bf16.mxu0 %v8287_v59  ;;  %v8324_v55 = vld [vmem:[%s11851_s1 + $0x748] ss:$16 sps:$4 sm:$0xff]   ;;  %v8329_v59 = vld [vmem:[%s11851_s1 + $0x52c] ss:$16 sps:$4 sm:$0xff]  }
 0x1dd   :  { %5466 = vmatprep.subr.bf16.mxu1 %v8290_v37  ;;  %v8332_v37 = vld [vmem:[%s11851_s1 + $0x72c] ss:$16 sps:$4 sm:$0xff]  }
 0x1df   :  { %5424 = vmatpush1.bf16.msra.mxu0 %v8285_v38  ;;  %v8327_v38 = vld [vmem:[%s11851_s1 + $0x528] ss:$16 sps:$4 sm:$0xff]  }
 0x1e0   :  { %5467 = vmatpush1.bf16.msra.mxu1 %v8288_v42  ;;  %5425 = vmatprep.subr.bf16.mxu0 %v8293_v45  ;;  %v8330_v42 = vld [vmem:[%s11851_s1 + $0x728] ss:$16 sps:$4 sm:$0xff]   ;;  %v8335_v45 = vld [vmem:[%s11851_s1 + $0x50c] ss:$16 sps:$4 sm:$0xff]  }
 0x1e1   :  { %5468 = vmatprep.subr.bf16.mxu1 %v8296_v52  ;;  %v8338_v52 = vld [vmem:[%s11851_s1 + $0x70c] ss:$16 sps:$4 sm:$0xff]  }
 0x1e3   :  { %5426 = vmatpush2.bf16.msra.mxu0 %v8291_v8  ;;  %v8333_v8 = vld [vmem:[%s11851_s1 + $0x508] ss:$16 sps:$4 sm:$0xff]  }
 0x1e4   :  { %5469 = vmatpush2.bf16.msra.mxu1 %v8294_v9  ;;  %5427 = vmatprep.subr.bf16.mxu0 %v8299_v6  ;;  %v8336_v9 = vld [vmem:[%s11851_s1 + $0x708] ss:$16 sps:$4 sm:$0xff]   ;;  %v8341_v6 = vld [vmem:[%s11851_s1 + $0x8ec] ss:$16 sps:$4 sm:$0xff]  }
 0x1e5   :  { %5470 = vmatprep.subr.bf16.mxu1 %v8302_v56  ;;  %v8344_v56 = vld [vmem:[%s11851_s1 + $0xaec] ss:$16 sps:$4 sm:$0xff]  }
 0x1e7   :  { %5428 = vmatpush2.bf16.msra.mxu0 %v8297_v61  ;;  %v8339_v61 = vld [vmem:[%s11851_s1 + $0x8e8] ss:$16 sps:$4 sm:$0xff]  }
 0x1e8   :  { %5471 = vmatpush2.bf16.msra.mxu1 %v8300_v7  ;;  %5429 = vmatprep.subr.bf16.mxu0 %v8305_v11  ;;  %v8342_v7 = vld [vmem:[%s11851_s1 + $0xae8] ss:$16 sps:$4 sm:$0xff]   ;;  %v10732_v11 = vpop.f32.mrf.mxu0 }
 0x1e9   :  { %5472 = vmatprep.subr.bf16.mxu1 %v8308_v17  ;;  %v10734_v17 = vpop.f32.mrf.mxu1 }
 0x1eb   :  { %5430 = vmatpush2.bf16.msra.mxu0 %v8303_v41  ;;  %v8347_v41 = vld [vmem:[%s11851_s1 + $0x8cc] ss:$16 sps:$4 sm:$0xff]  }
 0x1ec   :  { %5473 = vmatpush2.bf16.msra.mxu1 %v8306_v43  ;;  %5431 = vmatprep.subr.bf16.mxu0 %v8311_v34  ;;  %v8350_v43 = vld [vmem:[%s11851_s1 + $0xacc] ss:$16 sps:$4 sm:$0xff]  }
 0x1ed   :  { %5474 = vmatprep.subr.bf16.mxu1 %v8314_v62 }
 0x1ef   :  { %5432 = vmatpush2.bf16.msra.mxu0 %v8309_v0 }
 0x1f0   :  { %5475 = vmatpush2.bf16.msra.mxu1 %v8312_v3  ;;  %5433 = vmatprep.subr.bf16.mxu0 %v8317_v4  ;;  %v8345_v3 = vld [vmem:[%s11851_s1 + $0x8c8] ss:$16 sps:$4 sm:$0xff]  }
 0x1f1   :  { %5476 = vmatprep.subr.bf16.mxu1 %v8320_v51  ;;  %v8348_v4 = vld [vmem:[%s11851_s1 + $0xac8] ss:$16 sps:$4 sm:$0xff]  }
 0x1f3   :  { %5434 = vmatpush2.bf16.msra.mxu0 %v8315_v44 }
 0x1f4   :  { %5477 = vmatpush2.bf16.msra.mxu1 %v8318_v46  ;;  %5435 = vmatprep.subr.bf16.mxu0 %v8323_v25 }
 0x1f5   :  { %5478 = vmatprep.subr.bf16.mxu1 %v8326_v10  ;;  %v8351_v10 = vld [vmem:[%s11851_s1 + $0x8a8] ss:$16 sps:$4 sm:$0xff]  }
 0x1f7   :  { %5436 = vmatpush2.bf16.msra.mxu0 %v8321_v53  ;;  %v8354_v53 = vld [vmem:[%s11851_s1 + $0xaa8] ss:$16 sps:$4 sm:$0xff]  }
 0x1f8   :  { %5479 = vmatpush2.bf16.msra.mxu1 %v8324_v55  ;;  %5437 = vmatprep.subr.bf16.mxu0 %v8329_v59  ;;  %v8357_v59 = vld [vmem:[%s11851_s1 + $0x888] ss:$16 sps:$4 sm:$0xff]  }
 0x1f9   :  { %5480 = vmatprep.subr.bf16.mxu1 %v8332_v37  ;;  %v8360_v37 = vld [vmem:[%s11851_s1 + $0xa88] ss:$16 sps:$4 sm:$0xff]  }
 0x1fb   :  { %5438 = vmatpush2.bf16.msra.mxu0 %v8327_v38  ;;  %v8365_v38 = vld [vmem:[%s11851_s1 + $0x86c] ss:$16 sps:$4 sm:$0xff]  }
 0x1fc   :  { %5481 = vmatpush2.bf16.msra.mxu1 %v8330_v42  ;;  %5439 = vmatprep.subr.bf16.mxu0 %v8335_v45  ;;  %v8368_v42 = vld [vmem:[%s11851_s1 + $0xa6c] ss:$16 sps:$4 sm:$0xff]   ;;  %v8363_v45 = vld [vmem:[%s11851_s1 + $0x868] ss:$16 sps:$4 sm:$0xff]  }
 0x1fd   :  { %5482 = vmatprep.subr.bf16.mxu1 %v8338_v52  ;;  %v8366_v52 = vld [vmem:[%s11851_s1 + $0xa68] ss:$16 sps:$4 sm:$0xff]  }
 0x1ff   :  { %5440 = vmatpush2.bf16.msra.mxu0 %v8333_v8  ;;  %v8371_v8 = vld [vmem:[%s11851_s1 + $0x84c] ss:$16 sps:$4 sm:$0xff]  }
 0x200   :  { %5483 = vmatpush2.bf16.msra.mxu1 %v8336_v9  ;;  %5495 = vmatprep.subr.bf16.mxu0 %v8341_v6  ;;  %v8374_v9 = vld [vmem:[%s11851_s1 + $0xa4c] ss:$16 sps:$4 sm:$0xff]   ;;  %v8369_v6 = vld [vmem:[%s11851_s1 + $0x848] ss:$16 sps:$4 sm:$0xff]  }
 0x201   :  { %5538 = vmatprep.subr.bf16.mxu1 %v8344_v56  ;;  %v8372_v56 = vld [vmem:[%s11851_s1 + $0xa48] ss:$16 sps:$4 sm:$0xff]  }
 0x202   :  { %v5185_v34 = vpop.f32.mrf.mxu0  ;;  %5442 = vmatmul.mubr.bf16.vlgmr.msra.gmra.mxu0 %v9342_v20  ;;  %v8353_v20 = vld [vmem:[%s11851_s1 + $0x8ac] ss:$16 sps:$4 sm:$0xff]  }
 0x203   :  { %v5228_v62 = vpop.f32.mrf.mxu1  ;;  %5485 = vmatmul.mubr.bf16.vlgmr.msra.gmra.mxu1 %v9346_v21  ;;  %v5186_v0 = vadd.f32 %v5185_v34, %v10551_v54  ;;  %5496 = vmatpush1.bf16.msra.mxu0 %v8339_v61  ;;  %v8356_v21 = vld [vmem:[%s11851_s1 + $0xaac] ss:$16 sps:$4 sm:$0xff]  }
 0x204   :  { %5539 = vmatpush1.bf16.msra.mxu1 %v8342_v7  ;;  %v10751_v51 = vpop.f32.mrf.mxu0  ;;  %5497 = vmatprep.subr.bf16.mxu0 %v8347_v41  ;;  %v8377_v61 = vld [vmem:[%s11851_s1 + $0x82c] ss:$16 sps:$4 sm:$0xff]   ;;  %v8375_v41 = vld [vmem:[%s11851_s1 + $0x828] ss:$16 sps:$4 sm:$0xff]  }
 0x205   :  { %v10753_v44 = vpop.f32.mrf.mxu1  ;;  %5540 = vmatprep.subr.bf16.mxu1 %v8350_v43  ;;  %v10761_v54 = vadd.f32 %v5228_v62, %v5186_v0  ;;  %5527 = vmatprep.mubr.bf16.mxu0 %v9393_v33  ;;  %v8359_v33 = vld [vmem:[%s11851_s1 + $0x88c] ss:$16 sps:$4 sm:$0xff]   ;;  %v8378_v43 = vld [vmem:[%s11851_s1 + $0xa28] ss:$16 sps:$4 sm:$0xff]  }
 0x206   :  { %5570 = vmatprep.mubr.bf16.mxu1 %v9400_v35  ;;  %v5189_v46 = vpop.f32.mrf.mxu0  ;;  %v8362_v35 = vld [vmem:[%s11851_s1 + $0xa8c] ss:$16 sps:$4 sm:$0xff]   ;;  %v8381_v0 = vld [vmem:[%s11851_s1 + $0x808] ss:$16 sps:$4 sm:$0xff]  }
 0x207   :  { %v5190_v25 = vadd.f32 %v5189_v46, %v10568_v18  ;;  %5498 = vmatpush1.bf16.msra.mxu0 %v8345_v3  ;;  %v5232_v55 = vpop.f32.mrf.mxu1  ;;  %v8380_v7 = vld [vmem:[%s11851_s1 + $0xa2c] ss:$16 sps:$4 sm:$0xff]   ;;  %v8384_v3 = vld [vmem:[%s11851_s1 + $0xa08] ss:$16 sps:$4 sm:$0xff]  }
 0x208   :  { %5541 = vmatpush1.bf16.msra.mxu1 %v8348_v4  ;;  %5499 = vmatprep.subr.bf16.mxu0 %v8353_v20  ;;  %v8383_v34 = vld [vmem:[%s11851_s1 + $0x80c] ss:$16 sps:$4 sm:$0xff]   ;;  %v8390_v46 = vld [vmem:[%s11851_s1 + $0xbe8] ss:$16 sps:$4 sm:$0xff]  }
 0x209   :  { %5542 = vmatprep.subr.bf16.mxu1 %v8356_v21  ;;  %v10778_v18 = vadd.f32 %v5232_v55, %v5190_v25  ;;  %v8386_v62 = vld [vmem:[%s11851_s1 + $0xa0c] ss:$16 sps:$4 sm:$0xff]   ;;  %v8387_v21 = vld [vmem:[%s11851_s1 + $0x9e8] ss:$16 sps:$4 sm:$0xff]  }
 0x20a   :  { %v8389_v4 = vld [vmem:[%s11851_s1 + $0x9ec] ss:$16 sps:$4 sm:$0xff]   ;;  %v8396_v55 = vld [vmem:[%s11851_s1 + $0xbc8] ss:$16 sps:$4 sm:$0xff]  }
 0x20b   :  { %5500 = vmatpush1.bf16.msra.mxu0 %v8351_v10  ;;  %v8392_v20 = vld [vmem:[%s11851_s1 + $0xbec] ss:$16 sps:$4 sm:$0xff]  }
 0x20c   :  { %5543 = vmatpush1.bf16.msra.mxu1 %v8354_v53  ;;  %5501 = vmatprep.subr.bf16.mxu0 %v8359_v33  ;;  %v8395_v25 = vld [vmem:[%s11851_s1 + $0x9cc] ss:$16 sps:$4 sm:$0xff]   ;;  %v8393_v53 = vld [vmem:[%s11851_s1 + $0x9c8] ss:$16 sps:$4 sm:$0xff]  }
 0x20d   :  { %5544 = vmatprep.subr.bf16.mxu1 %v8362_v35  ;;  %v8398_v10 = vld [vmem:[%s11851_s1 + $0xbcc] ss:$16 sps:$4 sm:$0xff]  }
 0x20e   :  { %v8401_v33 = vld [vmem:[%s11851_s1 + $0x9ac] ss:$16 sps:$4 sm:$0xff]  }
 0x20f   :  { %5502 = vmatpush1.bf16.msra.mxu0 %v8357_v59  ;;  %v8404_v35 = vld [vmem:[%s11851_s1 + $0xbac] ss:$16 sps:$4 sm:$0xff]   ;;  %v8399_v59 = vld [vmem:[%s11851_s1 + $0x9a8] ss:$16 sps:$4 sm:$0xff]  }
 0x210   :  { %5545 = vmatpush1.bf16.msra.mxu1 %v8360_v37  ;;  %5503 = vmatprep.subr.bf16.mxu0 %v8365_v38  ;;  %v8402_v37 = vld [vmem:[%s11851_s1 + $0xba8] ss:$16 sps:$4 sm:$0xff]   ;;  %v8407_v38 = vld [vmem:[%s11851_s1 + $0x98c] ss:$16 sps:$4 sm:$0xff]  }
 0x211   :  { %5546 = vmatprep.subr.bf16.mxu1 %v8368_v42  ;;  %v8410_v42 = vld [vmem:[%s11851_s1 + $0xb8c] ss:$16 sps:$4 sm:$0xff]  }
 0x213   :  { %5504 = vmatpush1.bf16.msra.mxu0 %v8363_v45  ;;  %v8405_v45 = vld [vmem:[%s11851_s1 + $0x988] ss:$16 sps:$4 sm:$0xff]  }
 0x214   :  { %5547 = vmatpush1.bf16.msra.mxu1 %v8366_v52  ;;  %5505 = vmatprep.subr.bf16.mxu0 %v8371_v8  ;;  %v8408_v52 = vld [vmem:[%s11851_s1 + $0xb88] ss:$16 sps:$4 sm:$0xff]   ;;  %v8413_v8 = vld [vmem:[%s11851_s1 + $0x96c] ss:$16 sps:$4 sm:$0xff]  }
 0x215   :  { %5548 = vmatprep.subr.bf16.mxu1 %v8374_v9  ;;  %v8416_v9 = vld [vmem:[%s11851_s1 + $0xb6c] ss:$16 sps:$4 sm:$0xff]  }
 0x217   :  { %5506 = vmatpush1.bf16.msra.mxu0 %v8369_v6  ;;  %v8411_v6 = vld [vmem:[%s11851_s1 + $0x968] ss:$16 sps:$4 sm:$0xff]  }
 0x218   :  { %5549 = vmatpush1.bf16.msra.mxu1 %v8372_v56  ;;  %5507 = vmatprep.subr.bf16.mxu0 %v8377_v61  ;;  %v8414_v56 = vld [vmem:[%s11851_s1 + $0xb68] ss:$16 sps:$4 sm:$0xff]   ;;  %v8419_v61 = vld [vmem:[%s11851_s1 + $0x94c] ss:$16 sps:$4 sm:$0xff]  }
 0x219   :  { %5550 = vmatprep.subr.bf16.mxu1 %v8380_v7  ;;  %v8422_v7 = vld [vmem:[%s11851_s1 + $0xb4c] ss:$16 sps:$4 sm:$0xff]  }
 0x21b   :  { %5508 = vmatpush1.bf16.msra.mxu0 %v8375_v41  ;;  %v8417_v41 = vld [vmem:[%s11851_s1 + $0x948] ss:$16 sps:$4 sm:$0xff]  }
 0x21c   :  { %5551 = vmatpush1.bf16.msra.mxu1 %v8378_v43  ;;  %5509 = vmatprep.subr.bf16.mxu0 %v8383_v34  ;;  %v8420_v43 = vld [vmem:[%s11851_s1 + $0xb48] ss:$16 sps:$4 sm:$0xff]   ;;  %v8425_v34 = vld [vmem:[%s11851_s1 + $0x92c] ss:$16 sps:$4 sm:$0xff]  }
 0x21d   :  { %5552 = vmatprep.subr.bf16.mxu1 %v8386_v62  ;;  %v8428_v62 = vld [vmem:[%s11851_s1 + $0xb2c] ss:$16 sps:$4 sm:$0xff]  }
 0x21f   :  { %5510 = vmatpush1.bf16.msra.mxu0 %v8381_v0  ;;  %v8423_v0 = vld [vmem:[%s11851_s1 + $0x928] ss:$16 sps:$4 sm:$0xff]  }
 0x220   :  { %5553 = vmatpush1.bf16.msra.mxu1 %v8384_v3  ;;  %5511 = vmatprep.subr.bf16.mxu0 %v8389_v4  ;;  %v8426_v3 = vld [vmem:[%s11851_s1 + $0xb28] ss:$16 sps:$4 sm:$0xff]   ;;  %v8431_v4 = vld [vmem:[%s11851_s1 + $0x90c] ss:$16 sps:$4 sm:$0xff]  }
 0x221   :  { %5554 = vmatprep.subr.bf16.mxu1 %v8392_v20  ;;  %v8434_v20 = vld [vmem:[%s11851_s1 + $0xb0c] ss:$16 sps:$4 sm:$0xff]  }
 0x223   :  { %5512 = vmatpush2.bf16.msra.mxu0 %v8387_v21  ;;  %v8429_v21 = vld [vmem:[%s11851_s1 + $0x908] ss:$16 sps:$4 sm:$0xff]  }
 0x224   :  { %5555 = vmatpush2.bf16.msra.mxu1 %v8390_v46  ;;  %5513 = vmatprep.subr.bf16.mxu0 %v8395_v25  ;;  %v8432_v46 = vld [vmem:[%s11851_s1 + $0xb08] ss:$16 sps:$4 sm:$0xff]   ;;  %v8437_v25 = vld [vmem:[%s11851_s1 + $0xcec] ss:$16 sps:$4 sm:$0xff]  }
 0x225   :  { %5556 = vmatprep.subr.bf16.mxu1 %v8398_v10  ;;  %v8440_v10 = vld [vmem:[%s11851_s1 + $0xeec] ss:$16 sps:$4 sm:$0xff]  }
 0x227   :  { %5514 = vmatpush2.bf16.msra.mxu0 %v8393_v53  ;;  %v8435_v53 = vld [vmem:[%s11851_s1 + $0xce8] ss:$16 sps:$4 sm:$0xff]  }
 0x228   :  { %5557 = vmatpush2.bf16.msra.mxu1 %v8396_v55  ;;  %5515 = vmatprep.subr.bf16.mxu0 %v8401_v33  ;;  %v8438_v55 = vld [vmem:[%s11851_s1 + $0xee8] ss:$16 sps:$4 sm:$0xff]   ;;  %v10942_v33 = vpop.f32.mrf.mxu0 }
 0x229   :  { %5558 = vmatprep.subr.bf16.mxu1 %v8404_v35  ;;  %v10944_v35 = vpop.f32.mrf.mxu1 }
 0x22b   :  { %5516 = vmatpush2.bf16.msra.mxu0 %v8399_v59  ;;  %v8443_v59 = vld [vmem:[%s11851_s1 + $0xccc] ss:$16 sps:$4 sm:$0xff]  }
 0x22c   :  { %5559 = vmatpush2.bf16.msra.mxu1 %v8402_v37  ;;  %5517 = vmatprep.subr.bf16.mxu0 %v8407_v38  ;;  %v8446_v37 = vld [vmem:[%s11851_s1 + $0xecc] ss:$16 sps:$4 sm:$0xff]  }
 0x22d   :  { %5560 = vmatprep.subr.bf16.mxu1 %v8410_v42 }
 0x22f   :  { %5518 = vmatpush2.bf16.msra.mxu0 %v8405_v45 }
 0x230   :  { %5561 = vmatpush2.bf16.msra.mxu1 %v8408_v52  ;;  %5519 = vmatprep.subr.bf16.mxu0 %v8413_v8  ;;  %v8441_v52 = vld [vmem:[%s11851_s1 + $0xcc8] ss:$16 sps:$4 sm:$0xff]  }
 0x231   :  { %5562 = vmatprep.subr.bf16.mxu1 %v8416_v9  ;;  %v8444_v8 = vld [vmem:[%s11851_s1 + $0xec8] ss:$16 sps:$4 sm:$0xff]  }
 0x233   :  { %5520 = vmatpush2.bf16.msra.mxu0 %v8411_v6 }
 0x234   :  { %5563 = vmatpush2.bf16.msra.mxu1 %v8414_v56  ;;  %5521 = vmatprep.subr.bf16.mxu0 %v8419_v61 }
 0x235   :  { %5564 = vmatprep.subr.bf16.mxu1 %v8422_v7  ;;  %v8447_v7 = vld [vmem:[%s11851_s1 + $0xca8] ss:$16 sps:$4 sm:$0xff]  }
 0x237   :  { %5522 = vmatpush2.bf16.msra.mxu0 %v8417_v41  ;;  %v8450_v41 = vld [vmem:[%s11851_s1 + $0xea8] ss:$16 sps:$4 sm:$0xff]  }
 0x238   :  { %5565 = vmatpush2.bf16.msra.mxu1 %v8420_v43  ;;  %5523 = vmatprep.subr.bf16.mxu0 %v8425_v34 }
 0x239   :  { %5566 = vmatprep.subr.bf16.mxu1 %v8428_v62 }
 0x23b   :  { %5524 = vmatpush2.bf16.msra.mxu0 %v8423_v0  ;;  %v8453_v0 = vld [vmem:[%s11851_s1 + $0xc88] ss:$16 sps:$4 sm:$0xff]  }
 0x23c   :  { %5567 = vmatpush2.bf16.msra.mxu1 %v8426_v3  ;;  %5525 = vmatprep.subr.bf16.mxu0 %v8431_v4  ;;  %v8456_v3 = vld [vmem:[%s11851_s1 + $0xe88] ss:$16 sps:$4 sm:$0xff]   ;;  %v8461_v4 = vld [vmem:[%s11851_s1 + $0xc6c] ss:$16 sps:$4 sm:$0xff]  }
 0x23d   :  { %5568 = vmatprep.subr.bf16.mxu1 %v8434_v20  ;;  %v8464_v20 = vld [vmem:[%s11851_s1 + $0xe6c] ss:$16 sps:$4 sm:$0xff]  }
 0x23f   :  { %5526 = vmatpush2.bf16.msra.mxu0 %v8429_v21 }
 0x240   :  { %5569 = vmatpush2.bf16.msra.mxu1 %v8432_v46  ;;  %5581 = vmatprep.subr.bf16.mxu0 %v8437_v25  ;;  %v8459_v46 = vld [vmem:[%s11851_s1 + $0xc68] ss:$16 sps:$4 sm:$0xff]  }
 0x241   :  { %5624 = vmatprep.subr.bf16.mxu1 %v8440_v10  ;;  %v8462_v25 = vld [vmem:[%s11851_s1 + $0xe68] ss:$16 sps:$4 sm:$0xff]   ;;  %v8467_v10 = vld [vmem:[%s11851_s1 + $0xc4c] ss:$16 sps:$4 sm:$0xff]  }
 0x242   :  { %v5271_v38 = vpop.f32.mrf.mxu0  ;;  %5528 = vmatmul.mubr.bf16.vlgmr.msra.gmra.mxu0 %v9592_v48  ;;  %v8449_v48 = vld [vmem:[%s11851_s1 + $0xcac] ss:$16 sps:$4 sm:$0xff]  }
 0x243   :  { %v5314_v42 = vpop.f32.mrf.mxu1  ;;  %5571 = vmatmul.mubr.bf16.vlgmr.msra.gmra.mxu1 %v9596_v49  ;;  %v5272_v45 = vadd.f32 %v5271_v38, %v10761_v54  ;;  %5582 = vmatpush1.bf16.msra.mxu0 %v8435_v53  ;;  %v8452_v49 = vld [vmem:[%s11851_s1 + $0xeac] ss:$16 sps:$4 sm:$0xff]  }
 0x244   :  { %5625 = vmatpush1.bf16.msra.mxu1 %v8438_v55  ;;  %v10961_v9 = vpop.f32.mrf.mxu0  ;;  %5583 = vmatprep.subr.bf16.mxu0 %v8443_v59  ;;  %v8470_v53 = vld [vmem:[%s11851_s1 + $0xe4c] ss:$16 sps:$4 sm:$0xff]   ;;  %v8465_v55 = vld [vmem:[%s11851_s1 + $0xc48] ss:$16 sps:$4 sm:$0xff]  }
 0x245   :  { %v10963_v6 = vpop.f32.mrf.mxu1  ;;  %5626 = vmatprep.subr.bf16.mxu1 %v8446_v37  ;;  %v5315_v54 = vadd.f32 %v5314_v42, %v5272_v45  ;;  %5613 = vmatprep.mubr.bf16.mxu0 %v9614_v30  ;;  %v8455_v30 = vld [vmem:[%s11851_s1 + $0xc8c] ss:$16 sps:$4 sm:$0xff]   ;;  %v8468_v59 = vld [vmem:[%s11851_s1 + $0xe48] ss:$16 sps:$4 sm:$0xff]  }
 0x246   :  { %5656 = vmatprep.mubr.bf16.mxu1 %v9618_v31  ;;  %v5275_v56 = vpop.f32.mrf.mxu0  ;;  %v8458_v31 = vld [vmem:[%s11851_s1 + $0xe8c] ss:$16 sps:$4 sm:$0xff]   ;;  %v8471_v42 = vld [vmem:[%s11851_s1 + $0xc28] ss:$16 sps:$4 sm:$0xff]  }
 0x247   :  { %v5276_v61 = vadd.f32 %v5275_v56, %v10778_v18  ;;  %5584 = vmatpush1.bf16.msra.mxu0 %v8441_v52  ;;  %v5318_v43 = vpop.f32.mrf.mxu1  ;;  %v5839_v34 = vmax.f32 %v5315_v54, 0.0  ;;  %v8473_v37 = vld [vmem:[%s11851_s1 + $0xc2c] ss:$16 sps:$4 sm:$0xff]   ;;  %v8474_v45 = vld [vmem:[%s11851_s1 + $0xe28] ss:$16 sps:$4 sm:$0xff]  }
 0x248   :  { %5627 = vmatpush1.bf16.msra.mxu1 %v8444_v8  ;;  %5585 = vmatprep.subr.bf16.mxu0 %v8449_v48  ;;  %v8476_v38 = vld [vmem:[%s11851_s1 + $0xe2c] ss:$16 sps:$4 sm:$0xff]   ;;  %v8477_v48 = vld [vmem:[%s11851_s1 + $0xc08] ss:$16 sps:$4 sm:$0xff]  }
 0x249   :  { %5628 = vmatprep.subr.bf16.mxu1 %v8452_v49  ;;  %v5319_v18 = vadd.f32 %v5318_v43, %v5276_v61  ;;  %v8479_v52 = vld [vmem:[%s11851_s1 + $0xc0c] ss:$16 sps:$4 sm:$0xff]   ;;  %v8480_v49 = vld [vmem:[%s11851_s1 + $0xe08] ss:$16 sps:$4 sm:$0xff]  }
 0x24a   :  { %v8482_v8 = vld [vmem:[%s11851_s1 + $0xe0c] ss:$16 sps:$4 sm:$0xff]   ;;  %v8483_v61 = vld [vmem:[%s11851_s1 + $0xde8] ss:$16 sps:$4 sm:$0xff]  }
 0x24b   :  { %v5843_v62 = vmax.f32 %v5319_v18, 0.0  ;;  %5586 = vmatpush1.bf16.msra.mxu0 %v8447_v7  ;;  %v8485_v54 = vld [vmem:[%s11851_s1 + $0xdec] ss:$16 sps:$4 sm:$0xff]   ;;  %v8486_v7 = vld [vmem:[%s11851_s1 + $0xfe8] ss:$16 sps:$4 sm:$0xff]  }
 0x24c   :  { %5629 = vmatpush1.bf16.msra.mxu1 %v8450_v41  ;;  %5587 = vmatprep.subr.bf16.mxu0 %v8455_v30  ;;  %v8488_v56 = vld [vmem:[%s11851_s1 + $0xfec] ss:$16 sps:$4 sm:$0xff]   ;;  %v8489_v30 = vld [vmem:[%s11851_s1 + $0xdc8] ss:$16 sps:$4 sm:$0xff]  }
 0x24d   :  { %5630 = vmatprep.subr.bf16.mxu1 %v8458_v31  ;;  %v10998_v21 = vpack.c.bf16 %v5843_v62, %v5839_v34  ;;  %v8491_v41 = vld [vmem:[%s11851_s1 + $0xdcc] ss:$16 sps:$4 sm:$0xff]   ;;  %v8492_v31 = vld [vmem:[%s11851_s1 + $0xfc8] ss:$16 sps:$4 sm:$0xff]  }
 0x24e   :  { %v8494_v43 = vld [vmem:[%s11851_s1 + $0xfcc] ss:$16 sps:$4 sm:$0xff]   ;;  %v8495_v62 = vld [vmem:[%s11851_s1 + $0xda8] ss:$16 sps:$4 sm:$0xff]  }
 0x24f   :  { %5588 = vmatpush1.bf16.msra.mxu0 %v8453_v0  ;;  %v8497_v18 = vld [vmem:[%s11851_s1 + $0xdac] ss:$16 sps:$4 sm:$0xff]   ;;  %v8498_v0 = vld [vmem:[%s11851_s1 + $0xfa8] ss:$16 sps:$4 sm:$0xff]  }
 0x250   :  { %5631 = vmatpush1.bf16.msra.mxu1 %v8456_v3  ;;  %5589 = vmatprep.subr.bf16.mxu0 %v8461_v4  ;;  %v8500_v34 = vld [vmem:[%s11851_s1 + $0xfac] ss:$16 sps:$4 sm:$0xff]  }
 0x251   :  { %5632 = vmatprep.subr.bf16.mxu1 %v8464_v20  ;;  %v8503_v3 = vld [vmem:[%s11851_s1 + $0xd8c] ss:$16 sps:$4 sm:$0xff]   ;;  %v8501_v20 = vld [vmem:[%s11851_s1 + $0xd88] ss:$16 sps:$4 sm:$0xff]  }
 0x252   :  { %v8506_v4 = vld [vmem:[%s11851_s1 + $0xf8c] ss:$16 sps:$4 sm:$0xff]  }
 0x253   :  { %5590 = vmatpush1.bf16.msra.mxu0 %v8459_v46  ;;  %v8504_v46 = vld [vmem:[%s11851_s1 + $0xf88] ss:$16 sps:$4 sm:$0xff]  }
 0x254   :  { %5633 = vmatpush1.bf16.msra.mxu1 %v8462_v25  ;;  %5591 = vmatprep.subr.bf16.mxu0 %v8467_v10  ;;  %v8509_v25 = vld [vmem:[%s11851_s1 + $0xd6c] ss:$16 sps:$4 sm:$0xff]  }
 0x255   :  { %5634 = vmatprep.subr.bf16.mxu1 %v8470_v53  ;;  %v8512_v10 = vld [vmem:[%s11851_s1 + $0xf6c] ss:$16 sps:$4 sm:$0xff]   ;;  %v8507_v53 = vld [vmem:[%s11851_s1 + $0xd68] ss:$16 sps:$4 sm:$0xff]  }
 0x257   :  { %5592 = vmatpush1.bf16.msra.mxu0 %v8465_v55  ;;  %v8510_v55 = vld [vmem:[%s11851_s1 + $0xf68] ss:$16 sps:$4 sm:$0xff]  }
 0x258   :  { %5635 = vmatpush1.bf16.msra.mxu1 %v8468_v59  ;;  %5593 = vmatprep.subr.bf16.mxu0 %v8473_v37  ;;  %v8515_v59 = vld [vmem:[%s11851_s1 + $0xd4c] ss:$16 sps:$4 sm:$0xff]  }
 0x259   :  { %5636 = vmatprep.subr.bf16.mxu1 %v8476_v38  ;;  %v8518_v37 = vld [vmem:[%s11851_s1 + $0xf4c] ss:$16 sps:$4 sm:$0xff]   ;;  %v8513_v38 = vld [vmem:[%s11851_s1 + $0xd48] ss:$16 sps:$4 sm:$0xff]  }
 0x25b   :  { %5594 = vmatpush1.bf16.msra.mxu0 %v8471_v42  ;;  %v8516_v42 = vld [vmem:[%s11851_s1 + $0xf48] ss:$16 sps:$4 sm:$0xff]  }
 0x25c   :  { %5637 = vmatpush1.bf16.msra.mxu1 %v8474_v45  ;;  %5595 = vmatprep.subr.bf16.mxu0 %v8479_v52  ;;  %v8521_v45 = vld [vmem:[%s11851_s1 + $0xd2c] ss:$16 sps:$4 sm:$0xff]  }
 0x25d   :  { %5638 = vmatprep.subr.bf16.mxu1 %v8482_v8  ;;  %v8524_v52 = vld [vmem:[%s11851_s1 + $0xf2c] ss:$16 sps:$4 sm:$0xff]   ;;  %v8519_v8 = vld [vmem:[%s11851_s1 + $0xd28] ss:$16 sps:$4 sm:$0xff]  }
 0x25f   :  { %5596 = vmatpush1.bf16.msra.mxu0 %v8477_v48  ;;  %v8522_v48 = vld [vmem:[%s11851_s1 + $0xf28] ss:$16 sps:$4 sm:$0xff]  }
 0x260   :  { %5639 = vmatpush1.bf16.msra.mxu1 %v8480_v49  ;;  %5597 = vmatprep.subr.bf16.mxu0 %v8485_v54  ;;  %v8527_v49 = vld [vmem:[%s11851_s1 + $0xd0c] ss:$16 sps:$4 sm:$0xff]  }
 0x261   :  { %5640 = vmatprep.subr.bf16.mxu1 %v8488_v56  ;;  %v8530_v54 = vld [vmem:[%s11851_s1 + $0xf0c] ss:$16 sps:$4 sm:$0xff]   ;;  %v8525_v56 = vld [vmem:[%s11851_s1 + $0xd08] ss:$16 sps:$4 sm:$0xff]  }
 0x263   :  { %5598 = vmatpush2.bf16.msra.mxu0 %v8483_v61  ;;  %v8528_v61 = vld [vmem:[%s11851_s1 + $0xf08] ss:$16 sps:$4 sm:$0xff]  }
 0x264   :  { %5641 = vmatpush2.bf16.msra.mxu1 %v8486_v7  ;;  %5599 = vmatprep.subr.bf16.mxu0 %v8491_v41  ;;  %v8533_v7 = vld [vmem:[%s11851_s1 + $0x10ec] ss:$16 sps:$4 sm:$0xff]  }
 0x265   :  { %5642 = vmatprep.subr.bf16.mxu1 %v8494_v43  ;;  %v8536_v41 = vld [vmem:[%s11851_s1 + $0x12ec] ss:$16 sps:$4 sm:$0xff]   ;;  %v8531_v43 = vld [vmem:[%s11851_s1 + $0x10e8] ss:$16 sps:$4 sm:$0xff]  }
 0x267   :  { %5600 = vmatpush2.bf16.msra.mxu0 %v8489_v30  ;;  %v8534_v30 = vld [vmem:[%s11851_s1 + $0x12e8] ss:$16 sps:$4 sm:$0xff]  }
 0x268   :  { %5643 = vmatpush2.bf16.msra.mxu1 %v8492_v31  ;;  %5601 = vmatprep.subr.bf16.mxu0 %v8497_v18  ;;  %v8539_v31 = vld [vmem:[%s11851_s1 + $0x10cc] ss:$16 sps:$4 sm:$0xff]  }
 0x269   :  { %5644 = vmatprep.subr.bf16.mxu1 %v8500_v34  ;;  %v8542_v18 = vld [vmem:[%s11851_s1 + $0x12cc] ss:$16 sps:$4 sm:$0xff]   ;;  %v8537_v34 = vld [vmem:[%s11851_s1 + $0x10c8] ss:$16 sps:$4 sm:$0xff]  }
 0x26b   :  { %5602 = vmatpush2.bf16.msra.mxu0 %v8495_v62  ;;  %v8540_v62 = vld [vmem:[%s11851_s1 + $0x12c8] ss:$16 sps:$4 sm:$0xff]  }
 0x26c   :  { %5645 = vmatpush2.bf16.msra.mxu1 %v8498_v0  ;;  %5603 = vmatprep.subr.bf16.mxu0 %v8503_v3  ;;  %v8545_v0 = vld [vmem:[%s11851_s1 + $0x10ac] ss:$16 sps:$4 sm:$0xff]  }
 0x26d   :  { %5646 = vmatprep.subr.bf16.mxu1 %v8506_v4  ;;  %v8548_v3 = vld [vmem:[%s11851_s1 + $0x12ac] ss:$16 sps:$4 sm:$0xff]   ;;  %v8543_v4 = vld [vmem:[%s11851_s1 + $0x10a8] ss:$16 sps:$4 sm:$0xff]  }
 0x26f   :  { %5604 = vmatpush2.bf16.msra.mxu0 %v8501_v20  ;;  %v8554_v20 = vld [vmem:[%s11851_s1 + $0x128c] ss:$16 sps:$4 sm:$0xff]  }
 0x270   :  { %5647 = vmatpush2.bf16.msra.mxu1 %v8504_v46  ;;  %5605 = vmatprep.subr.bf16.mxu0 %v8509_v25  ;;  %v8549_v46 = vld [vmem:[%s11851_s1 + $0x1088] ss:$16 sps:$4 sm:$0xff]   ;;  %v8560_v25 = vld [vmem:[%s11851_s1 + $0x126c] ss:$16 sps:$4 sm:$0xff]  }
 0x271   :  { %5648 = vmatprep.subr.bf16.mxu1 %v8512_v10  ;;  %v8555_v10 = vld [vmem:[%s11851_s1 + $0x1068] ss:$16 sps:$4 sm:$0xff]  }
 0x273   :  { %5606 = vmatpush2.bf16.msra.mxu0 %v8507_v53  ;;  %v8558_v53 = vld [vmem:[%s11851_s1 + $0x1268] ss:$16 sps:$4 sm:$0xff]  }
 0x274   :  { %5649 = vmatpush2.bf16.msra.mxu1 %v8510_v55  ;;  %5607 = vmatprep.subr.bf16.mxu0 %v8515_v59  ;;  %v8563_v55 = vld [vmem:[%s11851_s1 + $0x104c] ss:$16 sps:$4 sm:$0xff]  }
 0x275   :  { %5650 = vmatprep.subr.bf16.mxu1 %v8518_v37  ;;  %v8566_v59 = vld [vmem:[%s11851_s1 + $0x124c] ss:$16 sps:$4 sm:$0xff]   ;;  %v8561_v37 = vld [vmem:[%s11851_s1 + $0x1048] ss:$16 sps:$4 sm:$0xff]  }
 0x277   :  { %5608 = vmatpush2.bf16.msra.mxu0 %v8513_v38  ;;  %v8564_v38 = vld [vmem:[%s11851_s1 + $0x1248] ss:$16 sps:$4 sm:$0xff]  }
 0x278   :  { %5651 = vmatpush2.bf16.msra.mxu1 %v8516_v42  ;;  %5609 = vmatprep.subr.bf16.mxu0 %v8521_v45  ;;  %v8569_v42 = vld [vmem:[%s11851_s1 + $0x102c] ss:$16 sps:$4 sm:$0xff]  }
 0x279   :  { %5652 = vmatprep.subr.bf16.mxu1 %v8524_v52  ;;  %v8572_v45 = vld [vmem:[%s11851_s1 + $0x122c] ss:$16 sps:$4 sm:$0xff]   ;;  %v8567_v52 = vld [vmem:[%s11851_s1 + $0x1028] ss:$16 sps:$4 sm:$0xff]  }
 0x27b   :  { %5610 = vmatpush2.bf16.msra.mxu0 %v8519_v8  ;;  %v8570_v8 = vld [vmem:[%s11851_s1 + $0x1228] ss:$16 sps:$4 sm:$0xff]  }
 0x27c   :  { %5653 = vmatpush2.bf16.msra.mxu1 %v8522_v48  ;;  %5611 = vmatprep.subr.bf16.mxu0 %v8527_v49  ;;  %v8575_v48 = vld [vmem:[%s11851_s1 + $0x100c] ss:$16 sps:$4 sm:$0xff]  }
 0x27d   :  { %5654 = vmatprep.subr.bf16.mxu1 %v8530_v54  ;;  %v8578_v49 = vld [vmem:[%s11851_s1 + $0x120c] ss:$16 sps:$4 sm:$0xff]   ;;  %v8573_v54 = vld [vmem:[%s11851_s1 + $0x1008] ss:$16 sps:$4 sm:$0xff]  }
 0x27f   :  { %5612 = vmatpush2.bf16.msra.mxu0 %v8525_v56  ;;  %v8576_v56 = vld [vmem:[%s11851_s1 + $0x1208] ss:$16 sps:$4 sm:$0xff]  }
 0x280   :  { %5655 = vmatpush2.bf16.msra.mxu1 %v8528_v61  ;;  %5667 = vmatprep.subr.bf16.mxu0 %v8533_v7  ;;  %v8581_v61 = vld [vmem:[%s11851_s1 + $0x11ec] ss:$16 sps:$4 sm:$0xff]  }
 0x281   :  { %5710 = vmatprep.subr.bf16.mxu1 %v8536_v41  ;;  %v8584_v7 = vld [vmem:[%s11851_s1 + $0x13ec] ss:$16 sps:$4 sm:$0xff]   ;;  %v8579_v41 = vld [vmem:[%s11851_s1 + $0x11e8] ss:$16 sps:$4 sm:$0xff]  }
 0x282   :  { %5614 = vmatmul.mubr.bf16.vlgmr.msra.gmra.mxu0 %v9830_v14  ;;  %v8546_v14 = vld [vmem:[%s11851_s1 + $0x12a8] ss:$16 sps:$4 sm:$0xff]  }
 0x283   :  { %5657 = vmatmul.mubr.bf16.vlgmr.msra.gmra.mxu1 %v9834_v15  ;;  %5668 = vmatpush1.bf16.msra.mxu0 %v8531_v43  ;;  %v8551_v15 = vld [vmem:[%s11851_s1 + $0x108c] ss:$16 sps:$4 sm:$0xff]   ;;  %v8582_v43 = vld [vmem:[%s11851_s1 + $0x13e8] ss:$16 sps:$4 sm:$0xff]  }
 0x284   :  { %5711 = vmatpush1.bf16.msra.mxu1 %v8534_v30  ;;  %5669 = vmatprep.subr.bf16.mxu0 %v8539_v31  ;;  %v8587_v30 = vld [vmem:[%s11851_s1 + $0x11cc] ss:$16 sps:$4 sm:$0xff]  }
 0x285   :  { %5712 = vmatprep.subr.bf16.mxu1 %v8542_v18  ;;  %5699 = vmatprep.mubr.bf16.mxu0 %v9854_v47  ;;  %v8552_v47 = vld [vmem:[%s11851_s1 + $0x1288] ss:$16 sps:$4 sm:$0xff]   ;;  %v8590_v31 = vld [vmem:[%s11851_s1 + $0x13cc] ss:$16 sps:$4 sm:$0xff]  }
 0x286   :  { %5742 = vmatprep.mubr.bf16.mxu1 %v9858_v50  ;;  %v8557_v50 = vld [vmem:[%s11851_s1 + $0x106c] ss:$16 sps:$4 sm:$0xff]   ;;  %v8585_v18 = vld [vmem:[%s11851_s1 + $0x11c8] ss:$16 sps:$4 sm:$0xff]  }
 0x287   :  { %5670 = vmatpush1.bf16.msra.mxu0 %v8537_v34  ;;  %v8588_v34 = vld [vmem:[%s11851_s1 + $0x13c8] ss:$16 sps:$4 sm:$0xff]  }
 0x288   :  { %5713 = vmatpush1.bf16.msra.mxu1 %v8540_v62  ;;  %5671 = vmatprep.subr.bf16.mxu0 %v8545_v0  ;;  %v8593_v62 = vld [vmem:[%s11851_s1 + $0x11ac] ss:$16 sps:$4 sm:$0xff]  }
 0x289   :  { %5714 = vmatprep.subr.bf16.mxu1 %v8548_v3  ;;  %v8596_v0 = vld [vmem:[%s11851_s1 + $0x13ac] ss:$16 sps:$4 sm:$0xff]   ;;  %v8591_v3 = vld [vmem:[%s11851_s1 + $0x11a8] ss:$16 sps:$4 sm:$0xff]  }
 0x28b   :  { %5672 = vmatpush1.bf16.msra.mxu0 %v8543_v4  ;;  %v8594_v4 = vld [vmem:[%s11851_s1 + $0x13a8] ss:$16 sps:$4 sm:$0xff]  }
 0x28c   :  { %5715 = vmatpush1.bf16.msra.mxu1 %v8546_v14  ;;  %5673 = vmatprep.subr.bf16.mxu0 %v8551_v15  ;;  %v8599_v14 = vld [vmem:[%s11851_s1 + $0x118c] ss:$16 sps:$4 sm:$0xff]  }
 0x28d   :  { %5716 = vmatprep.subr.bf16.mxu1 %v8554_v20  ;;  %v8602_v15 = vld [vmem:[%s11851_s1 + $0x138c] ss:$16 sps:$4 sm:$0xff]   ;;  %v8597_v20 = vld [vmem:[%s11851_s1 + $0x1188] ss:$16 sps:$4 sm:$0xff]  }
 0x28f   :  { %5674 = vmatpush1.bf16.msra.mxu0 %v8549_v46  ;;  %v8600_v46 = vld [vmem:[%s11851_s1 + $0x1388] ss:$16 sps:$4 sm:$0xff]  }
 0x290   :  { %5717 = vmatpush1.bf16.msra.mxu1 %v8552_v47  ;;  %5675 = vmatprep.subr.bf16.mxu0 %v8557_v50  ;;  %v8605_v47 = vld [vmem:[%s11851_s1 + $0x116c] ss:$16 sps:$4 sm:$0xff]  }
 0x291   :  { %5718 = vmatprep.subr.bf16.mxu1 %v8560_v25  ;;  %v8608_v50 = vld [vmem:[%s11851_s1 + $0x136c] ss:$16 sps:$4 sm:$0xff]   ;;  %v8603_v25 = vld [vmem:[%s11851_s1 + $0x1168] ss:$16 sps:$4 sm:$0xff]  }
 0x293   :  { %5676 = vmatpush1.bf16.msra.mxu0 %v8555_v10  ;;  %v8606_v10 = vld [vmem:[%s11851_s1 + $0x1368] ss:$16 sps:$4 sm:$0xff]  }
 0x294   :  { %5719 = vmatpush1.bf16.msra.mxu1 %v8558_v53  ;;  %5677 = vmatprep.subr.bf16.mxu0 %v8563_v55  ;;  %v8611_v53 = vld [vmem:[%s11851_s1 + $0x114c] ss:$16 sps:$4 sm:$0xff]  }
 0x295   :  { %5720 = vmatprep.subr.bf16.mxu1 %v8566_v59  ;;  %v8614_v55 = vld [vmem:[%s11851_s1 + $0x134c] ss:$16 sps:$4 sm:$0xff]   ;;  %v8609_v59 = vld [vmem:[%s11851_s1 + $0x1148] ss:$16 sps:$4 sm:$0xff]  }
 0x297   :  { %5678 = vmatpush1.bf16.msra.mxu0 %v8561_v37  ;;  %v8612_v37 = vld [vmem:[%s11851_s1 + $0x1348] ss:$16 sps:$4 sm:$0xff]  }
 0x298   :  { %5721 = vmatpush1.bf16.msra.mxu1 %v8564_v38  ;;  %5679 = vmatprep.subr.bf16.mxu0 %v8569_v42  ;;  %v8617_v38 = vld [vmem:[%s11851_s1 + $0x112c] ss:$16 sps:$4 sm:$0xff]  }
 0x299   :  { %5722 = vmatprep.subr.bf16.mxu1 %v8572_v45  ;;  %v8620_v42 = vld [vmem:[%s11851_s1 + $0x132c] ss:$16 sps:$4 sm:$0xff]   ;;  %v8615_v45 = vld [vmem:[%s11851_s1 + $0x1128] ss:$16 sps:$4 sm:$0xff]  }
 0x29b   :  { %5680 = vmatpush1.bf16.msra.mxu0 %v8567_v52  ;;  %v8618_v52 = vld [vmem:[%s11851_s1 + $0x1328] ss:$16 sps:$4 sm:$0xff]  }
 0x29c   :  { %5723 = vmatpush1.bf16.msra.mxu1 %v8570_v8  ;;  %5681 = vmatprep.subr.bf16.mxu0 %v8575_v48  ;;  %v8623_v8 = vld [vmem:[%s11851_s1 + $0x110c] ss:$16 sps:$4 sm:$0xff]  }
 0x29d   :  { %5724 = vmatprep.subr.bf16.mxu1 %v8578_v49  ;;  %v8626_v48 = vld [vmem:[%s11851_s1 + $0x130c] ss:$16 sps:$4 sm:$0xff]   ;;  %v8621_v49 = vld [vmem:[%s11851_s1 + $0x1108] ss:$16 sps:$4 sm:$0xff]  }
 0x29f   :  { %5682 = vmatpush1.bf16.msra.mxu0 %v8573_v54  ;;  %v8624_v54 = vld [vmem:[%s11851_s1 + $0x1308] ss:$16 sps:$4 sm:$0xff]  }
 0x2a0   :  { %5725 = vmatpush1.bf16.msra.mxu1 %v8576_v56  ;;  %5683 = vmatprep.subr.bf16.mxu0 %v8581_v61  ;;  %v8629_v56 = vld [vmem:[%s11851_s1 + $0x14ec] ss:$16 sps:$4 sm:$0xff]  }
 0x2a1   :  { %5726 = vmatprep.subr.bf16.mxu1 %v8584_v7  ;;  %v8632_v61 = vld [vmem:[%s11851_s1 + $0x16ec] ss:$16 sps:$4 sm:$0xff]   ;;  %v8627_v7 = vld [vmem:[%s11851_s1 + $0x14e8] ss:$16 sps:$4 sm:$0xff]  }
 0x2a3   :  { %5684 = vmatpush2.bf16.msra.mxu0 %v8579_v41  ;;  %v8630_v41 = vld [vmem:[%s11851_s1 + $0x16e8] ss:$16 sps:$4 sm:$0xff]  }
 0x2a4   :  { %5727 = vmatpush2.bf16.msra.mxu1 %v8582_v43  ;;  %5685 = vmatprep.subr.bf16.mxu0 %v8587_v30  ;;  %v8635_v43 = vld [vmem:[%s11851_s1 + $0x14cc] ss:$16 sps:$4 sm:$0xff]  }
 0x2a5   :  { %5728 = vmatprep.subr.bf16.mxu1 %v8590_v31  ;;  %v8638_v30 = vld [vmem:[%s11851_s1 + $0x16cc] ss:$16 sps:$4 sm:$0xff]   ;;  %v8633_v31 = vld [vmem:[%s11851_s1 + $0x14c8] ss:$16 sps:$4 sm:$0xff]  }
 0x2a7   :  { %5686 = vmatpush2.bf16.msra.mxu0 %v8585_v18  ;;  %v8636_v18 = vld [vmem:[%s11851_s1 + $0x16c8] ss:$16 sps:$4 sm:$0xff]  }
 0x2a8   :  { %5729 = vmatpush2.bf16.msra.mxu1 %v8588_v34  ;;  %5687 = vmatprep.subr.bf16.mxu0 %v8593_v62  ;;  %v8641_v34 = vld [vmem:[%s11851_s1 + $0x14ac] ss:$16 sps:$4 sm:$0xff]   ;;  %v8642_v62 = vld [vmem:[%s11851_s1 + $0x16a8] ss:$16 sps:$4 sm:$0xff]  }
 0x2a9   :  { %5730 = vmatprep.subr.bf16.mxu1 %v8596_v0  ;;  %v8647_v0 = vld [vmem:[%s11851_s1 + $0x148c] ss:$16 sps:$4 sm:$0xff]  }
 0x2ab   :  { %5688 = vmatpush2.bf16.msra.mxu0 %v8591_v3  ;;  %v8648_v3 = vld [vmem:[%s11851_s1 + $0x1688] ss:$16 sps:$4 sm:$0xff]  }
 0x2ac   :  { %5731 = vmatpush2.bf16.msra.mxu1 %v8594_v4  ;;  %5689 = vmatprep.subr.bf16.mxu0 %v8599_v14  ;;  %v8653_v4 = vld [vmem:[%s11851_s1 + $0x146c] ss:$16 sps:$4 sm:$0xff]  }
 0x2ad   :  { %5732 = vmatprep.subr.bf16.mxu1 %v8602_v15  ;;  %v8656_v14 = vld [vmem:[%s11851_s1 + $0x166c] ss:$16 sps:$4 sm:$0xff]   ;;  %v8651_v15 = vld [vmem:[%s11851_s1 + $0x1468] ss:$16 sps:$4 sm:$0xff]  }
 0x2af   :  { %5690 = vmatpush2.bf16.msra.mxu0 %v8597_v20  ;;  %v8654_v20 = vld [vmem:[%s11851_s1 + $0x1668] ss:$16 sps:$4 sm:$0xff]  }
 0x2b0   :  { %5733 = vmatpush2.bf16.msra.mxu1 %v8600_v46  ;;  %5691 = vmatprep.subr.bf16.mxu0 %v8605_v47  ;;  %v8659_v46 = vld [vmem:[%s11851_s1 + $0x144c] ss:$16 sps:$4 sm:$0xff]  }
 0x2b1   :  { %5734 = vmatprep.subr.bf16.mxu1 %v8608_v50  ;;  %v8662_v47 = vld [vmem:[%s11851_s1 + $0x164c] ss:$16 sps:$4 sm:$0xff]   ;;  %v833_v50 = vsub.s32 1, %v9786_v63 }
 0x2b3   :  { %5692 = vmatpush2.bf16.msra.mxu0 %v8603_v25  ;;  %v8657_v25 = vld [vmem:[%s11851_s1 + $0x1448] ss:$16 sps:$4 sm:$0xff]  }
 0x2b4   :  { %5735 = vmatpush2.bf16.msra.mxu1 %v8606_v10  ;;  %5693 = vmatprep.subr.bf16.mxu0 %v8611_v53  ;;  %v8660_v10 = vld [vmem:[%s11851_s1 + $0x1648] ss:$16 sps:$4 sm:$0xff]   ;;  %v8665_v53 = vld [vmem:[%s11851_s1 + $0x142c] ss:$16 sps:$4 sm:$0xff]  }
 0x2b5   :  { %5736 = vmatprep.subr.bf16.mxu1 %v8614_v55  ;;  %v8668_v55 = vld [vmem:[%s11851_s1 + $0x162c] ss:$16 sps:$4 sm:$0xff]  }
 0x2b7   :  { %5694 = vmatpush2.bf16.msra.mxu0 %v8609_v59  ;;  %v11420_v59 = vld [vmem:[%s11853_s2] sm:$0xf] }
 0x2b8   :  { %5737 = vmatpush2.bf16.msra.mxu1 %v8612_v37  ;;  %5695 = vmatprep.subr.bf16.mxu0 %v8617_v38  ;;  %v834_v37 = vrot.slane %v11420_v59, %v833_v50 }
 0x2b9   :  { %5738 = vmatprep.subr.bf16.mxu1 %v8620_v42  ;;  %v8663_v42 = vld [vmem:[%s11851_s1 + $0x1428] ss:$16 sps:$4 sm:$0xff]  }
 0x2ba   :  { %v4848_v38 = vadd.f32 %v10086_v23, %v834_v37  ;;  %v8674_v23 = vld [vmem:[%s11851_s1 + $0x160c] ss:$16 sps:$4 sm:$0xff]  }
 0x2bb   :  { %5696 = vmatpush2.bf16.msra.mxu0 %v8615_v45  ;;  %v8666_v45 = vld [vmem:[%s11851_s1 + $0x1628] ss:$16 sps:$4 sm:$0xff]  }
 0x2bc   :  { %5739 = vmatpush2.bf16.msra.mxu1 %v8618_v52  ;;  %5697 = vmatprep.subr.bf16.mxu0 %v8623_v8  ;;  %v8671_v52 = vld [vmem:[%s11851_s1 + $0x140c] ss:$16 sps:$4 sm:$0xff]   ;;  %v4844_v8 = vadd.f32 %v9868_v26, %v834_v37 }
 0x2bd   :  { %5740 = vmatprep.subr.bf16.mxu1 %v8626_v48  ;;  %v4891_v48 = vadd.f32 %v10088_v24, %v4848_v38  ;;  %v8680_v26 = vld [vmem:[%s11851_s1 + $0x17ec] ss:$16 sps:$4 sm:$0xff]  }
 0x2be   :  { %v4887_v24 = vadd.f32 %v9870_v27, %v4844_v8  ;;  %v8683_v27 = vld [vmem:[%s11851_s1 + $0x15cc] ss:$16 sps:$4 sm:$0xff]  }
 0x2bf   :  { %5698 = vmatpush2.bf16.msra.mxu0 %v8621_v49  ;;  %v8669_v49 = vld [vmem:[%s11851_s1 + $0x1408] ss:$16 sps:$4 sm:$0xff]  }
 0x2c0   :  { %5741 = vmatpush2.bf16.msra.mxu1 %v8624_v54  ;;  %5753 = vmatprep.subr.bf16.mxu0 %v8629_v56  ;;  %v8672_v54 = vld [vmem:[%s11851_s1 + $0x1608] ss:$16 sps:$4 sm:$0xff]   ;;  %v8677_v56 = vld [vmem:[%s11851_s1 + $0x15ec] ss:$16 sps:$4 sm:$0xff]  }
 0x2c1   :  { %5796 = vmatprep.subr.bf16.mxu1 %v8632_v61  ;;  %v4934_v61 = vadd.f32 %v10312_v28, %v4891_v48  ;;  %v8717_v48 = vld [vmem:[%s11851_s1 + $0x1508] ss:$16 sps:$4 sm:$0xff]  }
 0x2c2   :  { %5700 = vmatmul.mubr.bf16.vlgmr.msra.gmra.mxu0 %v10080_v19  ;;  %v8644_v19 = vld [vmem:[%s11851_s1 + $0x16ac] ss:$16 sps:$4 sm:$0xff]  }
 0x2c3   :  { %5743 = vmatmul.mubr.bf16.vlgmr.msra.gmra.mxu1 %v10084_v22  ;;  %5754 = vmatpush1.bf16.msra.mxu0 %v8627_v7  ;;  %v8639_v22 = vld [vmem:[%s11851_s1 + $0x14a8] ss:$16 sps:$4 sm:$0xff]   ;;  %v4930_v7 = vadd.f32 %v10113_v39, %v4887_v24  ;;  %v8686_v39 = vld [vmem:[%s11851_s1 + $0x17cc] ss:$16 sps:$4 sm:$0xff]   ;;  %v4977_v28 = vadd.f32 %v10314_v60, %v4934_v61 }
 0x2c4   :  { %5797 = vmatpush1.bf16.msra.mxu1 %v8630_v41  ;;  %5755 = vmatprep.subr.bf16.mxu0 %v8635_v43  ;;  %v8675_v41 = vld [vmem:[%s11851_s1 + $0x15e8] ss:$16 sps:$4 sm:$0xff]   ;;  %v8689_v60 = vld [vmem:[%s11851_s1 + $0x15ac] ss:$16 sps:$4 sm:$0xff]  }
 0x2c5   :  { %5798 = vmatprep.subr.bf16.mxu1 %v8638_v30  ;;  %5785 = vmatprep.mubr.bf16.mxu0 %v10104_v16  ;;  %v8650_v16 = vld [vmem:[%s11851_s1 + $0x168c] ss:$16 sps:$4 sm:$0xff]   ;;  %v8678_v43 = vld [vmem:[%s11851_s1 + $0x17e8] ss:$16 sps:$4 sm:$0xff]   ;;  %v4973_v30 = vadd.f32 %v10115_v40, %v4930_v7 }
 0x2c6   :  { %5828 = vmatprep.mubr.bf16.mxu1 %v10108_v32  ;;  %v8645_v32 = vld [vmem:[%s11851_s1 + $0x1488] ss:$16 sps:$4 sm:$0xff]   ;;  %v8692_v40 = vld [vmem:[%s11851_s1 + $0x17ac] ss:$16 sps:$4 sm:$0xff]  }
 0x2c7   :  { %5756 = vmatpush1.bf16.msra.mxu0 %v8633_v31  ;;  %v5020_v31 = vadd.f32 %v10522_v12, %v4977_v28  ;;  %v5016_v12 = vadd.f32 %v10331_v1, %v4973_v30  ;;  %v8698_v1 = vld [vmem:[%s11851_s1 + $0x178c] ss:$16 sps:$4 sm:$0xff]   ;;  %v8726_v7 = vld [vmem:[%s11854_s3 + $0x60] ss:$8 sps:$4 sm:$0xff]  }
 0x2c8   :  { %5799 = vmatpush1.bf16.msra.mxu1 %v8636_v18  ;;  %5757 = vmatprep.subr.bf16.mxu0 %v8641_v34  ;;  %v8681_v18 = vld [vmem:[%s11851_s1 + $0x15c8] ss:$16 sps:$4 sm:$0xff]   ;;  %v8728_v24 = vld [vmem:[%s11854_s3 + $0x64] ss:$8 sps:$4 sm:$0xff]   ;;  %v8737_v28 = vld [vmem:[%s11854_s3 + $0x34] ss:$8 sps:$4 sm:$0xff]  }
 0x2c9   :  { %5800 = vmatprep.subr.bf16.mxu1 %v8644_v19  ;;  %v8684_v34 = vld [vmem:[%s11851_s1 + $0x17c8] ss:$16 sps:$4 sm:$0xff]   ;;  %v5063_v19 = vadd.f32 %v10524_v13, %v5020_v31  ;;  %v5059_v13 = vadd.f32 %v10333_v2, %v5016_v12  ;;  %v8701_v2 = vld [vmem:[%s11851_s1 + $0x156c] ss:$16 sps:$4 sm:$0xff]  }
 0x2ca   :  { %v8776_v30 = vld [vmem:[%s11854_s3 + $0x164] ss:$8 sps:$4 sm:$0xff]   ;;  %v8774_v31 = vld [vmem:[%s11854_s3 + $0x160] ss:$8 sps:$4 sm:$0xff]  }
 0x2cb   :  { %5758 = vmatpush1.bf16.msra.mxu0 %v8639_v22  ;;  %v8687_v22 = vld [vmem:[%s11851_s1 + $0x15a8] ss:$16 sps:$4 sm:$0xff]  }
 0x2cc   :  { %5801 = vmatpush1.bf16.msra.mxu1 %v8642_v62  ;;  %5759 = vmatprep.subr.bf16.mxu0 %v8647_v0  ;;  %v8690_v62 = vld [vmem:[%s11851_s1 + $0x17a8] ss:$16 sps:$4 sm:$0xff]   ;;  %v8695_v0 = vld [vmem:[%s11851_s1 + $0x158c] ss:$16 sps:$4 sm:$0xff]  }
 0x2cd   :  { %5802 = vmatprep.subr.bf16.mxu1 %v8650_v16  ;;  %v5106_v16 = vadd.f32 %v10732_v11, %v5063_v19  ;;  %v8738_v12 = vld [vmem:[%s11854_s3 + $0x20] ss:$8 sps:$4 sm:$0xff]   ;;  %v8782_v19 = vld [vmem:[%s11854_s3 + $0x144] ss:$8 sps:$4 sm:$0xff]  }
 0x2cf   :  { %5760 = vmatpush1.bf16.msra.mxu0 %v8645_v32  ;;  %v5102_v32 = vadd.f32 %v10541_v36, %v5059_v13  ;;  %v8704_v36 = vld [vmem:[%s11851_s1 + $0x176c] ss:$16 sps:$4 sm:$0xff]   ;;  %v5149_v11 = vadd.f32 %v10734_v17, %v5106_v16  ;;  %v8783_v16 = vld [vmem:[%s11854_s3 + $0x130] ss:$8 sps:$4 sm:$0xff]  }
 0x2d0   :  { %5803 = vmatpush1.bf16.msra.mxu1 %v8648_v3  ;;  %5761 = vmatprep.subr.bf16.mxu0 %v8653_v4  ;;  %v8693_v3 = vld [vmem:[%s11851_s1 + $0x1588] ss:$16 sps:$4 sm:$0xff]   ;;  %v8707_v17 = vld [vmem:[%s11851_s1 + $0x154c] ss:$16 sps:$4 sm:$0xff]  }
 0x2d1   :  { %5804 = vmatprep.subr.bf16.mxu1 %v8656_v14  ;;  %v8696_v4 = vld [vmem:[%s11851_s1 + $0x1788] ss:$16 sps:$4 sm:$0xff]   ;;  %v5145_v14 = vadd.f32 %v10543_v29, %v5102_v32  ;;  %v8710_v29 = vld [vmem:[%s11851_s1 + $0x174c] ss:$16 sps:$4 sm:$0xff]  }
 0x2d2   :  { %v8746_v13 = vld [vmem:[%s11854_s3 + $0x4] ss:$8 sps:$4 sm:$0xff]   ;;  %v8744_v32 = vld [vmem:[%s11854_s3] ss:$8 sps:$4 sm:$0xff]  }
 0x2d3   :  { %5762 = vmatpush1.bf16.msra.mxu0 %v8651_v15  ;;  %v5192_v15 = vadd.f32 %v10942_v33, %v5149_v11  ;;  %v5188_v33 = vadd.f32 %v10751_v51, %v5145_v14  ;;  %v8716_v51 = vld [vmem:[%s11851_s1 + $0x172c] ss:$16 sps:$4 sm:$0xff]  }
 0x2d4   :  { %5805 = vmatpush1.bf16.msra.mxu1 %v8654_v20  ;;  %5763 = vmatprep.subr.bf16.mxu0 %v8659_v46  ;;  %v8699_v20 = vld [vmem:[%s11851_s1 + $0x1568] ss:$16 sps:$4 sm:$0xff]   ;;  %v8791_v11 = vld [vmem:[%s11854_s3 + $0x114] ss:$8 sps:$4 sm:$0xff]   ;;  %v8752_v14 = vld [vmem:[%s11854_s3 + $0xe4] ss:$8 sps:$4 sm:$0xff]  }
 0x2d5   :  { %5806 = vmatprep.subr.bf16.mxu1 %v8662_v47  ;;  %v8702_v46 = vld [vmem:[%s11851_s1 + $0x1768] ss:$16 sps:$4 sm:$0xff]   ;;  %v5277_v47 = vpop.f32.mrf.mxu0 }
 0x2d7   :  { %5764 = vmatpush1.bf16.msra.mxu0 %v8657_v25  ;;  %v5235_v25 = vadd.f32 %v10944_v35, %v5192_v15  ;;  %v5231_v35 = vadd.f32 %v10753_v44, %v5188_v33  ;;  %v8719_v44 = vld [vmem:[%s11851_s1 + $0x150c] ss:$16 sps:$4 sm:$0xff]   ;;  %v8789_v15 = vld [vmem:[%s11854_s3 + $0x110] ss:$8 sps:$4 sm:$0xff]  }
 0x2d8   :  { %5807 = vmatpush1.bf16.msra.mxu1 %v8660_v10  ;;  %5765 = vmatprep.subr.bf16.mxu0 %v8665_v53  ;;  %v8705_v10 = vld [vmem:[%s11851_s1 + $0x1548] ss:$16 sps:$4 sm:$0xff]  }
 0x2d9   :  { %5808 = vmatprep.subr.bf16.mxu1 %v8668_v55  ;;  %v8708_v53 = vld [vmem:[%s11851_s1 + $0x1748] ss:$16 sps:$4 sm:$0xff]   ;;  %v8713_v55 = vld [vmem:[%s11851_s1 + $0x152c] ss:$16 sps:$4 sm:$0xff]   ;;  %v5278_v37 = vadd.f32 %v5277_v47, %v5235_v25  ;;  %v5274_v38 = vadd.f32 %v10961_v9, %v5231_v35 }
 0x2da   :  { %v8722_v9 = vld [vmem:[%s11851_s1 + $0x170c] ss:$16 sps:$4 sm:$0xff]   ;;  %v8753_v33 = vld [vmem:[%s11854_s3 + $0xd0] ss:$8 sps:$4 sm:$0xff]   ;;  %v8798_v35 = vld [vmem:[%s11854_s3 + $0x1e0] ss:$8 sps:$4 sm:$0xff]  }
 0x2db   :  { %5766 = vmatpush1.bf16.msra.mxu0 %v8663_v42  ;;  %v8711_v42 = vld [vmem:[%s11851_s1 + $0x1528] ss:$16 sps:$4 sm:$0xff]   ;;  %v5317_v8 = vadd.f32 %v10963_v6, %v5274_v38  ;;  %v8797_v47 = vld [vmem:[%s11854_s3 + $0x1f4] ss:$8 sps:$4 sm:$0xff]   ;;  %v8758_v25 = vld [vmem:[%s11854_s3 + $0xc4] ss:$8 sps:$4 sm:$0xff]  }
 0x2dc   :  { %5809 = vmatpush1.bf16.msra.mxu1 %v8666_v45  ;;  %5767 = vmatprep.subr.bf16.mxu0 %v8671_v52  ;;  %v8714_v45 = vld [vmem:[%s11851_s1 + $0x1728] ss:$16 sps:$4 sm:$0xff]   ;;  %v5320_v52 = vpop.f32.mrf.mxu1  ;;  %v8803_v38 = vld [vmem:[%s11854_s3 + $0x1d4] ss:$8 sps:$4 sm:$0xff]  }
 0x2dd   :  { %5810 = vmatprep.subr.bf16.mxu1 %v8674_v23  ;;  %v5321_v23 = vadd.f32 %v5320_v52, %v5278_v37  ;;  %v8723_v6 = vld [vmem:[%s11854_s3 + $0x70] ss:$8 sps:$4 sm:$0xff]   ;;  %v8762_v52 = vld [vmem:[%s11854_s3 + $0xa0] ss:$8 sps:$4 sm:$0xff]  }
 0x2de   :  { %v8759_v37 = vld [vmem:[%s11854_s3 + $0xb0] ss:$8 sps:$4 sm:$0xff]  }
 0x2df   :  { %5768 = vmatpush1.bf16.msra.mxu0 %v8669_v49  ;;  %v8720_v49 = vld [vmem:[%s11851_s1 + $0x1708] ss:$16 sps:$4 sm:$0xff]  }
 0x2e0   :  { %5811 = vmatpush1.bf16.msra.mxu1 %v8672_v54  ;;  %5769 = vmatprep.subr.bf16.mxu0 %v8677_v56  ;;  %v8725_v54 = vld [vmem:[%s11854_s3 + $0x74] ss:$8 sps:$4 sm:$0xff]   ;;  %v5844_v56 = vmax.f32 %v5321_v23, 0.0  ;;  %v8804_v23 = vld [vmem:[%s11854_s3 + $0x1c0] ss:$8 sps:$4 sm:$0xff]  }
 0x2e1   :  { %5812 = vmatprep.subr.bf16.mxu1 %v8680_v26  ;;  %v5840_v26 = vmax.f32 %v5317_v8, 0.0  ;;  %v8765_v8 = vld [vmem:[%s11854_s3 + $0x90] ss:$8 sps:$4 sm:$0xff]  }
 0x2e3   :  { %5770 = vmatpush2.bf16.msra.mxu0 %v8675_v41  ;;  %v5848_v61 = vpack.c.bf16 %v5844_v56, %v5840_v26  ;;  %v8731_v41 = vld [vmem:[%s11854_s3 + $0x54] ss:$8 sps:$4 sm:$0xff]   ;;  %v8807_v56 = vld [vmem:[%s11854_s3 + $0x1b0] ss:$8 sps:$4 sm:$0xff]   ;;  %v8812_v26 = vld [vmem:[%s11854_s3 + $0x1a4] ss:$8 sps:$4 sm:$0xff]  }
 0x2e4   :  { %5813 = vmatpush2.bf16.msra.mxu1 %v8678_v43  ;;  %5771 = vmatprep.subr.bf16.mxu0 %v8683_v27  ;;  %v8729_v43 = vld [vmem:[%s11854_s3 + $0x50] ss:$8 sps:$4 sm:$0xff]  }
 0x2e5   :  { %5814 = vmatprep.subr.bf16.mxu1 %v8686_v39  ;;  %v8771_v27 = vld [vmem:[%s11854_s3 + $0x170] ss:$8 sps:$4 sm:$0xff]   ;;  %v8773_v39 = vld [vmem:[%s11854_s3 + $0x174] ss:$8 sps:$4 sm:$0xff]  }
 0x2e7   :  { %5772 = vmatpush2.bf16.msra.mxu0 %v8681_v18  ;;  %v8735_v18 = vld [vmem:[%s11854_s3 + $0x30] ss:$8 sps:$4 sm:$0xff]  }
 0x2e8   :  { %5815 = vmatpush2.bf16.msra.mxu1 %v8684_v34  ;;  %5773 = vmatprep.subr.bf16.mxu0 %v8689_v60  ;;  %v8779_v34 = vld [vmem:[%s11854_s3 + $0x154] ss:$8 sps:$4 sm:$0xff]   ;;  %v8740_v60 = vld [vmem:[%s11854_s3 + $0x24] ss:$8 sps:$4 sm:$0xff]  }
 0x2e9   :  { %5816 = vmatprep.subr.bf16.mxu1 %v8692_v40  ;;  %v8777_v40 = vld [vmem:[%s11854_s3 + $0x150] ss:$8 sps:$4 sm:$0xff]  }
 0x2eb   :  { %5774 = vmatpush2.bf16.msra.mxu0 %v8687_v22  ;;  %v8743_v22 = vld [vmem:[%s11854_s3 + $0x14] ss:$8 sps:$4 sm:$0xff]  }
 0x2ec   :  { %5817 = vmatpush2.bf16.msra.mxu1 %v8690_v62  ;;  %5775 = vmatprep.subr.bf16.mxu0 %v8695_v0  ;;  %v8780_v62 = vld [vmem:[%s11854_s3 + $0x140] ss:$8 sps:$4 sm:$0xff]   ;;  %v8741_v0 = vld [vmem:[%s11854_s3 + $0x10] ss:$8 sps:$4 sm:$0xff]  }
 0x2ed   :  { %5818 = vmatprep.subr.bf16.mxu1 %v8698_v1  ;;  %v8785_v1 = vld [vmem:[%s11854_s3 + $0x134] ss:$8 sps:$4 sm:$0xff]  }
 0x2ef   :  { %5776 = vmatpush2.bf16.msra.mxu0 %v8693_v3  ;;  %v8788_v3 = vld [vmem:[%s11854_s3 + $0x124] ss:$8 sps:$4 sm:$0xff]  }
 0x2f0   :  { %5819 = vmatpush2.bf16.msra.mxu1 %v8696_v4  ;;  %5777 = vmatprep.subr.bf16.mxu0 %v8701_v2  ;;  %v8749_v4 = vld [vmem:[%s11854_s3 + $0xf4] ss:$8 sps:$4 sm:$0xff]   ;;  %v8786_v2 = vld [vmem:[%s11854_s3 + $0x120] ss:$8 sps:$4 sm:$0xff]  }
 0x2f1   :  { %5820 = vmatprep.subr.bf16.mxu1 %v8704_v36  ;;  %v8747_v36 = vld [vmem:[%s11854_s3 + $0xf0] ss:$8 sps:$4 sm:$0xff]  }
 0x2f3   :  { %5778 = vmatpush2.bf16.msra.mxu0 %v8699_v20  ;;  %v8750_v20 = vld [vmem:[%s11854_s3 + $0xe0] ss:$8 sps:$4 sm:$0xff]  }
 0x2f4   :  { %5821 = vmatpush2.bf16.msra.mxu1 %v8702_v46  ;;  %5779 = vmatprep.subr.bf16.mxu0 %v8707_v17  ;;  %v8794_v46 = vld [vmem:[%s11854_s3 + $0x104] ss:$8 sps:$4 sm:$0xff]   ;;  %v8755_v17 = vld [vmem:[%s11854_s3 + $0xd4] ss:$8 sps:$4 sm:$0xff]  }
 0x2f5   :  { %5822 = vmatprep.subr.bf16.mxu1 %v8710_v29  ;;  %v8792_v29 = vld [vmem:[%s11854_s3 + $0x100] ss:$8 sps:$4 sm:$0xff]  }
 0x2f7   :  { %5780 = vmatpush2.bf16.msra.mxu0 %v8705_v10  ;;  %v8795_v10 = vld [vmem:[%s11854_s3 + $0x1f0] ss:$8 sps:$4 sm:$0xff]  }
 0x2f8   :  { %5823 = vmatpush2.bf16.msra.mxu1 %v8708_v53  ;;  %5781 = vmatprep.subr.bf16.mxu0 %v8713_v55  ;;  %v8756_v53 = vld [vmem:[%s11854_s3 + $0xc0] ss:$8 sps:$4 sm:$0xff]   ;;  %v8800_v55 = vld [vmem:[%s11854_s3 + $0x1e4] ss:$8 sps:$4 sm:$0xff]  }
 0x2f9   :  { %5824 = vmatprep.subr.bf16.mxu1 %v8716_v51  ;;  %v8761_v51 = vld [vmem:[%s11854_s3 + $0xb4] ss:$8 sps:$4 sm:$0xff]  }
 0x2fb   :  { %5782 = vmatpush2.bf16.msra.mxu0 %v8711_v42  ;;  %v8764_v42 = vld [vmem:[%s11854_s3 + $0xa4] ss:$8 sps:$4 sm:$0xff]  }
 0x2fc   :  { %5825 = vmatpush2.bf16.msra.mxu1 %v8714_v45  ;;  %5783 = vmatprep.subr.bf16.mxu0 %v8719_v44  ;;  %v8801_v45 = vld [vmem:[%s11854_s3 + $0x1d0] ss:$8 sps:$4 sm:$0xff]   ;;  %v8806_v44 = vld [vmem:[%s11854_s3 + $0x1c4] ss:$8 sps:$4 sm:$0xff]  }
 0x2fd   :  { %5826 = vmatprep.subr.bf16.mxu1 %v8722_v9  ;;  %v8767_v9 = vld [vmem:[%s11854_s3 + $0x94] ss:$8 sps:$4 sm:$0xff]  }
 0x2ff   :  { %5784 = vmatpush2.bf16.msra.mxu0 %v8717_v48  ;;  %v8770_v48 = vld [vmem:[%s11854_s3 + $0x84] ss:$8 sps:$4 sm:$0xff]  }
 0x300   :  { %5827 = vmatpush2.bf16.msra.mxu1 %v8720_v49  ;;  %6247 = vmatprep.subr.bf16.mxu0 %v8725_v54  ;;  %v8768_v49 = vld [vmem:[%s11854_s3 + $0x80] ss:$8 sps:$4 sm:$0xff]   ;;  %v8809_v54 = vld [vmem:[%s11854_s3 + $0x1b4] ss:$8 sps:$4 sm:$0xff]  }
 0x301   :  { %6290 = vmatprep.subr.bf16.mxu1 %v8773_v39 }
 0x302   :  { %5786 = vmatmul.mubr.bf16.vlgmr.msra.gmra.mxu0 %v10306_v57  ;;  %v8734_v57 = vld [vmem:[%s11854_s3 + $0x44] ss:$8 sps:$4 sm:$0xff]  }
 0x303   :  { %5829 = vmatmul.mubr.bf16.vlgmr.msra.gmra.mxu1 %v10310_v58  ;;  %6248 = vmatpush1.bf16.msra.mxu0 %v8723_v6  ;;  %v8732_v58 = vld [vmem:[%s11854_s3 + $0x40] ss:$8 sps:$4 sm:$0xff]  }
 0x304   :  { %6279 = vmatprep.mubr.bf16.mxu0 %v5848_v61  ;;  %6249 = vmatprep.subr.bf16.mxu0 %v8728_v24  ;;  %v8810_v6 = vld [vmem:[%s11854_s3 + $0x1a0] ss:$8 sps:$4 sm:$0xff]   ;;  %v8815_v24 = vld [vmem:[%s11854_s3 + $0x194] ss:$8 sps:$4 sm:$0xff]   ;;  %v8818_v61 = vld [vmem:[%s11854_s3 + $0x184] ss:$8 sps:$4 sm:$0xff]  }
 0x305   :  { %6291 = vmatpush1.bf16.msra.mxu1 %v8771_v27 }
 0x306   :  { %6292 = vmatprep.subr.bf16.mxu1 %v8776_v30 }
 0x307   :  { %6250 = vmatpush1.bf16.msra.mxu0 %v8726_v7  ;;  %v8816_v7 = vld [vmem:[%s11854_s3 + $0x180] ss:$8 sps:$4 sm:$0xff]  }
 0x308   :  { %6251 = vmatprep.subr.bf16.mxu0 %v8731_v41  ;;  %v5357_v41 = vpop.f32.mrf.mxu0 }
 0x309   :  { %6293 = vmatpush1.bf16.msra.mxu1 %v8774_v31 }
 0x30a   :  { %6294 = vmatprep.subr.bf16.mxu1 %v8779_v34  ;;  %v8819_v34 = vld [vmem:[%s11855_s5 + $0x78] sm:$0xff]  }
 0x30b   :  { %6252 = vmatpush1.bf16.msra.mxu0 %v8729_v43  ;;  %v5400_v43 = vpop.f32.mrf.mxu1 }
 0x30c   :  { %6253 = vmatprep.subr.bf16.mxu0 %v8734_v57  ;;  %v5359_v57 = vpop.f32.mrf.mxu0 }
 0x30d   :  { %6295 = vmatpush1.bf16.msra.mxu1 %v8777_v40  ;;  %v8821_v40 = vld [vmem:[%s11855_s5 + $0x70] sm:$0xff]  }
 0x30e   :  { %6296 = vmatprep.subr.bf16.mxu1 %v8782_v19  ;;  %v5361_v27 = vpop.f32.mrf.mxu0 }
 0x30f   :  { %6254 = vmatpush1.bf16.msra.mxu0 %v8732_v58  ;;  %v5402_v58 = vpop.f32.mrf.mxu1 }
 0x310   :  { %6255 = vmatprep.subr.bf16.mxu0 %v8737_v28  ;;  %v5363_v28 = vpop.f32.mrf.mxu0 }
 0x311   :  { %6297 = vmatpush1.bf16.msra.mxu1 %v8780_v62  ;;  %v5404_v39 = vpop.f32.mrf.mxu1  ;;  %v8823_v62 = vld [vmem:[%s11855_s5 + $0x68] sm:$0xff]  }
 0x312   :  { %6298 = vmatprep.subr.bf16.mxu1 %v8785_v1  ;;  %v5443_v31 = vpop.f32.mrf.mxu0 }
 0x313   :  { %6256 = vmatpush1.bf16.msra.mxu0 %v8735_v18  ;;  %v5406_v30 = vpop.f32.mrf.mxu1 }
 0x314   :  { %6257 = vmatprep.subr.bf16.mxu0 %v8740_v60  ;;  %v8820_v60 = vld [vmem:[%s11855_s5 + $0x38] sm:$0xff]   ;;  %v5445_v19 = vpop.f32.mrf.mxu0 }
 0x315   :  { %6299 = vmatpush1.bf16.msra.mxu1 %v8783_v16  ;;  %v5486_v18 = vpop.f32.mrf.mxu1  ;;  %v8825_v16 = vld [vmem:[%s11855_s5 + $0x60] sm:$0xff]  }
 0x316   :  { %6300 = vmatprep.subr.bf16.mxu1 %v8788_v3  ;;  %v5447_v1 = vpop.f32.mrf.mxu0  ;;  %v8827_v3 = vld [vmem:[%s11855_s5 + $0x58] sm:$0xff]  }
 0x317   :  { %6258 = vmatpush1.bf16.msra.mxu0 %v8738_v12  ;;  %v8822_v12 = vld [vmem:[%s11855_s5 + $0x30] sm:$0xff]  }
 0x318   :  { %6259 = vmatprep.subr.bf16.mxu0 %v8743_v22  ;;  %v5488_v22 = vpop.f32.mrf.mxu1 }
 0x319   :  { %6301 = vmatpush1.bf16.msra.mxu1 %v8786_v2 }
 0x31a   :  { %6302 = vmatprep.subr.bf16.mxu1 %v8791_v11 }
 0x31b   :  { %6260 = vmatpush1.bf16.msra.mxu0 %v8741_v0  ;;  %v8824_v0 = vld [vmem:[%s11855_s5 + $0x28] sm:$0xff]  }
 0x31c   :  { %6261 = vmatprep.subr.bf16.mxu0 %v8746_v13  ;;  %v5490_v13 = vpop.f32.mrf.mxu1 }
 0x31d   :  { %6303 = vmatpush1.bf16.msra.mxu1 %v8789_v15 }
 0x31e   :  { %6304 = vmatprep.subr.bf16.mxu1 %v8794_v46  ;;  %v5492_v2 = vpop.f32.mrf.mxu1  ;;  %v841_v46 = vsub.s32 3, %v9786_v63 }
 0x31f   :  { %6262 = vmatpush1.bf16.msra.mxu0 %v8744_v32  ;;  %v8826_v32 = vld [vmem:[%s11855_s5 + $0x20] sm:$0xff]  }
 0x320   :  { %6263 = vmatprep.subr.bf16.mxu0 %v8749_v4  ;;  %v5449_v4 = vpop.f32.mrf.mxu0  ;;  %v5572_v11 = vpop.f32.mrf.mxu1 }
 0x321   :  { %6305 = vmatpush1.bf16.msra.mxu1 %v8792_v29 }
 0x322   :  { %6306 = vmatprep.subr.bf16.mxu1 %v8797_v47  ;;  %v842_v47 = vrot.slane %v11420_v59, %v841_v46 }
 0x323   :  { %6264 = vmatpush2.bf16.msra.mxu0 %v8747_v36  ;;  %v5529_v36 = vpop.f32.mrf.mxu0 }
 0x324   :  { %6265 = vmatprep.subr.bf16.mxu0 %v8752_v14  ;;  %v8828_v14 = vld [vmem:[%s11855_s5 + $0x18] sm:$0xff]  }
 0x325   :  { %6307 = vmatpush2.bf16.msra.mxu1 %v8795_v10  ;;  %v5531_v15 = vpop.f32.mrf.mxu0 }
 0x326   :  { %6308 = vmatprep.subr.bf16.mxu1 %v8800_v55 }
 0x327   :  { %6266 = vmatpush2.bf16.msra.mxu0 %v8750_v20  ;;  %v5574_v20 = vpop.f32.mrf.mxu1  ;;  %v5533_v29 = vpop.f32.mrf.mxu0 }
 0x328   :  { %6267 = vmatprep.subr.bf16.mxu0 %v8755_v17  ;;  %v837_v17 = vsub.s32 2, %v9786_v63 }
 0x329   :  { %6309 = vmatpush2.bf16.msra.mxu1 %v8798_v35  ;;  %v5535_v10 = vpop.f32.mrf.mxu0  ;;  %v5360_v35 = vadd.f32 %v5359_v57, %v842_v47 }
 0x32a   :  { %6310 = vmatprep.subr.bf16.mxu1 %v8803_v38 }
 0x32b   :  { %6268 = vmatpush2.bf16.msra.mxu0 %v8753_v33  ;;  %v5576_v33 = vpop.f32.mrf.mxu1 }
 0x32c   :  { %6269 = vmatprep.subr.bf16.mxu0 %v8758_v25  ;;  %v838_v25 = vrot.slane %v11420_v59, %v837_v17 }
 0x32d   :  { %6311 = vmatpush2.bf16.msra.mxu1 %v8801_v45 }
 0x32e   :  { %6312 = vmatprep.subr.bf16.mxu1 %v8806_v44  ;;  %v5362_v38 = vadd.f32 %v5361_v27, %v838_v25  ;;  %v5364_v44 = vadd.f32 %v5363_v28, %v842_v47 }
 0x32f   :  { %6270 = vmatpush2.bf16.msra.mxu0 %v8756_v53  ;;  %v5578_v53 = vpop.f32.mrf.mxu1 }
 0x330   :  { %6271 = vmatprep.subr.bf16.mxu0 %v8761_v51 }
 0x331   :  { %6313 = vmatpush2.bf16.msra.mxu1 %v8804_v23  ;;  %v5405_v23 = vadd.f32 %v5404_v39, %v5362_v38 }
 0x332   :  { %6314 = vmatprep.subr.bf16.mxu1 %v8809_v54 }
 0x333   :  { %6272 = vmatpush2.bf16.msra.mxu0 %v8759_v37  ;;  %v5358_v37 = vadd.f32 %v5357_v41, %v838_v25 }
 0x334   :  { %6273 = vmatprep.subr.bf16.mxu0 %v8764_v42 }
 0x335   :  { %6315 = vmatpush2.bf16.msra.mxu1 %v8807_v56  ;;  %v5407_v56 = vadd.f32 %v5406_v30, %v5364_v44 }
 0x336   :  { %6316 = vmatprep.subr.bf16.mxu1 %v8812_v26  ;;  %v5448_v26 = vadd.f32 %v5447_v1, %v5405_v23 }
 0x337   :  { %6274 = vmatpush2.bf16.msra.mxu0 %v8762_v52  ;;  %v5403_v52 = vadd.f32 %v5402_v58, %v5360_v35 }
 0x338   :  { %6275 = vmatprep.subr.bf16.mxu0 %v8767_v9  ;;  %v5401_v9 = vadd.f32 %v5400_v43, %v5358_v37 }
 0x339   :  { %6317 = vmatpush2.bf16.msra.mxu1 %v8810_v6  ;;  %v5450_v6 = vadd.f32 %v5449_v4, %v5407_v56 }
 0x33a   :  { %6318 = vmatprep.subr.bf16.mxu1 %v8815_v24 }
 0x33b   :  { %6276 = vmatpush2.bf16.msra.mxu0 %v8765_v8  ;;  %v5446_v8 = vadd.f32 %v5445_v19, %v5403_v52  ;;  %v5493_v58 = vadd.f32 %v5492_v2, %v5450_v6  ;;  %v8830_v6 = vld [vmem:[%s11855_s5 + $0x10] sm:$0xff]  }
 0x33c   :  { %6277 = vmatprep.subr.bf16.mxu0 %v8770_v48  ;;  %v5444_v48 = vadd.f32 %v5443_v31, %v5401_v9 }
 0x33d   :  { %v5489_v59 = vadd.f32 %v5488_v22, %v5446_v8  ;;  %v5536_v39 = vadd.f32 %v5535_v10, %v5493_v58  ;;  %v8838_v58 = vld [vmem:[%s11856_s7 + $0x20] sm:$0xff]  }
 0x33e   :  { %v5487_v24 = vadd.f32 %v5486_v18, %v5444_v48 }
 0x33f   :  { %6278 = vmatpush2.bf16.msra.mxu0 %v8768_v49  ;;  %v5532_v41 = vadd.f32 %v5531_v15, %v5489_v59  ;;  %v5579_v22 = vadd.f32 %v5578_v53, %v5536_v39  ;;  %v8829_v59 = vld [vmem:[%s11855_s5 + $0x50] sm:$0xff]   ;;  %v5915_v39 = vld [vmem:[%s11857_s4] sm:$0x3] }
 0x340   :  { %7518 = vmatprep.subr.bf16.mxu0 %v8819_v34  ;;  %v5530_v57 = vadd.f32 %v5529_v36, %v5487_v24  ;;  %v8831_v24 = vld [vmem:[%s11855_s5 + $0x48] sm:$0xff]  }
 0x341   :  { %v5575_v43 = vadd.f32 %v5574_v20, %v5532_v41  ;;  %v8844_v41 = vmov 0.0  }
 0x342   :  { %6280 = vmatmul.mubr.bf16.vlgmr.msra.gmra.mxu0 %v10998_v21  ;;  %v8813_v21 = vld [vmem:[%s11854_s3 + $0x190] ss:$8 sps:$4 sm:$0xff]   ;;  %v5615_v55 = vpop.f32.mrf.mxu0 }
 0x343   :  { %6319 = vmatpush2.bf16.msra.mxu1 %v8813_v21  ;;  %7519 = vmatpush3.bf16.msra.mxu0 %v8820_v60  ;;  %v5658_v51 = vpop.f32.mrf.mxu1  ;;  %v5573_v60 = vadd.f32 %v5572_v11, %v5530_v57  ;;  %v8835_v57 = vld [vmem:[%s11856_s7 + $0x38] sm:$0xff]  }
 0x344   :  { %6320 = vmatprep.subr.bf16.mxu1 %v8818_v61  ;;  %7520 = vmatprep.subr.bf16.mxu0 %v8821_v40  ;;  %v5617_v42 = vpop.f32.mrf.mxu0 }
 0x345   :  { %v5660_v45 = vpop.f32.mrf.mxu1  ;;  %v5618_v30 = vadd.f32 %v5617_v42, %v5575_v43  ;;  %v5616_v19 = vadd.f32 %v5615_v55, %v5573_v60 }
 0x346   :  { %v5619_v49 = vpop.f32.mrf.mxu0 }
 0x347   :  { %6321 = vmatpush2.bf16.msra.mxu1 %v8816_v7  ;;  %7521 = vmatpush3.bf16.msra.mxu0 %v8822_v12  ;;  %v5662_v54 = vpop.f32.mrf.mxu1  ;;  %v5491_v7 = vadd.f32 %v5490_v13, %v5448_v26  ;;  %v5661_v1 = vadd.f32 %v5660_v45, %v5618_v30 }
 0x348   :  { %7522 = vmatprep.subr.bf16.mxu0 %v8823_v62  ;;  %v5621_v21 = vpop.f32.mrf.mxu0  ;;  %7549 = vmatprep.subr.bf16.mxu1 %v8844_v41 }
 0x349   :  { %v5664_v61 = vpop.f32.mrf.mxu1  ;;  %v5534_v28 = vadd.f32 %v5533_v29, %v5491_v7  ;;  %v5622_v13 = vadd.f32 %v5621_v21, %v5579_v22  ;;  %v8832_v21 = vld [vmem:[%s11855_s5 + $0x8] sm:$0xff]   ;;  %v8834_v7 = vld [vmem:[%s11855_s5] sm:$0xff]  }
 0x34b   :  { %7523 = vmatpush3.bf16.msra.mxu0 %v8824_v0  ;;  %v5577_v12 = vadd.f32 %v5576_v33, %v5534_v28 }
 0x34c   :  { %7524 = vmatprep.subr.bf16.mxu0 %v8825_v16  ;;  %v5659_v16 = vadd.f32 %v5658_v51, %v5616_v19 }
 0x34d   :  { %v5620_v62 = vadd.f32 %v5619_v49, %v5577_v12 }
 0x34f   :  { %7525 = vmatpush3.bf16.msra.mxu0 %v8826_v32  ;;  %v5663_v32 = vadd.f32 %v5662_v54, %v5620_v62 }
 0x350   :  { %7526 = vmatprep.subr.bf16.mxu0 %v8827_v3 }
 0x353   :  { %7527 = vmatpush3.bf16.msra.mxu0 %v8828_v14  ;;  %v5665_v14 = vadd.f32 %v5664_v61, %v5622_v13  ;;  %v8833_v61 = vld [vmem:[%s11855_s5 + $0x40] sm:$0xff]  }
 0x354   :  { %7528 = vmatprep.subr.bf16.mxu0 %v8829_v59 }
 0x357   :  { %7529 = vmatpush3.bf16.msra.mxu0 %v8830_v6 }
 0x358   :  { %7530 = vmatprep.subr.bf16.mxu0 %v8831_v24 }
 0x35b   :  { %7531 = vmatpush3.bf16.msra.mxu0 %v8832_v21 }
 0x35c   :  { %7532 = vmatprep.subr.bf16.mxu0 %v8833_v61 }
 0x35f   :  { %7533 = vmatpush3.bf16.msra.mxu0 %v8834_v7 }
 0x382   :  { %v5701_v27 = vpop.f32.mrf.mxu0 }
 0x383   :  { %v5744_v34 = vpop.f32.mrf.mxu1  ;;  %v5702_v4 = vadd.f32 %v5701_v27, %v5659_v16  ;;  %v8836_v27 = vld [vmem:[%s11856_s7 + $0x30] sm:$0xff]  }
 0x384   :  { %v5703_v31 = vpop.f32.mrf.mxu0 }
 0x385   :  { %v5746_v40 = vpop.f32.mrf.mxu1  ;;  %v5704_v3 = vadd.f32 %v5703_v31, %v5661_v1  ;;  %v5745_v29 = vadd.f32 %v5744_v34, %v5702_v4  ;;  %v8837_v34 = vld [vmem:[%s11856_s7 + $0x28] sm:$0xff]   ;;  %v5924_v31 = vrot.slane %v5915_v39, %v833_v50 }
 0x386   :  { %v5705_v18 = vpop.f32.mrf.mxu0 }
 0x387   :  { %v5748_v0 = vpop.f32.mrf.mxu1  ;;  %v5706_v15 = vadd.f32 %v5705_v18, %v5663_v32  ;;  %v5747_v46 = vadd.f32 %v5746_v40, %v5704_v3  ;;  %v5920_v40 = vrot.slane %v5915_v39, %v829_v5  ;;  %v8839_v5 = vld [vmem:[%s11856_s7 + $0x18] sm:$0xff]  }
 0x388   :  { %v5707_v2 = vpop.f32.mrf.mxu0 }
 0x389   :  { %v5750_v36 = vpop.f32.mrf.mxu1  ;;  %v5708_v17 = vadd.f32 %v5707_v2, %v5665_v14  ;;  %v5749_v25 = vadd.f32 %v5748_v0, %v5706_v15 }
 0x38b   :  { %v5751_v51 = vadd.f32 %v5750_v36, %v5708_v17 }
 0x3c2   :  { %v5787_v11 = vpop.f32.mrf.mxu0 }
 0x3c3   :  { %v5830_v20 = vpop.f32.mrf.mxu1  ;;  %v5788_v53 = vadd.f32 %v5787_v11, %v5745_v29  ;;  %v8840_v11 = vld [vmem:[%s11856_s7 + $0x10] sm:$0xff]  }
 0x3c4   :  { %v5789_v33 = vpop.f32.mrf.mxu0 }
 0x3c5   :  { %v5832_v47 = vpop.f32.mrf.mxu1  ;;  %v5790_v10 = vadd.f32 %v5789_v33, %v5747_v46  ;;  %v5831_v44 = vadd.f32 %v5830_v20, %v5788_v53  ;;  %v8841_v20 = vld [vmem:[%s11856_s7 + $0x8] sm:$0xff]   ;;  %v8842_v46 = vld [vmem:[%s11856_s7] sm:$0xff]  }
 0x3c6   :  { %v5791_v55 = vpop.f32.mrf.mxu0 }
 0x3c7   :  { %v5834_v35 = vpop.f32.mrf.mxu1  ;;  %v5792_v37 = vadd.f32 %v5791_v55, %v5749_v25  ;;  %v5833_v42 = vadd.f32 %v5832_v47, %v5790_v10  ;;  %v5841_v54 = vmax.f32 %v5831_v44, 0.0  ;;  %v7492_v47 = vld [vmem:[%s11858_s6] ss:$0 sm:$0xff] }
 0x3c8   :  { %v5793_v38 = vpop.f32.mrf.mxu0 }
 0x3c9   :  { %v5835_v45 = vadd.f32 %v5834_v35, %v5792_v37  ;;  %v5794_v52 = vadd.f32 %v5793_v38, %v5751_v51  ;;  %v5836_v9 = vpop.f32.mrf.mxu1  ;;  %v5842_v48 = vmax.f32 %v5833_v42, 0.0  ;;  %v7509_v42 = vld [vmem:[%s11859_s8] ss:$0 sm:$0xff] }
 0x3cb   :  { %v5837_v23 = vadd.f32 %v5836_v9, %v5794_v52  ;;  %v5845_v8 = vmax.f32 %v5835_v45, 0.0 }
 0x3cd   :  { %v5846_v49 = vmax.f32 %v5837_v23, 0.0  ;;  %v5849_v26 = vpack.c.bf16 %v5845_v8, %v5841_v54 }
 0x3cf   :  { %v5850_v56 = vpack.c.bf16 %v5846_v49, %v5842_v48 }
 0x3d1   :  { %6322 = vmatprep.mubr.bf16.mxu1 %v5850_v56 }
 0x3d2   :  { %6323 = vmatmul.mubr.bf16.vlgmr.msra.gmra.mxu1 %v5849_v26 }
 0x3d3   :  { %7550 = vmatpush3.bf16.msra.mxu1 %v8835_v57  ;;  %7565 = vmatprep.mubr.msk.bf16.mxu1 %vm8845_vm0, %v8844_v41 }
 0x3d4   :  { %7551 = vmatprep.subr.bf16.mxu1 %v8844_v41 }
 0x3d7   :  { %7552 = vmatpush3.bf16.msra.mxu1 %v8836_v27 }
 0x3d8   :  { %7553 = vmatprep.subr.bf16.mxu1 %v8844_v41 }
 0x3db   :  { %7554 = vmatpush3.bf16.msra.mxu1 %v8837_v34 }
 0x3dc   :  { %7555 = vmatprep.subr.bf16.mxu1 %v8844_v41 }
 0x3df   :  { %7556 = vmatpush3.bf16.msra.mxu1 %v8838_v58 }
 0x3e0   :  { %7557 = vmatprep.subr.bf16.mxu1 %v8844_v41 }
 0x3e3   :  { %7558 = vmatpush3.bf16.msra.mxu1 %v8839_v5 }
 0x3e4   :  { %7559 = vmatprep.subr.bf16.mxu1 %v8844_v41 }
 0x3e7   :  { %7560 = vmatpush3.bf16.msra.mxu1 %v8840_v11 }
 0x3e8   :  { %7561 = vmatprep.subr.bf16.mxu1 %v8844_v41 }
 0x3eb   :  { %7562 = vmatpush3.bf16.msra.mxu1 %v8841_v20 }
 0x3ec   :  { %7563 = vmatprep.subr.bf16.mxu1 %v8844_v41 }
 0x3ef   :  { %7564 = vmatpush3.bf16.msra.mxu1 %v8842_v46 }
 0x402   :  { %v6281_v28 = vpop.f32.mrf.mxu0 }
 0x403   :  { %v6282_v18 = vadd.f32 %v6281_v28, %v5920_v40 }
 0x404   :  { %v6283_v43 = vpop.f32.mrf.mxu0 }
 0x405   :  { %v6284_v22 = vadd.f32 %v6283_v43, %v5924_v31 }
 0x406   :  { %v6285_v60 = vpop.f32.mrf.mxu0 }
 0x407   :  { %v6286_v62 = vadd.f32 %v6285_v60, %v5920_v40 }
 0x408   :  { %v6287_v30 = vpop.f32.mrf.mxu0 }
 0x409   :  { %v6288_v1 = vadd.f32 %v6287_v30, %v5924_v31 }
 0x492   :  { %v6324_v12 = vpop.f32.mrf.mxu1 }
 0x493   :  { %v6325_v32 = vadd.f32 %v6324_v12, %v6282_v18 }
 0x494   :  { %v6326_v19 = vpop.f32.mrf.mxu1 }
 0x495   :  { %v6327_v13 = vadd.f32 %v6326_v19, %v6284_v22  ;;  %v6333_v50 = vmax.f32 %v6325_v32, 0.0 }
 0x496   :  { %v6328_v0 = vpop.f32.mrf.mxu1 }
 0x497   :  { %v6329_v16 = vadd.f32 %v6328_v0, %v6286_v62  ;;  %v6334_v36 = vmax.f32 %v6327_v13, 0.0 }
 0x498   :  { %v6330_v3 = vpop.f32.mrf.mxu1 }
 0x499   :  { %v6331_v4 = vadd.f32 %v6330_v3, %v6288_v1  ;;  %v6335_v2 = vmax.f32 %v6329_v16, 0.0 }
 0x49b   :  { %v6336_v14 = vmax.f32 %v6331_v4, 0.0  ;;  %v6337_v63 = vpack.c.bf16 %v6335_v2, %v6333_v50 }
 0x49d   :  { %v6338_v15 = vpack.c.bf16 %v6336_v14, %v6334_v36 }
 0x49f   :  { %6506 = vmatprep.mubr.bf16.mxu0 %v6338_v15 }
 0x4a0   :  { %6507 = vmatmul.mubr.bf16.vlgmr.msra.gmra.mxu0 %v6337_v63 }
 0x560   :  { %v7534_v17 = vpop.f32.mrf.mxu0 }
 0x562   :  { %v7535_v29 = vpop.f32.mrf.mxu0 }
 0x563   :  { %v7536_v33 = vadd.f32 %v7535_v29, %v7534_v17 }
 0x564   :  { %v7537_v25 = vpop.f32.mrf.mxu0 }
 0x565   :  { %v6509_v53 = vadd.f32 %v7536_v33, %v7492_v47 }
 0x566   :  { %v7538_v10 = vpop.f32.mrf.mxu0 }
 0x567   :  { %v7539_v55 = vadd.f32 %v7538_v10, %v7537_v25  ;;  %v6515_v51 = vmax.f32 %v6509_v53, 0.0 }
 0x569   :  { %v6512_v35 = vadd.f32 %v7539_v55, %v7492_v47 }
 0x56b   :  { %v6516_v37 = vmax.f32 %v6512_v35, 0.0 }
 0x56d   :  { %v6517_v38 = vpack.c.bf16 %v6516_v37, %v6515_v51 }
 0x56f   :  { %7566 = vmatmul.mubr.bf16.vlgmr.msra.gmra.mxu1 %v6517_v38 }
 0x62f   :  { %v6623_v45 = vpop.f32.mrf.mxu1 }
 0x630   :  { %v6624_v52 = vadd.f32 %v7509_v42, %v6623_v45 }
 0x631   :  { %v7567_v44 = vpop.f32.mrf.mxu1 }
 0x632   :  { %6630 = vst [vmem:[%s11860_s9] sm:$0xff] %v6624_v52 }
 0x633   :  { %v6626_v9 = vpop.f32.mrf.mxu1 }
 0x634   :  { %v6627_v23 = vadd.f32 %v7509_v42, %v6626_v9 }
 0x635   :  { %v7568_v8 = vpop.f32.mrf.mxu1 }
 0x636   :  { %6631 = vst [vmem:[%s11860_s9 + $0x8] sm:$0xff] %v6627_v23 }

</bundles_post_ra>
